<compile_context>
chip_gen: v7x
topology: tpu7x:2x2x1
jax: 0.10.0
libtpu: 0.0.40
codegen_flags: <defaults>
</compile_context>

<pallas_src>
import functools

import jax
import jax.numpy as jnp
from jax.experimental import pallas as pl
from jax.experimental.pallas import tpu as pltpu

K = 5          # conv kernel size (fixed by the module)
LATENT = 120   # fc1 output dim (fixed by the module)


def _round_up(x, m):
    return ((x + m - 1) // m) * m


# ----------------------------------------------------------------------------
# Fused kernel: one grid step == one batch tile. Every stage is a single GEMM.
# ----------------------------------------------------------------------------
def _fused_cnn_kernel(x_ref, w1_ref, b1_ref, w2_ref, b2_ref, w3_ref, b3_ref,
                      w4_ref, b4_ref, o_ref, *, pool1_cols, pool2_cols):
    # x_ref : (B, C_in*H*W)           bf16, NCHW-flattened raw images
    # w1_ref: (C_in*H*W, 4*C1*P1*P1)  bf16, conv1(+bn1) dense Toeplitz,
    #                                  N dim = (pool phase, c, i, j)
    # w2_ref: (C1*P1*P1, 4*C2*P2*P2)  bf16, conv2(+bn2) dense Toeplitz
    # w3_ref: (C2*P2*P2, LATENT)      bf16, fc1(+bn3) (NCHW flatten matches)
    # w4_ref: (LATENT, OUT_PAD)       bf16, classifier, zero-padded to 128 lanes
    # b*_ref: (1, ...)                f32 folded biases;  o_ref: (B, OUT_PAD) f32

    # conv1 + bn1: one GEMM; the four 2x2 pooling phases live in the N dim.
    y1 = jnp.dot(x_ref[...], w1_ref[...], preferred_element_type=jnp.float32)
    c = pool1_cols
    pool1 = jnp.maximum(jnp.maximum(y1[:, 0 * c:1 * c], y1[:, 1 * c:2 * c]),
                        jnp.maximum(y1[:, 2 * c:3 * c], y1[:, 3 * c:4 * c]))
    pool1 = jnp.maximum(pool1 + b1_ref[...], 0.0).astype(jnp.bfloat16)

    # conv2 + bn2: one GEMM on the pooled map, then the 2x2 max-pool.
    y2 = jnp.dot(pool1, w2_ref[...], preferred_element_type=jnp.float32)
    c = pool2_cols
    pool2 = jnp.maximum(jnp.maximum(y2[:, 0 * c:1 * c], y2[:, 1 * c:2 * c]),
                        jnp.maximum(y2[:, 2 * c:3 * c], y2[:, 3 * c:4 * c]))
    pool2 = jnp.maximum(pool2 + b2_ref[...], 0.0).astype(jnp.bfloat16)

    # fc1 + bn3 + relu.
    hid = jnp.dot(pool2, w3_ref[...], preferred_element_type=jnp.float32)
    hid = jnp.maximum(hid + b3_ref[...], 0.0).astype(jnp.bfloat16)

    # classifier (output lanes zero-padded to 128 -> unmasked full-lane stores).
    o_ref[...] = (jnp.dot(hid, w4_ref[...], preferred_element_type=jnp.float32)
                  + b4_ref[...])


# ----------------------------------------------------------------------------
# Weight-only preprocessing (cheap XLA glue; in deployment precompute once).
# ----------------------------------------------------------------------------
def _fold_bn(gamma, beta, mean, var, eps=1e-5):
    scale = gamma / jnp.sqrt(var + eps)
    shift = beta - mean * scale
    return scale, shift


def _conv_as_dense(w, in_hw, pool_out, pad):
    """Lower a KxK conv (+ 2x2 floor max-pool phase split) to a dense matrix.

    w: (C_out, C_in, K, K) conv weight (BN scale already folded in).
    Returns W of shape (C_in*in_hw*in_hw, 4*C_out*pool_out*pool_out) with
      rows ordered (ci, h, w)                 [NCHW flatten of the input]
      cols ordered (ph_h, ph_w, co, i, j)     [pool phase, NCHW of pooled map]
    so that x_flat @ W gives the conv output at (2i+ph_h, 2j+ph_w) for co.
    """
    c_out, c_in = w.shape[0], w.shape[1]
    src = jnp.arange(in_hw)                       # input coordinate
    pos = jnp.arange(pool_out)                    # pooled output coordinate
    ph = jnp.arange(2)                            # pooling phase
    out_coord = 2 * pos[None, :] + ph[:, None]    # (2, pool_out) conv-out coord
    k = src[:, None, None] - out_coord[None, :, :] + pad   # (in_hw, 2, pool_out)
    valid = (k >= 0) & (k < K)
    kc = jnp.clip(k, 0, K - 1)

    # g[co, ci, h, ph_h, i, w, ph_w, j] = w[co, ci, kc[h,ph_h,i], kc[w,ph_w,j]]
    g = w[:, :, kc, :][..., kc]
    mask = valid[:, :, :, None, None, None] & valid[None, None, None, :, :, :]
    g = g * mask[None, None].astype(g.dtype)
    # -> rows (ci, h, w), cols (ph_h, ph_w, co, i, j)
    g = jnp.transpose(g, (1, 2, 5, 3, 6, 0, 4, 7))
    return g.reshape(c_in * in_hw * in_hw, 4 * c_out * pool_out * pool_out)


# ----------------------------------------------------------------------------
# pallas_call wrapper
# ----------------------------------------------------------------------------
@functools.partial(jax.jit, static_argnames=("n_kernels",))
def simple_cnn2_forward(params, x, n_kernels):
    prm = params
    n, c_in, hin, win = x.shape
    assert hin == win, "square inputs only"
    c1 = n_kernels
    c2 = 2 * n_kernels
    latent = prm["fc1_b"].shape[0]
    out_dim = prm["cls_b"].shape[0]

    conv1_out = hin               # k=5, pad=2, stride=1
    p1 = conv1_out // 2           # pool1 output size
    conv2_out = p1 - K + 1        # valid conv
    p2 = conv2_out // 2           # pool2 output size
    assert p1 >= K and p2 >= 1, "input too small for this architecture"

    # ---- fold BatchNorm (eval mode) into conv / fc weights and biases ------
    s1, t1 = _fold_bn(prm["bn1_gamma"], prm["bn1_beta"], prm["bn1_mean"], prm["bn1_var"])
    s2, t2 = _fold_bn(prm["bn2_gamma"], prm["bn2_beta"], prm["bn2_mean"], prm["bn2_var"])
    s3, t3 = _fold_bn(prm["bn3_gamma"], prm["bn3_beta"], prm["bn3_mean"], prm["bn3_var"])

    w1s = prm["conv1_w"] * s1[:, None, None, None]
    w2s = prm["conv2_w"] * s2[:, None, None, None]

    # ---- dense Toeplitz conv matrices + folded biases (bf16 MXU operands) --
    W1 = _conv_as_dense(w1s, hin, p1, pad=2).astype(jnp.bfloat16)
    W2 = _conv_as_dense(w2s, p1, p2, pad=0).astype(jnp.bfloat16)
    b1 = jnp.repeat(prm["conv1_b"] * s1 + t1, p1 * p1).reshape(1, -1)   # (1, c1*p1*p1)
    b2 = jnp.repeat(prm["conv2_b"] * s2 + t2, p2 * p2).reshape(1, -1)   # (1, c2*p2*p2)

    # fc1: kernel's pooled features are already in PyTorch's NCHW flatten order.
    W3 = (prm["fc1_w"].T * s3).astype(jnp.bfloat16)                     # (c2*p2*p2, latent)
    b3 = (prm["fc1_b"] * s3 + t3).reshape(1, latent)

    out_pad = _round_up(out_dim, 128)                                   # lane-dense output
    W4 = jnp.zeros((latent, out_pad), jnp.float32).at[:, :out_dim].set(prm["cls_w"].T)
    W4 = W4.astype(jnp.bfloat16)
    b4 = jnp.zeros((1, out_pad), jnp.float32).at[0, :out_dim].set(prm["cls_b"])

    # ---- input: flatten NCHW, pad features to a lane multiple, cast bf16 ---
    in_feat = c_in * hin * win
    feat_pad = _round_up(in_feat, 128)
    x_flat = x.reshape(n, in_feat).astype(jnp.bfloat16)
    if feat_pad != in_feat:
        x_flat = jnp.pad(x_flat, ((0, 0), (0, feat_pad - in_feat)))
        W1 = jnp.pad(W1, ((0, feat_pad - in_feat), (0, 0)))

    # ---- batch tiling -------------------------------------------------------
    b_tile = n if n <= 128 else 128
    n_pad = _round_up(n, b_tile)
    if n_pad != n:
        x_flat = jnp.pad(x_flat, ((0, n_pad - n), (0, 0)))

    kernel = functools.partial(_fused_cnn_kernel,
                               pool1_cols=c1 * p1 * p1,
                               pool2_cols=c2 * p2 * p2)

    def _whole(arr):   # full-array block, resident across the whole grid
        return pl.BlockSpec(arr.shape, lambda b: (0, 0))

    out = pl.pallas_call(
        kernel,
        out_shape=jax.ShapeDtypeStruct((n_pad, out_pad), jnp.float32),
        grid=(n_pad // b_tile,),
        in_specs=[
            pl.BlockSpec((b_tile, feat_pad), lambda b: (b, 0)),
            _whole(W1), _whole(b1),
            _whole(W2), _whole(b2),
            _whole(W3), _whole(b3),
            _whole(W4), _whole(b4),
        ],
        out_specs=pl.BlockSpec((b_tile, out_pad), lambda b: (b, 0)),
        compiler_params=pltpu.CompilerParams(
            dimension_semantics=("parallel",),
            vmem_limit_bytes=32 * 1024 * 1024),
    )(x_flat, W1, b1, W2, b2, W3, b3, W4, b4)
    return out[:n, :out_dim]


# ----------------------------------------------------------------------------
# Parameter init (matches the PyTorch module's shapes; BN in eval mode)
# ----------------------------------------------------------------------------
def init_params(key, in_channels, input_size, n_kernels, out_dim):
    conv1_out = (input_size - K + 2 * 2) + 1
    pool1_out = conv1_out // 2
    conv2_out = (pool1_out - K) + 1
    pool2_out = conv2_out // 2
    flattened = 2 * n_kernels * pool2_out * pool2_out

    keys = jax.random.split(key, 8)
    p = {}
    p["conv1_w"] = 0.05 * jax.random.normal(keys[0], (n_kernels, in_channels, K, K), jnp.float32)
    p["conv1_b"] = 0.05 * jax.random.normal(keys[1], (n_kernels,), jnp.float32)
    p["conv2_w"] = 0.05 * jax.random.normal(keys[2], (2 * n_kernels, n_kernels, K, K), jnp.float32)
    p["conv2_b"] = 0.05 * jax.random.normal(keys[3], (2 * n_kernels,), jnp.float32)
    p["fc1_w"] = 0.05 * jax.random.normal(keys[4], (LATENT, flattened), jnp.float32)
    p["fc1_b"] = 0.05 * jax.random.normal(keys[5], (LATENT,), jnp.float32)
    p["cls_w"] = 0.05 * jax.random.normal(keys[6], (out_dim, LATENT), jnp.float32)
    p["cls_b"] = 0.05 * jax.random.normal(keys[7], (out_dim,), jnp.float32)

    # BatchNorm params, eval mode (fresh running stats, unit gamma, zero beta)
    for name, dim in (("bn1", n_kernels), ("bn2", 2 * n_kernels), ("bn3", LATENT)):
        p[f"{name}_gamma"] = jnp.ones((dim,), jnp.float32)
        p[f"{name}_beta"] = jnp.zeros((dim,), jnp.float32)
        p[f"{name}_mean"] = jnp.zeros((dim,), jnp.float32)
        p[f"{name}_var"] = jnp.ones((dim,), jnp.float32)
    return p


if __name__ == "__main__":
    # Small, module-consistent shapes: batch=2, in_channels=3, input_size=16,
    # n_kernels=8, out_dim=1.
    batch, in_channels, input_size, n_kernels, out_dim = 2, 3, 16, 8, 1

    key = jax.random.PRNGKey(0)
    pkey, xkey = jax.random.split(key)
    params = init_params(pkey, in_channels, input_size, n_kernels, out_dim)
    x = jax.random.normal(xkey, (batch, in_channels, input_size, input_size), jnp.float32)

    out = simple_cnn2_forward(params, x, n_kernels=n_kernels)
    out = jax.block_until_ready(out)
    assert out.shape == (batch, out_dim), out.shape
    assert bool(jnp.all(jnp.isfinite(out)))
    print("KERNEL_OK")
</pallas_src>

<mosaic_0001>
module attributes {stable_mosaic.version = 11 : i64} {
  func.func @_fused_cnn_kernel(%arg0: i32, %arg1: memref<2x768xbf16, #tpu.memory_space<vmem>>, %arg2: memref<768x2048xbf16, #tpu.memory_space<vmem>>, %arg3: memref<1x512xf32, #tpu.memory_space<vmem>>, %arg4: memref<512x256xbf16, #tpu.memory_space<vmem>>, %arg5: memref<1x64xf32, #tpu.memory_space<vmem>>, %arg6: memref<64x120xbf16, #tpu.memory_space<vmem>>, %arg7: memref<1x120xf32, #tpu.memory_space<vmem>>, %arg8: memref<120x128xbf16, #tpu.memory_space<vmem>>, %arg9: memref<1x128xf32, #tpu.memory_space<vmem>>, %arg10: memref<2x128xf32, #tpu.memory_space<vmem>>) attributes {dimension_semantics = [#tpu.dimension_semantics<parallel>], iteration_bounds = array<i64: 1>, scalar_prefetch = 0 : i64, scratch_operands = 0 : i64, tpu.core_type = #tpu.core_type<tc>, window_params = [{transform_indices = @transform_0, window_bounds = array<i64: 2, 768>}, {pipeline_mode = #tpu.pipeline_mode<synchronous>, transform_indices = @transform_1, window_bounds = array<i64: 768, 2048>}, {pipeline_mode = #tpu.pipeline_mode<synchronous>, transform_indices = @transform_2, window_bounds = array<i64: 1, 512>}, {pipeline_mode = #tpu.pipeline_mode<synchronous>, transform_indices = @transform_3, window_bounds = array<i64: 512, 256>}, {pipeline_mode = #tpu.pipeline_mode<synchronous>, transform_indices = @transform_4, window_bounds = array<i64: 1, 64>}, {pipeline_mode = #tpu.pipeline_mode<synchronous>, transform_indices = @transform_5, window_bounds = array<i64: 64, 120>}, {pipeline_mode = #tpu.pipeline_mode<synchronous>, transform_indices = @transform_6, window_bounds = array<i64: 1, 120>}, {pipeline_mode = #tpu.pipeline_mode<synchronous>, transform_indices = @transform_7, window_bounds = array<i64: 120, 128>}, {pipeline_mode = #tpu.pipeline_mode<synchronous>, transform_indices = @transform_8, window_bounds = array<i64: 1, 128>}, {transform_indices = @transform_9, window_bounds = array<i64: 2, 128>}]} {
    %c0 = arith.constant 0 : index
    %c0_0 = arith.constant 0 : index
    %0 = vector.load %arg1[%c0, %c0_0] : memref<2x768xbf16, #tpu.memory_space<vmem>>, vector<2x768xbf16>
    %c0_1 = arith.constant 0 : index
    %c0_2 = arith.constant 0 : index
    %1 = vector.load %arg2[%c0_1, %c0_2] : memref<768x2048xbf16, #tpu.memory_space<vmem>>, vector<768x2048xbf16>
    %cst = arith.constant dense<0.000000e+00> : vector<2x2048xf32>
    %2 = tpu.matmul %0, %1, %cst {dimension_numbers = #tpu.dot_dimension_numbers<[1], [0], [0], [1], [0, 0, 1, 1], [], []>} : vector<2x768xbf16>, vector<768x2048xbf16>, vector<2x2048xf32> -> vector<2x2048xf32>
    %3 = vector.extract_strided_slice %2 {offsets = [0, 0], sizes = [2, 512], strides = [1, 1]} : vector<2x2048xf32> to vector<2x512xf32>
    %4 = vector.extract_strided_slice %2 {offsets = [0, 512], sizes = [2, 512], strides = [1, 1]} : vector<2x2048xf32> to vector<2x512xf32>
    %5 = arith.maximumf %3, %4 : vector<2x512xf32>
    %6 = vector.extract_strided_slice %2 {offsets = [0, 1024], sizes = [2, 512], strides = [1, 1]} : vector<2x2048xf32> to vector<2x512xf32>
    %7 = vector.extract_strided_slice %2 {offsets = [0, 1536], sizes = [2, 512], strides = [1, 1]} : vector<2x2048xf32> to vector<2x512xf32>
    %8 = arith.maximumf %6, %7 : vector<2x512xf32>
    %9 = arith.maximumf %5, %8 : vector<2x512xf32>
    %c0_3 = arith.constant 0 : index
    %c0_4 = arith.constant 0 : index
    %10 = vector.load %arg3[%c0_3, %c0_4] : memref<1x512xf32, #tpu.memory_space<vmem>>, vector<1x512xf32>
    %11 = vector.broadcast %10 : vector<1x512xf32> to vector<2x512xf32>
    %12 = arith.addf %9, %11 : vector<2x512xf32>
    %cst_5 = arith.constant 0.000000e+00 : f32
    %13 = vector.broadcast %cst_5 : f32 to vector<2x512xf32>
    %14 = arith.maximumf %12, %13 : vector<2x512xf32>
    %15 = arith.truncf %14 : vector<2x512xf32> to vector<2x512xbf16>
    %c0_6 = arith.constant 0 : index
    %c0_7 = arith.constant 0 : index
    %16 = vector.load %arg4[%c0_6, %c0_7] : memref<512x256xbf16, #tpu.memory_space<vmem>>, vector<512x256xbf16>
    %cst_8 = arith.constant dense<0.000000e+00> : vector<2x256xf32>
    %17 = tpu.matmul %15, %16, %cst_8 {dimension_numbers = #tpu.dot_dimension_numbers<[1], [0], [0], [1], [0, 0, 1, 1], [], []>} : vector<2x512xbf16>, vector<512x256xbf16>, vector<2x256xf32> -> vector<2x256xf32>
    %18 = vector.extract_strided_slice %17 {offsets = [0, 0], sizes = [2, 64], strides = [1, 1]} : vector<2x256xf32> to vector<2x64xf32>
    %19 = vector.extract_strided_slice %17 {offsets = [0, 64], sizes = [2, 64], strides = [1, 1]} : vector<2x256xf32> to vector<2x64xf32>
    %20 = arith.maximumf %18, %19 : vector<2x64xf32>
    %21 = vector.extract_strided_slice %17 {offsets = [0, 128], sizes = [2, 64], strides = [1, 1]} : vector<2x256xf32> to vector<2x64xf32>
    %22 = vector.extract_strided_slice %17 {offsets = [0, 192], sizes = [2, 64], strides = [1, 1]} : vector<2x256xf32> to vector<2x64xf32>
    %23 = arith.maximumf %21, %22 : vector<2x64xf32>
    %24 = arith.maximumf %20, %23 : vector<2x64xf32>
    %c0_9 = arith.constant 0 : index
    %c0_10 = arith.constant 0 : index
    %25 = vector.load %arg5[%c0_9, %c0_10] : memref<1x64xf32, #tpu.memory_space<vmem>>, vector<1x64xf32>
    %26 = vector.broadcast %25 : vector<1x64xf32> to vector<2x64xf32>
    %27 = arith.addf %24, %26 : vector<2x64xf32>
    %cst_11 = arith.constant 0.000000e+00 : f32
    %28 = vector.broadcast %cst_11 : f32 to vector<2x64xf32>
    %29 = arith.maximumf %27, %28 : vector<2x64xf32>
    %30 = arith.truncf %29 : vector<2x64xf32> to vector<2x64xbf16>
    %c0_12 = arith.constant 0 : index
    %c0_13 = arith.constant 0 : index
    %31 = vector.load %arg6[%c0_12, %c0_13] : memref<64x120xbf16, #tpu.memory_space<vmem>>, vector<64x120xbf16>
    %cst_14 = arith.constant dense<0.000000e+00> : vector<2x120xf32>
    %32 = tpu.matmul %30, %31, %cst_14 {dimension_numbers = #tpu.dot_dimension_numbers<[1], [0], [0], [1], [0, 0, 1, 1], [], []>} : vector<2x64xbf16>, vector<64x120xbf16>, vector<2x120xf32> -> vector<2x120xf32>
    %c0_15 = arith.constant 0 : index
    %c0_16 = arith.constant 0 : index
    %33 = vector.load %arg7[%c0_15, %c0_16] : memref<1x120xf32, #tpu.memory_space<vmem>>, vector<1x120xf32>
    %34 = vector.broadcast %33 : vector<1x120xf32> to vector<2x120xf32>
    %35 = arith.addf %32, %34 : vector<2x120xf32>
    %cst_17 = arith.constant 0.000000e+00 : f32
    %36 = vector.broadcast %cst_17 : f32 to vector<2x120xf32>
    %37 = arith.maximumf %35, %36 : vector<2x120xf32>
    %38 = arith.truncf %37 : vector<2x120xf32> to vector<2x120xbf16>
    %c0_18 = arith.constant 0 : index
    %c0_19 = arith.constant 0 : index
    %39 = vector.load %arg8[%c0_18, %c0_19] : memref<120x128xbf16, #tpu.memory_space<vmem>>, vector<120x128xbf16>
    %cst_20 = arith.constant dense<0.000000e+00> : vector<2x128xf32>
    %40 = tpu.matmul %38, %39, %cst_20 {dimension_numbers = #tpu.dot_dimension_numbers<[1], [0], [0], [1], [0, 0, 1, 1], [], []>} : vector<2x120xbf16>, vector<120x128xbf16>, vector<2x128xf32> -> vector<2x128xf32>
    %c0_21 = arith.constant 0 : index
    %c0_22 = arith.constant 0 : index
    %41 = vector.load %arg9[%c0_21, %c0_22] : memref<1x128xf32, #tpu.memory_space<vmem>>, vector<1x128xf32>
    %42 = vector.broadcast %41 : vector<1x128xf32> to vector<2x128xf32>
    %43 = arith.addf %40, %42 : vector<2x128xf32>
    %c0_23 = arith.constant 0 : index
    %c0_24 = arith.constant 0 : index
    %44 = vector.load %arg10[%c0_23, %c0_24] : memref<2x128xf32, #tpu.memory_space<vmem>>, vector<2x128xf32>
    tpu.vector_store %arg10[%c0_23, %c0_24], %43 {strides = array<i32>} : memref<2x128xf32, #tpu.memory_space<vmem>>, vector<2x128xf32>,
    return
  }
  func.func @transform_0(%arg0: i32) -> (i32, i32) {
    %c0_i32 = arith.constant 0 : i32
    %c0_i32_0 = arith.constant 0 : i32
    return %arg0, %c0_i32 : i32, i32
  }
  func.func @transform_1(%arg0: i32) -> (i32, i32) {
    %c0_i32 = arith.constant 0 : i32
    %c0_i32_0 = arith.constant 0 : i32
    %c0_i32_1 = arith.constant 0 : i32
    return %c0_i32, %c0_i32_0 : i32, i32
  }
  func.func @transform_2(%arg0: i32) -> (i32, i32) {
    %c0_i32 = arith.constant 0 : i32
    %c0_i32_0 = arith.constant 0 : i32
    %c0_i32_1 = arith.constant 0 : i32
    return %c0_i32, %c0_i32_0 : i32, i32
  }
  func.func @transform_3(%arg0: i32) -> (i32, i32) {
    %c0_i32 = arith.constant 0 : i32
    %c0_i32_0 = arith.constant 0 : i32
    %c0_i32_1 = arith.constant 0 : i32
    return %c0_i32, %c0_i32_0 : i32, i32
  }
  func.func @transform_4(%arg0: i32) -> (i32, i32) {
    %c0_i32 = arith.constant 0 : i32
    %c0_i32_0 = arith.constant 0 : i32
    %c0_i32_1 = arith.constant 0 : i32
    return %c0_i32, %c0_i32_0 : i32, i32
  }
  func.func @transform_5(%arg0: i32) -> (i32, i32) {
    %c0_i32 = arith.constant 0 : i32
    %c0_i32_0 = arith.constant 0 : i32
    %c0_i32_1 = arith.constant 0 : i32
    return %c0_i32, %c0_i32_0 : i32, i32
  }
  func.func @transform_6(%arg0: i32) -> (i32, i32) {
    %c0_i32 = arith.constant 0 : i32
    %c0_i32_0 = arith.constant 0 : i32
    %c0_i32_1 = arith.constant 0 : i32
    return %c0_i32, %c0_i32_0 : i32, i32
  }
  func.func @transform_7(%arg0: i32) -> (i32, i32) {
    %c0_i32 = arith.constant 0 : i32
    %c0_i32_0 = arith.constant 0 : i32
    %c0_i32_1 = arith.constant 0 : i32
    return %c0_i32, %c0_i32_0 : i32, i32
  }
  func.func @transform_8(%arg0: i32) -> (i32, i32) {
    %c0_i32 = arith.constant 0 : i32
    %c0_i32_0 = arith.constant 0 : i32
    %c0_i32_1 = arith.constant 0 : i32
    return %c0_i32, %c0_i32_0 : i32, i32
  }
  func.func @transform_9(%arg0: i32) -> (i32, i32) {
    %c0_i32 = arith.constant 0 : i32
    %c0_i32_0 = arith.constant 0 : i32
    return %arg0, %c0_i32 : i32, i32
  }
}

</mosaic_0001>

<bundles_post_ra>
// kernel: simple_cnn2_forward.1
= control target key start
LH: loop header
LB: loop body
LE: loop exit
PB: predicated region body
PF: predicated region fallthrough
CT: control target
= control target key end

     0   :  { %v7492_v32 = vmov 1966171168   ;;  %v807_v34 = vlaneseq  ;;  %s7494_s30 = smov 64   ;;  %vm7495_vm0 = vmmov 0   ;;  %vm6252_vm1 = vcmask 523264   ;;  %s10245_s1 = inlined_call_operand.vmem [shape: bf16[768,2048], index: 1, kind: input, shape index: {}]   ;;  %s10246_s0 = inlined_call_operand.vmem [shape: bf16[2,768], index: 0, kind: input, shape index: {}]   ;;  %s10247_s3 = inlined_call_operand.vmem [shape: bf16[512,256], index: 3, kind: input, shape index: {}]   ;;  %s10248_s2 = inlined_call_operand.vmem [shape: f32[1,512], index: 2, kind: input, shape index: {}]   ;;  %s10249_s5 = inlined_call_operand.vmem [shape: bf16[64,120], index: 5, kind: input, shape index: {}]   ;;  %s10250_s7 = inlined_call_operand.vmem [shape: bf16[120,128], index: 7, kind: input, shape index: {}]   ;;  %s10251_s4 = inlined_call_operand.vmem [shape: f32[1,64], index: 4, kind: input, shape index: {}]   ;;  %s10252_s6 = inlined_call_operand.vmem [shape: f32[1,120], index: 6, kind: input, shape index: {}]   ;;  %s10253_s8 = inlined_call_operand.vmem [shape: f32[1,128], index: 8, kind: input, shape index: {}]   ;;  %s10254_s9 = inlined_call_operand.vmem [shape: f32[2,128], index: 9, kind: output, shape index: {}]  }
   0x1   :  { %v34_v0 = vld [vmem:[%s10245_s1] sm:$0xff]  ;;  %v805_v33 = vunpack.c.l.s4 %v7492_v32  ;;  %vm6369_vm2 = vcmask 1043456   ;;  %vm6365_vm3 = vcmask 982016  }
   0x2   :  { %v42_v1 = vld [vmem:[%s10245_s1 + $0x40] sm:$0xff]  ;;  %v7612_v44 = vshrl.u32 %v807_v34, 7 }
   0x3   :  { %v290_v2 = vld [vmem:[%s10245_s1 + $0x800] sm:$0xff]  ;;  %v6419_v3 = vcombine.high %v34_v0, %v42_v1  ;;  %v6418_v5 = vcombine.low %v34_v0, %v42_v1  ;;  %v806_v43 = vunpack.c.0.s8 %v805_v33 }
   0x4   :  { %v298_v4 = vld [vmem:[%s10245_s1 + $0x840] sm:$0xff] }
   0x5   :  { %v50_v6 = vld [vmem:[%s10245_s1 + $0x80] sm:$0xff]  ;;  %v6675_v8 = vcombine.high %v290_v2, %v298_v4  ;;  %v6674_v9 = vcombine.low %v290_v2, %v298_v4  ;;  %4696 = vmatprep.subr.bf16.mxu1 %v6419_v3  ;;  %v7627_v53 = vsub.s32 %v806_v43, %v7612_v44 }
   0x6   :  { %v58_v7 = vld [vmem:[%s10245_s1 + $0xc0] sm:$0xff]  ;;  %4697 = vmatpush1.bf16.msra.mxu1 %v6418_v5 }
   0x7   :  { %v6435_v10 = vcombine.high %v50_v6, %v58_v7  ;;  %v306_v11 = vld [vmem:[%s10245_s1 + $0x880] sm:$0xff]  ;;  %4737 = vmatprep.subr.bf16.mxu0 %v6675_v8  ;;  %v6434_v18 = vcombine.low %v50_v6, %v58_v7 }
   0x8   :  { %v314_v12 = vld [vmem:[%s10245_s1 + $0x8c0] sm:$0xff]  ;;  %4738 = vmatpush1.bf16.msra.mxu0 %v6674_v9 }
   0x9   :  { %v66_v13 = vld [vmem:[%s10245_s1 + $0x100] sm:$0xff]  ;;  %v6691_v14 = vcombine.high %v306_v11, %v314_v12  ;;  %4698 = vmatprep.subr.bf16.mxu1 %v6435_v10  ;;  %v6690_v19 = vcombine.low %v306_v11, %v314_v12 }
   0xa   :  { %v74_v15 = vld [vmem:[%s10245_s1 + $0x140] sm:$0xff]  ;;  %4699 = vmatpush1.bf16.msra.mxu1 %v6434_v18 }
   0xb   :  { %v322_v16 = vld [vmem:[%s10245_s1 + $0x900] sm:$0xff]  ;;  %v6451_v20 = vcombine.high %v66_v13, %v74_v15  ;;  %4739 = vmatprep.subr.bf16.mxu0 %v6691_v14  ;;  %v6450_v26 = vcombine.low %v66_v13, %v74_v15 }
   0xc   :  { %v330_v17 = vld [vmem:[%s10245_s1 + $0x940] sm:$0xff]  ;;  %4740 = vmatpush1.bf16.msra.mxu0 %v6690_v19 }
   0xd   :  { %v6707_v21 = vcombine.high %v322_v16, %v330_v17  ;;  %v82_v22 = vld [vmem:[%s10245_s1 + $0x180] sm:$0xff]  ;;  %4700 = vmatprep.subr.bf16.mxu1 %v6451_v20  ;;  %v6706_v27 = vcombine.low %v322_v16, %v330_v17 }
   0xe   :  { %v90_v23 = vld [vmem:[%s10245_s1 + $0x1c0] sm:$0xff]  ;;  %4701 = vmatpush1.bf16.msra.mxu1 %v6450_v26 }
   0xf   :  { %v338_v24 = vld [vmem:[%s10245_s1 + $0x980] sm:$0xff]  ;;  %v6467_v28 = vcombine.high %v82_v22, %v90_v23  ;;  %4741 = vmatprep.subr.bf16.mxu0 %v6707_v21  ;;  %v6466_v37 = vcombine.low %v82_v22, %v90_v23 }
  0x10   :  { %v346_v25 = vld [vmem:[%s10245_s1 + $0x9c0] sm:$0xff]  ;;  %4742 = vmatpush1.bf16.msra.mxu0 %v6706_v27 }
  0x11   :  { %v6723_v29 = vcombine.high %v338_v24, %v346_v25  ;;  %v98_v30 = vld [vmem:[%s10245_s1 + $0x200] sm:$0xff]  ;;  %4702 = vmatprep.subr.bf16.mxu1 %v6467_v28  ;;  %v6722_v38 = vcombine.low %v338_v24, %v346_v25 }
  0x12   :  { %v106_v31 = vld [vmem:[%s10245_s1 + $0x240] sm:$0xff]  ;;  %4703 = vmatpush1.bf16.msra.mxu1 %v6466_v37 }
  0x13   :  { %v354_v35 = vld [vmem:[%s10245_s1 + $0xa00] sm:$0xff]  ;;  %v6483_v39 = vcombine.high %v98_v30, %v106_v31  ;;  %4743 = vmatprep.subr.bf16.mxu0 %v6723_v29  ;;  %v6482_v47 = vcombine.low %v98_v30, %v106_v31 }
  0x14   :  { %v362_v36 = vld [vmem:[%s10245_s1 + $0xa40] sm:$0xff]  ;;  %4744 = vmatpush1.bf16.msra.mxu0 %v6722_v38 }
  0x15   :  { %v6739_v40 = vcombine.high %v354_v35, %v362_v36  ;;  %v114_v41 = vld [vmem:[%s10245_s1 + $0x280] sm:$0xff]  ;;  %4704 = vmatprep.subr.bf16.mxu1 %v6483_v39  ;;  %v6738_v48 = vcombine.low %v354_v35, %v362_v36 }
  0x16   :  { %v122_v42 = vld [vmem:[%s10245_s1 + $0x2c0] sm:$0xff]  ;;  %4705 = vmatpush1.bf16.msra.mxu1 %v6482_v47 }
  0x17   :  { %v370_v45 = vld [vmem:[%s10245_s1 + $0xa80] sm:$0xff]  ;;  %v6499_v49 = vcombine.high %v114_v41, %v122_v42  ;;  %4745 = vmatprep.subr.bf16.mxu0 %v6739_v40  ;;  %v6498_v56 = vcombine.low %v114_v41, %v122_v42 }
  0x18   :  { %v378_v46 = vld [vmem:[%s10245_s1 + $0xac0] sm:$0xff]  ;;  %4746 = vmatpush1.bf16.msra.mxu0 %v6738_v48 }
  0x19   :  { %v6755_v50 = vcombine.high %v370_v45, %v378_v46  ;;  %v130_v51 = vld [vmem:[%s10245_s1 + $0x300] sm:$0xff]  ;;  %4706 = vmatprep.subr.bf16.mxu1 %v6499_v49  ;;  %v6754_v57 = vcombine.low %v370_v45, %v378_v46 }
  0x1a   :  { %v138_v52 = vld [vmem:[%s10245_s1 + $0x340] sm:$0xff]  ;;  %4707 = vmatpush1.bf16.msra.mxu1 %v6498_v56 }
  0x1b   :  { %v386_v54 = vld [vmem:[%s10245_s1 + $0xb00] sm:$0xff]  ;;  %v6515_v58 = vcombine.high %v130_v51, %v138_v52  ;;  %4747 = vmatprep.subr.bf16.mxu0 %v6755_v50  ;;  %v6514_v2 = vcombine.low %v130_v51, %v138_v52 }
  0x1c   :  { %v394_v55 = vld [vmem:[%s10245_s1 + $0xb40] sm:$0xff]  ;;  %4748 = vmatpush1.bf16.msra.mxu0 %v6754_v57 }
  0x1d   :  { %v33_v59 = vld [vmem:[%s10246_s0] sm:$0x3f]  ;;  %v6771_v60 = vcombine.high %v386_v54, %v394_v55  ;;  %4708 = vmatprep.subr.bf16.mxu1 %v6515_v58  ;;  %v6770_v4 = vcombine.low %v386_v54, %v394_v55 }
  0x1e   :  { %v146_v61 = vld [vmem:[%s10245_s1 + $0x380] sm:$0xff]  ;;  %v7645_v63 = vrot.slane %v33_v59, %v7627_v53  ;;  %4709 = vmatpush1.bf16.msra.mxu1 %v6514_v2  ;;  %v803_v19 = vcombine.high %v33_v59, %v33_v59 }
  0x1f   :  { %v154_v62 = vld [vmem:[%s10245_s1 + $0x3c0] sm:$0xff]  ;;  %4749 = vmatprep.subr.bf16.mxu0 %v6771_v60 }
  0x20   :  { %v402_v0 = vld [vmem:[%s10245_s1 + $0xb80] sm:$0xff]  ;;  %v818_v3 = vcombine.high %v7645_v63, %v7645_v63  ;;  %v6531_v5 = vcombine.high %v146_v61, %v154_v62  ;;  %v6530_v12 = vcombine.low %v146_v61, %v154_v62  ;;  %4750 = vmatpush1.bf16.msra.mxu0 %v6770_v4  ;;  %v7695_v28 = vrot.slane %v803_v19, %v7627_v53 }
  0x21   :  { %v410_v1 = vld [vmem:[%s10245_s1 + $0xbc0] sm:$0xff] }
  0x22   :  { %v6787_v6 = vcombine.high %v402_v0, %v410_v1  ;;  %v162_v7 = vld [vmem:[%s10245_s1 + $0x400] sm:$0xff]  ;;  %v7662_v9 = vrot.slane %v818_v3, %v7627_v53  ;;  %4710 = vmatprep.subr.bf16.mxu1 %v6531_v5  ;;  %v6786_v14 = vcombine.low %v402_v0, %v410_v1  ;;  %v7705_v32 = vrot.slane %v7695_v28, %v7627_v53 }
  0x23   :  { %v170_v8 = vld [vmem:[%s10245_s1 + $0x440] sm:$0xff]  ;;  %4711 = vmatpush1.bf16.msra.mxu1 %v6530_v12 }
  0x24   :  { %v418_v10 = vld [vmem:[%s10245_s1 + $0xc00] sm:$0xff]  ;;  %4728 = vmatprep.mubr.bf16.mxu1 %v7662_v9  ;;  %v7673_v13 = vcombine.high %v7662_v9, %v7662_v9  ;;  %v6547_v15 = vcombine.high %v162_v7, %v170_v8  ;;  %4751 = vmatprep.subr.bf16.mxu0 %v6787_v6  ;;  %v6546_v22 = vcombine.low %v162_v7, %v170_v8 }
  0x25   :  { %v426_v11 = vld [vmem:[%s10245_s1 + $0xc40] sm:$0xff]  ;;  %4752 = vmatpush1.bf16.msra.mxu0 %v6786_v14 }
  0x26   :  { %v6803_v16 = vcombine.high %v418_v10, %v426_v11  ;;  %v178_v17 = vld [vmem:[%s10245_s1 + $0x480] sm:$0xff]  ;;  %4769 = vmatprep.mubr.bf16.mxu0 %v7673_v13  ;;  %4712 = vmatprep.subr.bf16.mxu1 %v6547_v15  ;;  %v6802_v23 = vcombine.low %v418_v10, %v426_v11 }
  0x27   :  { %v186_v18 = vld [vmem:[%s10245_s1 + $0x4c0] sm:$0xff]  ;;  %4713 = vmatpush1.bf16.msra.mxu1 %v6546_v22  ;;  %v7781_v22 = vrot.slane %v7645_v63, %v7627_v53 }
  0x28   :  { %v434_v20 = vld [vmem:[%s10245_s1 + $0xc80] sm:$0xff]  ;;  %v6563_v24 = vcombine.high %v178_v17, %v186_v18  ;;  %4753 = vmatprep.subr.bf16.mxu0 %v6803_v16  ;;  %v6562_v31 = vcombine.low %v178_v17, %v186_v18  ;;  %v35_v17 = vld [vmem:[%s10245_s1 + $0x8] sm:$0xff] }
  0x29   :  { %v442_v21 = vld [vmem:[%s10245_s1 + $0xcc0] sm:$0xff]  ;;  %4754 = vmatpush1.bf16.msra.mxu0 %v6802_v23  ;;  %v43_v18 = vld [vmem:[%s10245_s1 + $0x48] sm:$0xff] }
  0x2a   :  { %v6819_v25 = vcombine.high %v434_v20, %v442_v21  ;;  %v194_v26 = vld [vmem:[%s10245_s1 + $0x500] sm:$0xff]  ;;  %4714 = vmatprep.subr.bf16.mxu1 %v6563_v24  ;;  %v6818_v33 = vcombine.low %v434_v20, %v442_v21  ;;  %v6421_v24 = vcombine.high %v35_v17, %v43_v18 }
  0x2b   :  { %v202_v27 = vld [vmem:[%s10245_s1 + $0x540] sm:$0xff]  ;;  %4715 = vmatpush1.bf16.msra.mxu1 %v6562_v31  ;;  %v6420_v31 = vcombine.low %v35_v17, %v43_v18  ;;  %v147_v17 = vld [vmem:[%s10245_s1 + $0x388] sm:$0xff] }
  0x2c   :  { %v450_v29 = vld [vmem:[%s10245_s1 + $0xd00] sm:$0xff]  ;;  %v6579_v34 = vcombine.high %v194_v26, %v202_v27  ;;  %4755 = vmatprep.subr.bf16.mxu0 %v6819_v25  ;;  %v6578_v40 = vcombine.low %v194_v26, %v202_v27  ;;  %v51_v26 = vld [vmem:[%s10245_s1 + $0x88] sm:$0xff] }
  0x2d   :  { %v458_v30 = vld [vmem:[%s10245_s1 + $0xd40] sm:$0xff]  ;;  %4756 = vmatpush1.bf16.msra.mxu0 %v6818_v33  ;;  %v59_v27 = vld [vmem:[%s10245_s1 + $0xc8] sm:$0xff]  ;;  %v7799_v33 = vcombine.high %v7781_v22, %v7781_v22 }
  0x2e   :  { %v6835_v35 = vcombine.high %v450_v29, %v458_v30  ;;  %v210_v36 = vld [vmem:[%s10245_s1 + $0x580] sm:$0xff]  ;;  %4716 = vmatprep.subr.bf16.mxu1 %v6579_v34  ;;  %v6834_v41 = vcombine.low %v450_v29, %v458_v30  ;;  %v819_v29 = vcombine.high %v7695_v28, %v7695_v28  ;;  %v155_v18 = vld [vmem:[%s10245_s1 + $0x3c8] sm:$0xff] }
  0x2f   :  { %v218_v37 = vld [vmem:[%s10245_s1 + $0x5c0] sm:$0xff]  ;;  %4717 = vmatpush1.bf16.msra.mxu1 %v6578_v40 }
  0x30   :  { %v466_v38 = vld [vmem:[%s10245_s1 + $0xd80] sm:$0xff]  ;;  %v6595_v42 = vcombine.high %v210_v36, %v218_v37  ;;  %4757 = vmatprep.subr.bf16.mxu0 %v6835_v35  ;;  %v6594_v49 = vcombine.low %v210_v36, %v218_v37  ;;  %v6437_v35 = vcombine.high %v51_v26, %v59_v27  ;;  %v67_v36 = vld [vmem:[%s10245_s1 + $0x108] sm:$0xff] }
  0x31   :  { %v474_v39 = vld [vmem:[%s10245_s1 + $0xdc0] sm:$0xff]  ;;  %4758 = vmatpush1.bf16.msra.mxu0 %v6834_v41  ;;  %v75_v37 = vld [vmem:[%s10245_s1 + $0x148] sm:$0xff]  ;;  %v6436_v41 = vcombine.low %v51_v26, %v59_v27 }
  0x32   :  { %v6851_v43 = vcombine.high %v466_v38, %v474_v39  ;;  %v226_v45 = vld [vmem:[%s10245_s1 + $0x600] sm:$0xff]  ;;  %4718 = vmatprep.subr.bf16.mxu1 %v6595_v42  ;;  %v6850_v50 = vcombine.low %v466_v38, %v474_v39  ;;  %v7808_v38 = vrot.slane %v819_v29, %v7627_v53  ;;  %v163_v26 = vld [vmem:[%s10245_s1 + $0x408] sm:$0xff] }
  0x33   :  { %v234_v46 = vld [vmem:[%s10245_s1 + $0x640] sm:$0xff]  ;;  %4719 = vmatpush1.bf16.msra.mxu1 %v6594_v49  ;;  %v6452_v49 = vcombine.low %v67_v36, %v75_v37  ;;  %v171_v27 = vld [vmem:[%s10245_s1 + $0x448] sm:$0xff] }
  0x34   :  { %v482_v47 = vld [vmem:[%s10245_s1 + $0xe00] sm:$0xff]  ;;  %v6611_v51 = vcombine.high %v226_v45, %v234_v46  ;;  %4759 = vmatprep.subr.bf16.mxu0 %v6851_v43  ;;  %v6610_v58 = vcombine.low %v226_v45, %v234_v46  ;;  %v6453_v43 = vcombine.high %v67_v36, %v75_v37  ;;  %v83_v45 = vld [vmem:[%s10245_s1 + $0x188] sm:$0xff] }
  0x35   :  { %v490_v48 = vld [vmem:[%s10245_s1 + $0xe40] sm:$0xff]  ;;  %4760 = vmatpush1.bf16.msra.mxu0 %v6850_v50  ;;  %v91_v46 = vld [vmem:[%s10245_s1 + $0x1c8] sm:$0xff] }
  0x36   :  { %v6867_v52 = vcombine.high %v482_v47, %v490_v48  ;;  %v242_v54 = vld [vmem:[%s10245_s1 + $0x680] sm:$0xff]  ;;  %4720 = vmatprep.subr.bf16.mxu1 %v6611_v51  ;;  %v6866_v59 = vcombine.low %v482_v47, %v490_v48  ;;  %v6469_v51 = vcombine.high %v83_v45, %v91_v46  ;;  %v187_v36 = vld [vmem:[%s10245_s1 + $0x4c8] sm:$0xff] }
  0x37   :  { %v250_v55 = vld [vmem:[%s10245_s1 + $0x6c0] sm:$0xff]  ;;  %4721 = vmatpush1.bf16.msra.mxu1 %v6610_v58  ;;  %v6468_v58 = vcombine.low %v83_v45, %v91_v46  ;;  %v203_v45 = vld [vmem:[%s10245_s1 + $0x548] sm:$0xff] }
  0x38   :  { %v498_v56 = vld [vmem:[%s10245_s1 + $0xe80] sm:$0xff]  ;;  %v6627_v60 = vcombine.high %v242_v54, %v250_v55  ;;  %4761 = vmatprep.subr.bf16.mxu0 %v6867_v52  ;;  %v6626_v3 = vcombine.low %v242_v54, %v250_v55  ;;  %v99_v54 = vld [vmem:[%s10245_s1 + $0x208] sm:$0xff] }
  0x39   :  { %v506_v57 = vld [vmem:[%s10245_s1 + $0xec0] sm:$0xff]  ;;  %4762 = vmatpush1.bf16.msra.mxu0 %v6866_v59  ;;  %v107_v55 = vld [vmem:[%s10245_s1 + $0x248] sm:$0xff] }
  0x3a   :  { %v6883_v61 = vcombine.high %v498_v56, %v506_v57  ;;  %v258_v62 = vld [vmem:[%s10245_s1 + $0x700] sm:$0xff]  ;;  %4722 = vmatprep.subr.bf16.mxu1 %v6627_v60  ;;  %v6882_v4 = vcombine.low %v498_v56, %v506_v57  ;;  %v6485_v60 = vcombine.high %v99_v54, %v107_v55 }
  0x3b   :  { %v266_v0 = vld [vmem:[%s10245_s1 + $0x740] sm:$0xff]  ;;  %4723 = vmatpush1.bf16.msra.mxu1 %v6626_v3  ;;  %v6484_v3 = vcombine.low %v99_v54, %v107_v55  ;;  %v219_v54 = vld [vmem:[%s10245_s1 + $0x5c8] sm:$0xff] }
  0x3c   :  { %v514_v1 = vld [vmem:[%s10245_s1 + $0xf00] sm:$0xff]  ;;  %v6643_v5 = vcombine.high %v258_v62, %v266_v0  ;;  %4763 = vmatprep.subr.bf16.mxu0 %v6883_v61  ;;  %v6642_v12 = vcombine.low %v258_v62, %v266_v0  ;;  %v115_v62 = vld [vmem:[%s10245_s1 + $0x288] sm:$0xff] }
  0x3d   :  { %v522_v2 = vld [vmem:[%s10245_s1 + $0xf40] sm:$0xff]  ;;  %4764 = vmatpush1.bf16.msra.mxu0 %v6882_v4  ;;  %v123_v0 = vld [vmem:[%s10245_s1 + $0x2c8] sm:$0xff] }
  0x3e   :  { %v6899_v6 = vcombine.high %v514_v1, %v522_v2  ;;  %v274_v7 = vld [vmem:[%s10245_s1 + $0x780] sm:$0xff]  ;;  %4724 = vmatprep.subr.bf16.mxu1 %v6643_v5  ;;  %v6898_v14 = vcombine.low %v514_v1, %v522_v2  ;;  %v6501_v5 = vcombine.high %v115_v62, %v123_v0 }
  0x3f   :  { %v282_v8 = vld [vmem:[%s10245_s1 + $0x7c0] sm:$0xff]  ;;  %4725 = vmatpush1.bf16.msra.mxu1 %v6642_v12  ;;  %v6500_v12 = vcombine.low %v115_v62, %v123_v0  ;;  %v235_v62 = vld [vmem:[%s10245_s1 + $0x648] sm:$0xff] }
  0x40   :  { %v530_v10 = vld [vmem:[%s10245_s1 + $0xf80] sm:$0xff]  ;;  %v6659_v15 = vcombine.high %v274_v7, %v282_v8  ;;  %4765 = vmatprep.subr.bf16.mxu0 %v6899_v6  ;;  %v6658_v21 = vcombine.low %v274_v7, %v282_v8  ;;  %v131_v7 = vld [vmem:[%s10245_s1 + $0x308] sm:$0xff] }
  0x41   :  { %v538_v11 = vld [vmem:[%s10245_s1 + $0xfc0] sm:$0xff]  ;;  %4766 = vmatpush1.bf16.msra.mxu0 %v6898_v14  ;;  %v139_v8 = vld [vmem:[%s10245_s1 + $0x348] sm:$0xff] }
  0x42   :  { %v6915_v16 = vcombine.high %v530_v10, %v538_v11  ;;  %v546_v19 = vld [vmem:[%s10245_s1 + $0x1000] sm:$0xff]  ;;  %4726 = vmatprep.subr.bf16.mxu1 %v6659_v15  ;;  %v6914_v23 = vcombine.low %v530_v10, %v538_v11  ;;  %v6517_v15 = vcombine.high %v131_v7, %v139_v8 }
  0x43   :  { %v554_v20 = vld [vmem:[%s10245_s1 + $0x1040] sm:$0xff]  ;;  %4727 = vmatpush1.bf16.msra.mxu1 %v6658_v21  ;;  %v6516_v21 = vcombine.low %v131_v7, %v139_v8  ;;  %v251_v7 = vld [vmem:[%s10245_s1 + $0x6c8] sm:$0xff] }
  0x44   :  { %4767 = vmatprep.subr.bf16.mxu0 %v6915_v16  ;;  %v6931_v25 = vcombine.high %v546_v19, %v554_v20  ;;  %v562_v63 = vld [vmem:[%s10245_s1 + $0x1080] sm:$0xff]  ;;  %v6930_v34 = vcombine.low %v546_v19, %v554_v20  ;;  %4819 = vmatprep.subr.bf16.mxu1 %v6421_v24  ;;  %v6533_v24 = vcombine.high %v147_v17, %v155_v18 }
  0x45   :  { %v570_v30 = vld [vmem:[%s10245_s1 + $0x10c0] sm:$0xff]  ;;  %4768 = vmatpush1.bf16.msra.mxu0 %v6914_v23 }
  0x46   :  { %4778 = vmatprep.subr.bf16.mxu0 %v6931_v25  ;;  %v6947_v28 = vcombine.high %v562_v63, %v570_v30  ;;  %4729 = vmatmul.mubr.bf16.vlgmr.msra.gmra.mrb[0].mxu1 %v7781_v22  ;;  %v578_v39 = vld [vmem:[%s10245_s1 + $0x1100] sm:$0xff]  ;;  %v6946_v42 = vcombine.low %v562_v63, %v570_v30  ;;  %v6532_v30 = vcombine.low %v147_v17, %v155_v18  ;;  %v267_v17 = vld [vmem:[%s10245_s1 + $0x748] sm:$0xff] }
  0x47   :  { %v586_v40 = vld [vmem:[%s10245_s1 + $0x1140] sm:$0xff]  ;;  %4820 = vmatpush1.bf16.msra.mxu1 %v6420_v31  ;;  %4851 = vmatprep.mubr.bf16.mxu1 %v7662_v9 }
  0x48   :  { %4770 = vmatmul.mubr.bf16.vlgmr.msra.gmra.mrb[0].mxu0 %v7799_v33  ;;  %4821 = vmatprep.subr.bf16.mxu1 %v6437_v35  ;;  %v6963_v53 = vcombine.high %v578_v39, %v586_v40  ;;  %v594_v47 = vld [vmem:[%s10245_s1 + $0x1180] sm:$0xff]  ;;  %v6962_v50 = vcombine.low %v578_v39, %v586_v40  ;;  %v6548_v40 = vcombine.low %v163_v26, %v171_v27 }
  0x49   :  { %4779 = vmatpush1.bf16.msra.mxu0 %v6930_v34  ;;  %4810 = vmatprep.mubr.bf16.mxu0 %v7808_v38  ;;  %v602_v48 = vld [vmem:[%s10245_s1 + $0x11c0] sm:$0xff]  ;;  %v6549_v34 = vcombine.high %v163_v26, %v171_v27  ;;  %v283_v26 = vld [vmem:[%s10245_s1 + $0x7c8] sm:$0xff] }
  0x4a   :  { %4780 = vmatprep.subr.bf16.mxu0 %v6947_v28  ;;  %v6979_v52 = vcombine.high %v594_v47, %v602_v48  ;;  %v610_v56 = vld [vmem:[%s10245_s1 + $0x1200] sm:$0xff]  ;;  %v6978_v59 = vcombine.low %v594_v47, %v602_v48  ;;  %v179_v28 = vld [vmem:[%s10245_s1 + $0x488] sm:$0xff] }
  0x4b   :  { %4822 = vmatpush1.bf16.msra.mxu1 %v6436_v41  ;;  %v618_v57 = vld [vmem:[%s10245_s1 + $0x1240] sm:$0xff]  ;;  %v6564_v48 = vcombine.low %v179_v28, %v187_v36 }
  0x4c   :  { %4823 = vmatprep.subr.bf16.mxu1 %v6453_v43  ;;  %v6995_v61 = vcombine.high %v610_v56, %v618_v57  ;;  %v626_v1 = vld [vmem:[%s10245_s1 + $0x1280] sm:$0xff]  ;;  %v6994_v4 = vcombine.low %v610_v56, %v618_v57 }
  0x4d   :  { %4781 = vmatpush1.bf16.msra.mxu0 %v6946_v42  ;;  %v634_v2 = vld [vmem:[%s10245_s1 + $0x12c0] sm:$0xff]  ;;  %v6565_v42 = vcombine.high %v179_v28, %v187_v36  ;;  %v299_v28 = vld [vmem:[%s10245_s1 + $0x848] sm:$0xff]  ;;  %v36_v36 = vld [vmem:[%s10245_s1 + $0x10] sm:$0xff] }
  0x4e   :  { %4782 = vmatprep.subr.bf16.mxu0 %v6963_v53  ;;  %v7011_v6 = vcombine.high %v626_v1, %v634_v2  ;;  %v642_v10 = vld [vmem:[%s10245_s1 + $0x1300] sm:$0xff]  ;;  %v7010_v14 = vcombine.low %v626_v1, %v634_v2  ;;  %v195_v53 = vld [vmem:[%s10245_s1 + $0x508] sm:$0xff] }
  0x4f   :  { %4824 = vmatpush1.bf16.msra.mxu1 %v6452_v49  ;;  %v650_v11 = vld [vmem:[%s10245_s1 + $0x1340] sm:$0xff]  ;;  %v6580_v57 = vcombine.low %v195_v53, %v203_v45 }
  0x50   :  { %4825 = vmatprep.subr.bf16.mxu1 %v6469_v51  ;;  %v7027_v16 = vcombine.high %v642_v10, %v650_v11  ;;  %v658_v19 = vld [vmem:[%s10245_s1 + $0x1380] sm:$0xff]  ;;  %v7026_v23 = vcombine.low %v642_v10, %v650_v11 }
  0x51   :  { %4783 = vmatpush1.bf16.msra.mxu0 %v6962_v50  ;;  %v666_v20 = vld [vmem:[%s10245_s1 + $0x13c0] sm:$0xff]  ;;  %v6581_v50 = vcombine.high %v195_v53, %v203_v45  ;;  %v315_v53 = vld [vmem:[%s10245_s1 + $0x8c8] sm:$0xff]  ;;  %v52_v45 = vld [vmem:[%s10245_s1 + $0x90] sm:$0xff] }
  0x52   :  { %4784 = vmatprep.subr.bf16.mxu0 %v6979_v52  ;;  %v7043_v25 = vcombine.high %v658_v19, %v666_v20  ;;  %v674_v29 = vld [vmem:[%s10245_s1 + $0x1400] sm:$0xff]  ;;  %v7042_v31 = vcombine.low %v658_v19, %v666_v20  ;;  %v211_v52 = vld [vmem:[%s10245_s1 + $0x588] sm:$0xff] }
  0x53   :  { %4826 = vmatpush1.bf16.msra.mxu1 %v6468_v58  ;;  %v682_v63 = vld [vmem:[%s10245_s1 + $0x1440] sm:$0xff]  ;;  %v6596_v2 = vcombine.low %v211_v52, %v219_v54 }
  0x54   :  { %4827 = vmatprep.subr.bf16.mxu1 %v6485_v60  ;;  %v7059_v35 = vcombine.high %v674_v29, %v682_v63  ;;  %v690_v37 = vld [vmem:[%s10245_s1 + $0x1480] sm:$0xff]  ;;  %v7058_v41 = vcombine.low %v674_v29, %v682_v63 }
  0x55   :  { %4785 = vmatpush1.bf16.msra.mxu0 %v6978_v59  ;;  %v698_v39 = vld [vmem:[%s10245_s1 + $0x14c0] sm:$0xff]  ;;  %v6597_v59 = vcombine.high %v211_v52, %v219_v54  ;;  %v331_v52 = vld [vmem:[%s10245_s1 + $0x948] sm:$0xff]  ;;  %v68_v54 = vld [vmem:[%s10245_s1 + $0x110] sm:$0xff] }
  0x56   :  { %4786 = vmatprep.subr.bf16.mxu0 %v6995_v61  ;;  %v7075_v43 = vcombine.high %v690_v37, %v698_v39  ;;  %v706_v46 = vld [vmem:[%s10245_s1 + $0x1500] sm:$0xff]  ;;  %v7074_v49 = vcombine.low %v690_v37, %v698_v39  ;;  %v227_v61 = vld [vmem:[%s10245_s1 + $0x608] sm:$0xff]  ;;  %v44_v37 = vld [vmem:[%s10245_s1 + $0x50] sm:$0xff] }
  0x57   :  { %4828 = vmatpush1.bf16.msra.mxu1 %v6484_v3  ;;  %v714_v47 = vld [vmem:[%s10245_s1 + $0x1540] sm:$0xff]  ;;  %v6612_v11 = vcombine.low %v227_v61, %v235_v62 }
  0x58   :  { %4829 = vmatprep.subr.bf16.mxu1 %v6501_v5  ;;  %v7091_v51 = vcombine.high %v706_v46, %v714_v47  ;;  %v722_v55 = vld [vmem:[%s10245_s1 + $0x1580] sm:$0xff]  ;;  %v7090_v58 = vcombine.low %v706_v46, %v714_v47  ;;  %v60_v46 = vld [vmem:[%s10245_s1 + $0xd0] sm:$0xff] }
  0x59   :  { %4787 = vmatpush1.bf16.msra.mxu0 %v6994_v4  ;;  %v730_v56 = vld [vmem:[%s10245_s1 + $0x15c0] sm:$0xff]  ;;  %v6613_v4 = vcombine.high %v227_v61, %v235_v62  ;;  %v347_v61 = vld [vmem:[%s10245_s1 + $0x9c8] sm:$0xff]  ;;  %v84_v62 = vld [vmem:[%s10245_s1 + $0x190] sm:$0xff] }
  0x5a   :  { %4788 = vmatprep.subr.bf16.mxu0 %v7011_v6  ;;  %v7107_v60 = vcombine.high %v722_v55, %v730_v56  ;;  %v738_v0 = vld [vmem:[%s10245_s1 + $0x1600] sm:$0xff]  ;;  %v7106_v3 = vcombine.low %v722_v55, %v730_v56  ;;  %v243_v6 = vld [vmem:[%s10245_s1 + $0x688] sm:$0xff]  ;;  %v76_v55 = vld [vmem:[%s10245_s1 + $0x150] sm:$0xff] }
  0x5b   :  { %4830 = vmatpush1.bf16.msra.mxu1 %v6500_v12  ;;  %v746_v1 = vld [vmem:[%s10245_s1 + $0x1640] sm:$0xff]  ;;  %v6628_v20 = vcombine.low %v243_v6, %v251_v7 }
  0x5c   :  { %4831 = vmatprep.subr.bf16.mxu1 %v6517_v15  ;;  %v7123_v5 = vcombine.high %v738_v0, %v746_v1  ;;  %v754_v8 = vld [vmem:[%s10245_s1 + $0x1680] sm:$0xff]  ;;  %v7122_v12 = vcombine.low %v738_v0, %v746_v1  ;;  %v92_v0 = vld [vmem:[%s10245_s1 + $0x1d0] sm:$0xff] }
  0x5d   :  { %4789 = vmatpush1.bf16.msra.mxu0 %v7010_v14  ;;  %v762_v10 = vld [vmem:[%s10245_s1 + $0x16c0] sm:$0xff]  ;;  %v6629_v14 = vcombine.high %v243_v6, %v251_v7  ;;  %v363_v6 = vld [vmem:[%s10245_s1 + $0xa48] sm:$0xff]  ;;  %v100_v7 = vld [vmem:[%s10245_s1 + $0x210] sm:$0xff] }
  0x5e   :  { %4790 = vmatprep.subr.bf16.mxu0 %v7027_v16  ;;  %v7139_v15 = vcombine.high %v754_v8, %v762_v10  ;;  %v259_v16 = vld [vmem:[%s10245_s1 + $0x708] sm:$0xff]  ;;  %v770_v18 = vld [vmem:[%s10245_s1 + $0x1700] sm:$0xff] }
  0x5f   :  { %4832 = vmatpush1.bf16.msra.mxu1 %v6516_v21  ;;  %v778_v19 = vld [vmem:[%s10245_s1 + $0x1740] sm:$0xff]  ;;  %v7138_v21 = vcombine.low %v754_v8, %v762_v10  ;;  %v6644_v63 = vcombine.low %v259_v16, %v267_v17  ;;  %v108_v8 = vld [vmem:[%s10245_s1 + $0x250] sm:$0xff] }
  0x60   :  { %4833 = vmatprep.subr.bf16.mxu1 %v6533_v24  ;;  %v7155_v24 = vcombine.high %v770_v18, %v778_v19  ;;  %v786_v27 = vld [vmem:[%s10245_s1 + $0x1780] sm:$0xff] }
  0x61   :  { %4791 = vmatpush1.bf16.msra.mxu0 %v7026_v23  ;;  %v6645_v23 = vcombine.high %v259_v16, %v267_v17  ;;  %v794_v29 = vld [vmem:[%s10245_s1 + $0x17c0] sm:$0xff]  ;;  %v379_v16 = vld [vmem:[%s10245_s1 + $0xac8] sm:$0xff]  ;;  %v116_v17 = vld [vmem:[%s10245_s1 + $0x290] sm:$0xff] }
  0x62   :  { %4792 = vmatprep.subr.bf16.mxu0 %v7043_v25  ;;  %v275_v25 = vld [vmem:[%s10245_s1 + $0x788] sm:$0xff] }
  0x63   :  { %4834 = vmatpush1.bf16.msra.mxu1 %v6532_v30  ;;  %v7154_v30 = vcombine.low %v770_v18, %v778_v19  ;;  %v6660_v39 = vcombine.low %v275_v25, %v283_v26  ;;  %v124_v18 = vld [vmem:[%s10245_s1 + $0x2d0] sm:$0xff] }
  0x64   :  { %4835 = vmatprep.subr.bf16.mxu1 %v6549_v34  ;;  %v7171_v34 = vcombine.high %v786_v27, %v794_v29 }
  0x65   :  { %4793 = vmatpush1.bf16.msra.mxu0 %v7042_v31  ;;  %v6661_v31 = vcombine.high %v275_v25, %v283_v26  ;;  %v395_v25 = vld [vmem:[%s10245_s1 + $0xb48] sm:$0xff]  ;;  %v132_v26 = vld [vmem:[%s10245_s1 + $0x310] sm:$0xff] }
  0x66   :  { %4794 = vmatprep.subr.bf16.mxu0 %v7059_v35  ;;  %v291_v35 = vld [vmem:[%s10245_s1 + $0x808] sm:$0xff] }
  0x67   :  { %4836 = vmatpush1.bf16.msra.mxu1 %v6548_v40  ;;  %v7170_v40 = vcombine.low %v786_v27, %v794_v29  ;;  %v6676_v47 = vcombine.low %v291_v35, %v299_v28  ;;  %v140_v27 = vld [vmem:[%s10245_s1 + $0x350] sm:$0xff] }
  0x68   :  { %4837 = vmatprep.subr.bf16.mxu1 %v6565_v42  ;;  %v6423_v42 = vcombine.high %v36_v36, %v44_v37 }
  0x69   :  { %4795 = vmatpush1.bf16.msra.mxu0 %v7058_v41  ;;  %v6677_v41 = vcombine.high %v291_v35, %v299_v28  ;;  %v411_v35 = vld [vmem:[%s10245_s1 + $0xbc8] sm:$0xff]  ;;  %v148_v28 = vld [vmem:[%s10245_s1 + $0x390] sm:$0xff] }
  0x6a   :  { %4796 = vmatprep.subr.bf16.mxu0 %v7075_v43  ;;  %v307_v43 = vld [vmem:[%s10245_s1 + $0x888] sm:$0xff] }
  0x6b   :  { %4838 = vmatpush1.bf16.msra.mxu1 %v6564_v48  ;;  %v6422_v48 = vcombine.low %v36_v36, %v44_v37  ;;  %v6692_v56 = vcombine.low %v307_v43, %v315_v53  ;;  %v156_v36 = vld [vmem:[%s10245_s1 + $0x3d0] sm:$0xff] }
  0x6c   :  { %4839 = vmatprep.subr.bf16.mxu1 %v6581_v50  ;;  %v6439_v50 = vcombine.high %v52_v45, %v60_v46 }
  0x6d   :  { %4797 = vmatpush1.bf16.msra.mxu0 %v7074_v49  ;;  %v6693_v49 = vcombine.high %v307_v43, %v315_v53  ;;  %v427_v43 = vld [vmem:[%s10245_s1 + $0xc48] sm:$0xff]  ;;  %v164_v53 = vld [vmem:[%s10245_s1 + $0x410] sm:$0xff] }
  0x6e   :  { %4798 = vmatprep.subr.bf16.mxu0 %v7091_v51  ;;  %v323_v51 = vld [vmem:[%s10245_s1 + $0x908] sm:$0xff] }
  0x6f   :  { %4840 = vmatpush1.bf16.msra.mxu1 %v6580_v57  ;;  %v6438_v57 = vcombine.low %v52_v45, %v60_v46  ;;  %v6708_v1 = vcombine.low %v323_v51, %v331_v52  ;;  %v172_v45 = vld [vmem:[%s10245_s1 + $0x450] sm:$0xff] }
  0x70   :  { %4841 = vmatprep.subr.bf16.mxu1 %v6597_v59  ;;  %v6455_v59 = vcombine.high %v68_v54, %v76_v55 }
  0x71   :  { %4799 = vmatpush1.bf16.msra.mxu0 %v7090_v58  ;;  %v6709_v58 = vcombine.high %v323_v51, %v331_v52  ;;  %v443_v51 = vld [vmem:[%s10245_s1 + $0xcc8] sm:$0xff]  ;;  %v180_v52 = vld [vmem:[%s10245_s1 + $0x490] sm:$0xff] }
  0x72   :  { %4800 = vmatprep.subr.bf16.mxu0 %v7107_v60  ;;  %v339_v60 = vld [vmem:[%s10245_s1 + $0x988] sm:$0xff] }
  0x73   :  { %4842 = vmatpush1.bf16.msra.mxu1 %v6596_v2  ;;  %v6454_v2 = vcombine.low %v68_v54, %v76_v55  ;;  %v6724_v10 = vcombine.low %v339_v60, %v347_v61  ;;  %v188_v54 = vld [vmem:[%s10245_s1 + $0x4d0] sm:$0xff] }
  0x74   :  { %4843 = vmatprep.subr.bf16.mxu1 %v6613_v4  ;;  %v6471_v4 = vcombine.high %v84_v62, %v92_v0 }
  0x75   :  { %4801 = vmatpush1.bf16.msra.mxu0 %v7106_v3  ;;  %v6725_v3 = vcombine.high %v339_v60, %v347_v61  ;;  %v459_v60 = vld [vmem:[%s10245_s1 + $0xd48] sm:$0xff]  ;;  %v196_v61 = vld [vmem:[%s10245_s1 + $0x510] sm:$0xff] }
  0x76   :  { %4802 = vmatprep.subr.bf16.mxu0 %v7123_v5  ;;  %v355_v5 = vld [vmem:[%s10245_s1 + $0xa08] sm:$0xff] }
  0x77   :  { %4844 = vmatpush1.bf16.msra.mxu1 %v6612_v11  ;;  %v6470_v11 = vcombine.low %v84_v62, %v92_v0  ;;  %v6740_v19 = vcombine.low %v355_v5, %v363_v6  ;;  %v204_v62 = vld [vmem:[%s10245_s1 + $0x550] sm:$0xff] }
  0x78   :  { %4845 = vmatprep.subr.bf16.mxu1 %v6629_v14  ;;  %v6487_v14 = vcombine.high %v100_v7, %v108_v8 }
  0x79   :  { %4803 = vmatpush1.bf16.msra.mxu0 %v7122_v12  ;;  %v6741_v12 = vcombine.high %v355_v5, %v363_v6  ;;  %v475_v5 = vld [vmem:[%s10245_s1 + $0xdc8] sm:$0xff]  ;;  %v212_v6 = vld [vmem:[%s10245_s1 + $0x590] sm:$0xff] }
  0x7a   :  { %4804 = vmatprep.subr.bf16.mxu0 %v7139_v15  ;;  %v371_v15 = vld [vmem:[%s10245_s1 + $0xa88] sm:$0xff] }
  0x7b   :  { %4846 = vmatpush1.bf16.msra.mxu1 %v6628_v20  ;;  %v6486_v20 = vcombine.low %v100_v7, %v108_v8  ;;  %v6756_v29 = vcombine.low %v371_v15, %v379_v16  ;;  %v220_v7 = vld [vmem:[%s10245_s1 + $0x5d0] sm:$0xff] }
  0x7c   :  { %4847 = vmatprep.subr.bf16.mxu1 %v6645_v23  ;;  %v6503_v23 = vcombine.high %v116_v17, %v124_v18 }
  0x7d   :  { %4805 = vmatpush1.bf16.msra.mxu0 %v7138_v21  ;;  %v6757_v21 = vcombine.high %v371_v15, %v379_v16  ;;  %v491_v15 = vld [vmem:[%s10245_s1 + $0xe48] sm:$0xff]  ;;  %v228_v16 = vld [vmem:[%s10245_s1 + $0x610] sm:$0xff] }
  0x7e   :  { %4806 = vmatprep.subr.bf16.mxu0 %v7155_v24  ;;  %v387_v24 = vld [vmem:[%s10245_s1 + $0xb08] sm:$0xff] }
  0x7f   :  { %4848 = vmatpush1.bf16.msra.mxu1 %v6644_v63  ;;  %v6502_v63 = vcombine.low %v116_v17, %v124_v18  ;;  %v6772_v37 = vcombine.low %v387_v24, %v395_v25  ;;  %v236_v17 = vld [vmem:[%s10245_s1 + $0x650] sm:$0xff] }
  0x80   :  { %4849 = vmatprep.subr.bf16.mxu1 %v6661_v31  ;;  %v6519_v31 = vcombine.high %v132_v26, %v140_v27 }
  0x81   :  { %4807 = vmatpush1.bf16.msra.mxu0 %v7154_v30  ;;  %v6773_v30 = vcombine.high %v387_v24, %v395_v25  ;;  %v507_v24 = vld [vmem:[%s10245_s1 + $0xec8] sm:$0xff]  ;;  %v244_v25 = vld [vmem:[%s10245_s1 + $0x690] sm:$0xff] }
  0x82   :  { %4808 = vmatprep.subr.bf16.mxu0 %v7171_v34  ;;  %v403_v34 = vld [vmem:[%s10245_s1 + $0xb88] sm:$0xff] }
  0x83   :  { %4850 = vmatpush1.bf16.msra.mxu1 %v6660_v39  ;;  %v6518_v39 = vcombine.low %v132_v26, %v140_v27  ;;  %v6788_v46 = vcombine.low %v403_v34, %v411_v35  ;;  %v252_v26 = vld [vmem:[%s10245_s1 + $0x6d0] sm:$0xff] }
  0x84   :  { %4860 = vmatprep.subr.bf16.mxu1 %v6677_v41  ;;  %v6535_v41 = vcombine.high %v148_v28, %v156_v36 }
  0x85   :  { %4809 = vmatpush1.bf16.msra.mxu0 %v7170_v40  ;;  %v6789_v40 = vcombine.high %v403_v34, %v411_v35  ;;  %v523_v34 = vld [vmem:[%s10245_s1 + $0xf48] sm:$0xff]  ;;  %v260_v35 = vld [vmem:[%s10245_s1 + $0x710] sm:$0xff] }
  0x86   :  { %4942 = vmatprep.subr.bf16.mxu0 %v6423_v42  ;;  %4852 = vmatmul.mubr.bf16.vlgmr.msra.gmra.mrb[4].mxu1 %v7781_v22  ;;  %v419_v42 = vld [vmem:[%s10245_s1 + $0xc08] sm:$0xff] }
  0x87   :  { %4861 = vmatpush1.bf16.msra.mxu1 %v6676_v47  ;;  %4892 = vmatprep.mubr.bf16.mxu1 %v7673_v13  ;;  %v6534_v47 = vcombine.low %v148_v28, %v156_v36  ;;  %v6804_v55 = vcombine.low %v419_v42, %v427_v43  ;;  %v268_v28 = vld [vmem:[%s10245_s1 + $0x750] sm:$0xff] }
  0x88   :  { %4811 = vmatmul.mubr.bf16.vlgmr.msra.gmra.mrb[0].mxu0 %v7705_v32  ;;  %4862 = vmatprep.subr.bf16.mxu1 %v6693_v49  ;;  %v6551_v49 = vcombine.high %v164_v53, %v172_v45 }
  0x89   :  { %4943 = vmatpush1.bf16.msra.mxu0 %v6422_v48  ;;  %4974 = vmatprep.mubr.bf16.mxu0 %v7662_v9  ;;  %v6805_v48 = vcombine.high %v419_v42, %v427_v43  ;;  %v539_v42 = vld [vmem:[%s10245_s1 + $0xfc8] sm:$0xff]  ;;  %v276_v43 = vld [vmem:[%s10245_s1 + $0x790] sm:$0xff] }
  0x8a   :  { %4944 = vmatprep.subr.bf16.mxu0 %v6439_v50  ;;  %v435_v50 = vld [vmem:[%s10245_s1 + $0xc88] sm:$0xff] }
  0x8b   :  { %4863 = vmatpush1.bf16.msra.mxu1 %v6692_v56  ;;  %v6550_v56 = vcombine.low %v164_v53, %v172_v45  ;;  %v6820_v0 = vcombine.low %v435_v50, %v443_v51  ;;  %v284_v53 = vld [vmem:[%s10245_s1 + $0x7d0] sm:$0xff] }
  0x8c   :  { %4864 = vmatprep.subr.bf16.mxu1 %v6709_v58  ;;  %v6567_v58 = vcombine.high %v180_v52, %v188_v54 }
  0x8d   :  { %4945 = vmatpush1.bf16.msra.mxu0 %v6438_v57  ;;  %v6821_v57 = vcombine.high %v435_v50, %v443_v51  ;;  %v555_v50 = vld [vmem:[%s10245_s1 + $0x1048] sm:$0xff]  ;;  %v292_v51 = vld [vmem:[%s10245_s1 + $0x810] sm:$0xff] }
  0x8e   :  { %4946 = vmatprep.subr.bf16.mxu0 %v6455_v59  ;;  %v451_v59 = vld [vmem:[%s10245_s1 + $0xd08] sm:$0xff] }
  0x8f   :  { %4865 = vmatpush1.bf16.msra.mxu1 %v6708_v1  ;;  %v6566_v1 = vcombine.low %v180_v52, %v188_v54  ;;  %v6836_v8 = vcombine.low %v451_v59, %v459_v60  ;;  %v300_v52 = vld [vmem:[%s10245_s1 + $0x850] sm:$0xff] }
  0x90   :  { %4866 = vmatprep.subr.bf16.mxu1 %v6725_v3  ;;  %v6583_v3 = vcombine.high %v196_v61, %v204_v62 }
  0x91   :  { %4947 = vmatpush1.bf16.msra.mxu0 %v6454_v2  ;;  %v6837_v2 = vcombine.high %v451_v59, %v459_v60  ;;  %v571_v59 = vld [vmem:[%s10245_s1 + $0x10c8] sm:$0xff]  ;;  %v308_v60 = vld [vmem:[%s10245_s1 + $0x890] sm:$0xff] }
  0x92   :  { %4948 = vmatprep.subr.bf16.mxu0 %v6471_v4  ;;  %v467_v4 = vld [vmem:[%s10245_s1 + $0xd88] sm:$0xff] }
  0x93   :  { %4867 = vmatpush1.bf16.msra.mxu1 %v6724_v10  ;;  %v6582_v10 = vcombine.low %v196_v61, %v204_v62  ;;  %v6852_v18 = vcombine.low %v467_v4, %v475_v5  ;;  %v316_v61 = vld [vmem:[%s10245_s1 + $0x8d0] sm:$0xff] }
  0x94   :  { %4868 = vmatprep.subr.bf16.mxu1 %v6741_v12  ;;  %v6599_v12 = vcombine.high %v212_v6, %v220_v7 }
  0x95   :  { %4949 = vmatpush1.bf16.msra.mxu0 %v6470_v11  ;;  %v6853_v11 = vcombine.high %v467_v4, %v475_v5  ;;  %v587_v4 = vld [vmem:[%s10245_s1 + $0x1148] sm:$0xff]  ;;  %v324_v5 = vld [vmem:[%s10245_s1 + $0x910] sm:$0xff] }
  0x96   :  { %4950 = vmatprep.subr.bf16.mxu0 %v6487_v14  ;;  %v483_v14 = vld [vmem:[%s10245_s1 + $0xe08] sm:$0xff] }
  0x97   :  { %4869 = vmatpush1.bf16.msra.mxu1 %v6740_v19  ;;  %v6598_v19 = vcombine.low %v212_v6, %v220_v7  ;;  %v6868_v27 = vcombine.low %v483_v14, %v491_v15  ;;  %v332_v6 = vld [vmem:[%s10245_s1 + $0x950] sm:$0xff] }
  0x98   :  { %4870 = vmatprep.subr.bf16.mxu1 %v6757_v21  ;;  %v6615_v21 = vcombine.high %v228_v16, %v236_v17 }
  0x99   :  { %4951 = vmatpush1.bf16.msra.mxu0 %v6486_v20  ;;  %v6869_v20 = vcombine.high %v483_v14, %v491_v15  ;;  %v603_v14 = vld [vmem:[%s10245_s1 + $0x11c8] sm:$0xff]  ;;  %v340_v15 = vld [vmem:[%s10245_s1 + $0x990] sm:$0xff] }
  0x9a   :  { %4952 = vmatprep.subr.bf16.mxu0 %v6503_v23  ;;  %v499_v23 = vld [vmem:[%s10245_s1 + $0xe88] sm:$0xff] }
  0x9b   :  { %4871 = vmatpush1.bf16.msra.mxu1 %v6756_v29  ;;  %v6614_v29 = vcombine.low %v228_v16, %v236_v17  ;;  %v6884_v36 = vcombine.low %v499_v23, %v507_v24  ;;  %v348_v16 = vld [vmem:[%s10245_s1 + $0x9d0] sm:$0xff] }
  0x9c   :  { %4872 = vmatprep.subr.bf16.mxu1 %v6773_v30  ;;  %v6631_v30 = vcombine.high %v244_v25, %v252_v26 }
  0x9d   :  { %4953 = vmatpush1.bf16.msra.mxu0 %v6502_v63  ;;  %v6885_v63 = vcombine.high %v499_v23, %v507_v24  ;;  %v619_v23 = vld [vmem:[%s10245_s1 + $0x1248] sm:$0xff]  ;;  %v356_v24 = vld [vmem:[%s10245_s1 + $0xa10] sm:$0xff] }
  0x9e   :  { %4954 = vmatprep.subr.bf16.mxu0 %v6519_v31  ;;  %v515_v31 = vld [vmem:[%s10245_s1 + $0xf08] sm:$0xff] }
  0x9f   :  { %4873 = vmatpush1.bf16.msra.mxu1 %v6772_v37  ;;  %v6630_v37 = vcombine.low %v244_v25, %v252_v26  ;;  %v6900_v45 = vcombine.low %v515_v31, %v523_v34  ;;  %v364_v25 = vld [vmem:[%s10245_s1 + $0xa50] sm:$0xff] }
  0xa0   :  { %4874 = vmatprep.subr.bf16.mxu1 %v6789_v40  ;;  %v6647_v40 = vcombine.high %v260_v35, %v268_v28 }
  0xa1   :  { %4955 = vmatpush1.bf16.msra.mxu0 %v6518_v39  ;;  %v6901_v39 = vcombine.high %v515_v31, %v523_v34  ;;  %v635_v31 = vld [vmem:[%s10245_s1 + $0x12c8] sm:$0xff]  ;;  %v372_v34 = vld [vmem:[%s10245_s1 + $0xa90] sm:$0xff] }
  0xa2   :  { %4956 = vmatprep.subr.bf16.mxu0 %v6535_v41  ;;  %v531_v41 = vld [vmem:[%s10245_s1 + $0xf88] sm:$0xff] }
  0xa3   :  { %4875 = vmatpush1.bf16.msra.mxu1 %v6788_v46  ;;  %v6646_v46 = vcombine.low %v260_v35, %v268_v28  ;;  %v6916_v54 = vcombine.low %v531_v41, %v539_v42  ;;  %v380_v35 = vld [vmem:[%s10245_s1 + $0xad0] sm:$0xff] }
  0xa4   :  { %4876 = vmatprep.subr.bf16.mxu1 %v6805_v48  ;;  %v6663_v48 = vcombine.high %v276_v43, %v284_v53 }
  0xa5   :  { %4957 = vmatpush1.bf16.msra.mxu0 %v6534_v47  ;;  %v6917_v47 = vcombine.high %v531_v41, %v539_v42  ;;  %v651_v41 = vld [vmem:[%s10245_s1 + $0x1348] sm:$0xff]  ;;  %v388_v42 = vld [vmem:[%s10245_s1 + $0xb10] sm:$0xff] }
  0xa6   :  { %4958 = vmatprep.subr.bf16.mxu0 %v6551_v49  ;;  %v547_v49 = vld [vmem:[%s10245_s1 + $0x1008] sm:$0xff] }
  0xa7   :  { %4877 = vmatpush1.bf16.msra.mxu1 %v6804_v55  ;;  %v6662_v55 = vcombine.low %v276_v43, %v284_v53  ;;  %v6932_v62 = vcombine.low %v547_v49, %v555_v50  ;;  %v396_v43 = vld [vmem:[%s10245_s1 + $0xb50] sm:$0xff] }
  0xa8   :  { %4878 = vmatprep.subr.bf16.mxu1 %v6821_v57  ;;  %v6679_v57 = vcombine.high %v292_v51, %v300_v52 }
  0xa9   :  { %4959 = vmatpush1.bf16.msra.mxu0 %v6550_v56  ;;  %v6933_v56 = vcombine.high %v547_v49, %v555_v50  ;;  %v667_v49 = vld [vmem:[%s10245_s1 + $0x13c8] sm:$0xff]  ;;  %v404_v50 = vld [vmem:[%s10245_s1 + $0xb90] sm:$0xff] }
  0xaa   :  { %4960 = vmatprep.subr.bf16.mxu0 %v6567_v58  ;;  %v563_v58 = vld [vmem:[%s10245_s1 + $0x1088] sm:$0xff] }
  0xab   :  { %4879 = vmatpush1.bf16.msra.mxu1 %v6820_v0  ;;  %v6678_v0 = vcombine.low %v292_v51, %v300_v52  ;;  %v6948_v7 = vcombine.low %v563_v58, %v571_v59  ;;  %v412_v51 = vld [vmem:[%s10245_s1 + $0xbd0] sm:$0xff] }
  0xac   :  { %4880 = vmatprep.subr.bf16.mxu1 %v6837_v2  ;;  %v6695_v2 = vcombine.high %v308_v60, %v316_v61 }
  0xad   :  { %4961 = vmatpush1.bf16.msra.mxu0 %v6566_v1  ;;  %v6949_v1 = vcombine.high %v563_v58, %v571_v59  ;;  %v683_v58 = vld [vmem:[%s10245_s1 + $0x1448] sm:$0xff]  ;;  %v420_v59 = vld [vmem:[%s10245_s1 + $0xc10] sm:$0xff] }
  0xae   :  { %4962 = vmatprep.subr.bf16.mxu0 %v6583_v3  ;;  %v579_v3 = vld [vmem:[%s10245_s1 + $0x1108] sm:$0xff] }
  0xaf   :  { %4881 = vmatpush1.bf16.msra.mxu1 %v6836_v8  ;;  %v6694_v8 = vcombine.low %v308_v60, %v316_v61  ;;  %v6964_v17 = vcombine.low %v579_v3, %v587_v4  ;;  %v428_v60 = vld [vmem:[%s10245_s1 + $0xc50] sm:$0xff] }
  0xb0   :  { %4882 = vmatprep.subr.bf16.mxu1 %v6853_v11  ;;  %v6711_v11 = vcombine.high %v324_v5, %v332_v6 }
  0xb1   :  { %4963 = vmatpush1.bf16.msra.mxu0 %v6582_v10  ;;  %v6965_v10 = vcombine.high %v579_v3, %v587_v4  ;;  %v699_v3 = vld [vmem:[%s10245_s1 + $0x14c8] sm:$0xff]  ;;  %v436_v4 = vld [vmem:[%s10245_s1 + $0xc90] sm:$0xff] }
  0xb2   :  { %4964 = vmatprep.subr.bf16.mxu0 %v6599_v12  ;;  %v595_v12 = vld [vmem:[%s10245_s1 + $0x1188] sm:$0xff] }
  0xb3   :  { %4883 = vmatpush1.bf16.msra.mxu1 %v6852_v18  ;;  %v6710_v18 = vcombine.low %v324_v5, %v332_v6  ;;  %v6980_v26 = vcombine.low %v595_v12, %v603_v14  ;;  %v444_v5 = vld [vmem:[%s10245_s1 + $0xcd0] sm:$0xff] }
  0xb4   :  { %4884 = vmatprep.subr.bf16.mxu1 %v6869_v20  ;;  %v6727_v20 = vcombine.high %v340_v15, %v348_v16 }
  0xb5   :  { %4965 = vmatpush1.bf16.msra.mxu0 %v6598_v19  ;;  %v6981_v19 = vcombine.high %v595_v12, %v603_v14  ;;  %v715_v12 = vld [vmem:[%s10245_s1 + $0x1548] sm:$0xff]  ;;  %v452_v14 = vld [vmem:[%s10245_s1 + $0xd10] sm:$0xff] }
  0xb6   :  { %4966 = vmatprep.subr.bf16.mxu0 %v6615_v21  ;;  %v611_v21 = vld [vmem:[%s10245_s1 + $0x1208] sm:$0xff] }
  0xb7   :  { %4885 = vmatpush1.bf16.msra.mxu1 %v6868_v27  ;;  %v6726_v27 = vcombine.low %v340_v15, %v348_v16  ;;  %v6996_v28 = vcombine.low %v611_v21, %v619_v23  ;;  %v460_v15 = vld [vmem:[%s10245_s1 + $0xd50] sm:$0xff] }
  0xb8   :  { %4886 = vmatprep.subr.bf16.mxu1 %v6885_v63  ;;  %v6743_v63 = vcombine.high %v356_v24, %v364_v25 }
  0xb9   :  { %4967 = vmatpush1.bf16.msra.mxu0 %v6614_v29  ;;  %v6997_v29 = vcombine.high %v611_v21, %v619_v23  ;;  %v731_v21 = vld [vmem:[%s10245_s1 + $0x15c8] sm:$0xff]  ;;  %v468_v23 = vld [vmem:[%s10245_s1 + $0xd90] sm:$0xff] }
  0xba   :  { %4968 = vmatprep.subr.bf16.mxu0 %v6631_v30  ;;  %v627_v30 = vld [vmem:[%s10245_s1 + $0x1288] sm:$0xff] }
  0xbb   :  { %4887 = vmatpush1.bf16.msra.mxu1 %v6884_v36  ;;  %v6742_v36 = vcombine.low %v356_v24, %v364_v25  ;;  %v7012_v53 = vcombine.low %v627_v30, %v635_v31  ;;  %v476_v24 = vld [vmem:[%s10245_s1 + $0xdd0] sm:$0xff] }
  0xbc   :  { %4888 = vmatprep.subr.bf16.mxu1 %v6901_v39  ;;  %v6759_v39 = vcombine.high %v372_v34, %v380_v35 }
  0xbd   :  { %4969 = vmatpush1.bf16.msra.mxu0 %v6630_v37  ;;  %v7013_v37 = vcombine.high %v627_v30, %v635_v31  ;;  %v747_v30 = vld [vmem:[%s10245_s1 + $0x1648] sm:$0xff]  ;;  %v484_v31 = vld [vmem:[%s10245_s1 + $0xe10] sm:$0xff] }
  0xbe   :  { %4970 = vmatprep.subr.bf16.mxu0 %v6647_v40  ;;  %v643_v40 = vld [vmem:[%s10245_s1 + $0x1308] sm:$0xff] }
  0xbf   :  { %4889 = vmatpush1.bf16.msra.mxu1 %v6900_v45  ;;  %v6758_v45 = vcombine.low %v372_v34, %v380_v35  ;;  %v7028_v52 = vcombine.low %v643_v40, %v651_v41  ;;  %v492_v34 = vld [vmem:[%s10245_s1 + $0xe50] sm:$0xff] }
  0xc0   :  { %4890 = vmatprep.subr.bf16.mxu1 %v6917_v47  ;;  %v6775_v47 = vcombine.high %v388_v42, %v396_v43 }
  0xc1   :  { %4971 = vmatpush1.bf16.msra.mxu0 %v6646_v46  ;;  %v7029_v46 = vcombine.high %v643_v40, %v651_v41  ;;  %v763_v40 = vld [vmem:[%s10245_s1 + $0x16c8] sm:$0xff]  ;;  %v500_v41 = vld [vmem:[%s10245_s1 + $0xe90] sm:$0xff] }
  0xc2   :  { %4972 = vmatprep.subr.bf16.mxu0 %v6663_v48  ;;  %v659_v48 = vld [vmem:[%s10245_s1 + $0x1388] sm:$0xff] }
  0xc3   :  { %4891 = vmatpush1.bf16.msra.mxu1 %v6916_v54  ;;  %v6774_v54 = vcombine.low %v388_v42, %v396_v43  ;;  %v7044_v61 = vcombine.low %v659_v48, %v667_v49  ;;  %v508_v42 = vld [vmem:[%s10245_s1 + $0xed0] sm:$0xff] }
  0xc4   :  { %4901 = vmatprep.subr.bf16.mxu1 %v6933_v56  ;;  %v6791_v56 = vcombine.high %v404_v50, %v412_v51 }
  0xc5   :  { %4973 = vmatpush1.bf16.msra.mxu0 %v6662_v55  ;;  %v7045_v55 = vcombine.high %v659_v48, %v667_v49  ;;  %v779_v48 = vld [vmem:[%s10245_s1 + $0x1748] sm:$0xff]  ;;  %v516_v49 = vld [vmem:[%s10245_s1 + $0xf10] sm:$0xff] }
  0xc6   :  { %4983 = vmatprep.subr.bf16.mxu0 %v6679_v57  ;;  %4893 = vmatmul.mubr.bf16.vlgmr.msra.gmra.mrb[4].mxu1 %v7799_v33  ;;  %v675_v57 = vld [vmem:[%s10245_s1 + $0x1408] sm:$0xff] }
  0xc7   :  { %4902 = vmatpush1.bf16.msra.mxu1 %v6932_v62  ;;  %4933 = vmatprep.mubr.bf16.mxu1 %v7808_v38  ;;  %v6790_v62 = vcombine.low %v404_v50, %v412_v51  ;;  %v7060_v6 = vcombine.low %v675_v57, %v683_v58  ;;  %v524_v50 = vld [vmem:[%s10245_s1 + $0xf50] sm:$0xff] }
  0xc8   :  { %4975 = vmatmul.mubr.bf16.vlgmr.msra.gmra.mrb[4].mxu0 %v7781_v22  ;;  %4903 = vmatprep.subr.bf16.mxu1 %v6949_v1  ;;  %v6807_v1 = vcombine.high %v420_v59, %v428_v60 }
  0xc9   :  { %4984 = vmatpush1.bf16.msra.mxu0 %v6678_v0  ;;  %5015 = vmatprep.mubr.bf16.mxu0 %v7673_v13  ;;  %v7061_v0 = vcombine.high %v675_v57, %v683_v58  ;;  %v795_v57 = vld [vmem:[%s10245_s1 + $0x17c8] sm:$0xff]  ;;  %v532_v58 = vld [vmem:[%s10245_s1 + $0xf90] sm:$0xff] }
  0xca   :  { %4985 = vmatprep.subr.bf16.mxu0 %v6695_v2  ;;  %v691_v2 = vld [vmem:[%s10245_s1 + $0x1488] sm:$0xff] }
  0xcb   :  { %4904 = vmatpush1.bf16.msra.mxu1 %v6948_v7  ;;  %v6806_v7 = vcombine.low %v420_v59, %v428_v60  ;;  %v7076_v16 = vcombine.low %v691_v2, %v699_v3  ;;  %v540_v59 = vld [vmem:[%s10245_s1 + $0xfd0] sm:$0xff] }
  0xcc   :  { %4905 = vmatprep.subr.bf16.mxu1 %v6965_v10  ;;  %v6823_v10 = vcombine.high %v436_v4, %v444_v5 }
  0xcd   :  { %4986 = vmatpush1.bf16.msra.mxu0 %v6694_v8  ;;  %v7077_v8 = vcombine.high %v691_v2, %v699_v3  ;;  %v45_v2 = vld [vmem:[%s10245_s1 + $0x58] sm:$0xff]  ;;  %v548_v3 = vld [vmem:[%s10245_s1 + $0x1010] sm:$0xff] }
  0xce   :  { %4987 = vmatprep.subr.bf16.mxu0 %v6711_v11  ;;  %v707_v11 = vld [vmem:[%s10245_s1 + $0x1508] sm:$0xff] }
  0xcf   :  { %4906 = vmatpush1.bf16.msra.mxu1 %v6964_v17  ;;  %v6822_v17 = vcombine.low %v436_v4, %v444_v5  ;;  %v7092_v25 = vcombine.low %v707_v11, %v715_v12  ;;  %v556_v4 = vld [vmem:[%s10245_s1 + $0x1050] sm:$0xff] }
  0xd0   :  { %4907 = vmatprep.subr.bf16.mxu1 %v6981_v19  ;;  %v6839_v19 = vcombine.high %v452_v14, %v460_v15 }
  0xd1   :  { %4988 = vmatpush1.bf16.msra.mxu0 %v6710_v18  ;;  %v7093_v18 = vcombine.high %v707_v11, %v715_v12  ;;  %v61_v11 = vld [vmem:[%s10245_s1 + $0xd8] sm:$0xff]  ;;  %v564_v12 = vld [vmem:[%s10245_s1 + $0x1090] sm:$0xff] }
  0xd2   :  { %4989 = vmatprep.subr.bf16.mxu0 %v6727_v20  ;;  %v723_v20 = vld [vmem:[%s10245_s1 + $0x1588] sm:$0xff] }
  0xd3   :  { %4908 = vmatpush1.bf16.msra.mxu1 %v6980_v26  ;;  %v6838_v26 = vcombine.low %v452_v14, %v460_v15  ;;  %v7108_v35 = vcombine.low %v723_v20, %v731_v21  ;;  %v572_v14 = vld [vmem:[%s10245_s1 + $0x10d0] sm:$0xff] }
  0xd4   :  { %4909 = vmatprep.subr.bf16.mxu1 %v6997_v29  ;;  %v6855_v29 = vcombine.high %v468_v23, %v476_v24 }
  0xd5   :  { %4990 = vmatpush1.bf16.msra.mxu0 %v6726_v27  ;;  %v7109_v27 = vcombine.high %v723_v20, %v731_v21  ;;  %v77_v20 = vld [vmem:[%s10245_s1 + $0x158] sm:$0xff]  ;;  %v580_v21 = vld [vmem:[%s10245_s1 + $0x1110] sm:$0xff] }
  0xd6   :  { %4991 = vmatprep.subr.bf16.mxu0 %v6743_v63  ;;  %v739_v63 = vld [vmem:[%s10245_s1 + $0x1608] sm:$0xff] }
  0xd7   :  { %4910 = vmatpush1.bf16.msra.mxu1 %v6996_v28  ;;  %v6854_v28 = vcombine.low %v468_v23, %v476_v24  ;;  %v7124_v43 = vcombine.low %v739_v63, %v747_v30  ;;  %v588_v23 = vld [vmem:[%s10245_s1 + $0x1150] sm:$0xff] }
  0xd8   :  { %4911 = vmatprep.subr.bf16.mxu1 %v7013_v37  ;;  %v6871_v37 = vcombine.high %v484_v31, %v492_v34 }
  0xd9   :  { %4992 = vmatpush1.bf16.msra.mxu0 %v6742_v36  ;;  %v7125_v36 = vcombine.high %v739_v63, %v747_v30  ;;  %v93_v63 = vld [vmem:[%s10245_s1 + $0x1d8] sm:$0xff]  ;;  %v596_v30 = vld [vmem:[%s10245_s1 + $0x1190] sm:$0xff] }
  0xda   :  { %4993 = vmatprep.subr.bf16.mxu0 %v6759_v39  ;;  %v755_v39 = vld [vmem:[%s10245_s1 + $0x1688] sm:$0xff] }
  0xdb   :  { %4912 = vmatpush1.bf16.msra.mxu1 %v7012_v53  ;;  %v6870_v53 = vcombine.low %v484_v31, %v492_v34  ;;  %v7140_v51 = vcombine.low %v755_v39, %v763_v40  ;;  %v604_v31 = vld [vmem:[%s10245_s1 + $0x11d0] sm:$0xff] }
  0xdc   :  { %4913 = vmatprep.subr.bf16.mxu1 %v7029_v46  ;;  %v6887_v46 = vcombine.high %v500_v41, %v508_v42 }
  0xdd   :  { %4994 = vmatpush1.bf16.msra.mxu0 %v6758_v45  ;;  %v7141_v45 = vcombine.high %v755_v39, %v763_v40  ;;  %v109_v39 = vld [vmem:[%s10245_s1 + $0x258] sm:$0xff]  ;;  %v612_v40 = vld [vmem:[%s10245_s1 + $0x1210] sm:$0xff] }
  0xde   :  { %4995 = vmatprep.subr.bf16.mxu0 %v6775_v47  ;;  %v771_v47 = vld [vmem:[%s10245_s1 + $0x1708] sm:$0xff] }
  0xdf   :  { %4914 = vmatpush1.bf16.msra.mxu1 %v7028_v52  ;;  %v6886_v52 = vcombine.low %v500_v41, %v508_v42  ;;  %v7156_v60 = vcombine.low %v771_v47, %v779_v48  ;;  %v620_v41 = vld [vmem:[%s10245_s1 + $0x1250] sm:$0xff] }
  0xe0   :  { %4915 = vmatprep.subr.bf16.mxu1 %v7045_v55  ;;  %v6903_v55 = vcombine.high %v516_v49, %v524_v50 }
  0xe1   :  { %4996 = vmatpush1.bf16.msra.mxu0 %v6774_v54  ;;  %v7157_v54 = vcombine.high %v771_v47, %v779_v48  ;;  %v125_v47 = vld [vmem:[%s10245_s1 + $0x2d8] sm:$0xff]  ;;  %v628_v48 = vld [vmem:[%s10245_s1 + $0x1290] sm:$0xff] }
  0xe2   :  { %4997 = vmatprep.subr.bf16.mxu0 %v6791_v56  ;;  %v787_v56 = vld [vmem:[%s10245_s1 + $0x1788] sm:$0xff] }
  0xe3   :  { %4916 = vmatpush1.bf16.msra.mxu1 %v7044_v61  ;;  %v6902_v61 = vcombine.low %v516_v49, %v524_v50  ;;  %v7172_v5 = vcombine.low %v787_v56, %v795_v57  ;;  %v636_v49 = vld [vmem:[%s10245_s1 + $0x12d0] sm:$0xff] }
  0xe4   :  { %4917 = vmatprep.subr.bf16.mxu1 %v7061_v0  ;;  %v6919_v0 = vcombine.high %v532_v58, %v540_v59 }
  0xe5   :  { %4998 = vmatpush1.bf16.msra.mxu0 %v6790_v62  ;;  %v7173_v62 = vcombine.high %v787_v56, %v795_v57  ;;  %v141_v56 = vld [vmem:[%s10245_s1 + $0x358] sm:$0xff]  ;;  %v644_v57 = vld [vmem:[%s10245_s1 + $0x1310] sm:$0xff] }
  0xe6   :  { %4999 = vmatprep.subr.bf16.mxu0 %v6807_v1  ;;  %v37_v1 = vld [vmem:[%s10245_s1 + $0x18] sm:$0xff] }
  0xe7   :  { %4918 = vmatpush1.bf16.msra.mxu1 %v7060_v6  ;;  %v6918_v6 = vcombine.low %v532_v58, %v540_v59  ;;  %v6424_v15 = vcombine.low %v37_v1, %v45_v2  ;;  %v652_v58 = vld [vmem:[%s10245_s1 + $0x1350] sm:$0xff] }
  0xe8   :  { %4919 = vmatprep.subr.bf16.mxu1 %v7077_v8  ;;  %v6935_v8 = vcombine.high %v548_v3, %v556_v4 }
  0xe9   :  { %5000 = vmatpush1.bf16.msra.mxu0 %v6806_v7  ;;  %v6425_v7 = vcombine.high %v37_v1, %v45_v2  ;;  %v149_v1 = vld [vmem:[%s10245_s1 + $0x398] sm:$0xff] }
  0xea   :  { %5001 = vmatprep.subr.bf16.mxu0 %v6823_v10  ;;  %v53_v10 = vld [vmem:[%s10245_s1 + $0x98] sm:$0xff] }
  0xeb   :  { %4920 = vmatpush1.bf16.msra.mxu1 %v7076_v16  ;;  %v6934_v16 = vcombine.low %v548_v3, %v556_v4  ;;  %v6440_v24 = vcombine.low %v53_v10, %v61_v11  ;;  %v157_v2 = vld [vmem:[%s10245_s1 + $0x3d8] sm:$0xff]  ;;  %v660_v4 = vld [vmem:[%s10245_s1 + $0x1390] sm:$0xff] }
  0xec   :  { %4921 = vmatprep.subr.bf16.mxu1 %v7093_v18  ;;  %v6951_v18 = vcombine.high %v564_v12, %v572_v14 }
  0xed   :  { %5002 = vmatpush1.bf16.msra.mxu0 %v6822_v17  ;;  %v6441_v17 = vcombine.high %v53_v10, %v61_v11  ;;  %v7030_v10 = vcombine.low %v644_v57, %v652_v58  ;;  %v6537_v11 = vcombine.high %v149_v1, %v157_v2 }
  0xee   :  { %5003 = vmatprep.subr.bf16.mxu0 %v6839_v19  ;;  %v69_v19 = vld [vmem:[%s10245_s1 + $0x118] sm:$0xff] }
  0xef   :  { %4922 = vmatpush1.bf16.msra.mxu1 %v7092_v25  ;;  %v6950_v25 = vcombine.low %v564_v12, %v572_v14  ;;  %v6456_v34 = vcombine.low %v69_v19, %v77_v20  ;;  %v165_v14 = vld [vmem:[%s10245_s1 + $0x418] sm:$0xff] }
  0xf0   :  { %4923 = vmatprep.subr.bf16.mxu1 %v7109_v27  ;;  %v6967_v27 = vcombine.high %v580_v21, %v588_v23 }
  0xf1   :  { %5004 = vmatpush1.bf16.msra.mxu0 %v6838_v26  ;;  %v6457_v26 = vcombine.high %v69_v19, %v77_v20 }
  0xf2   :  { %5005 = vmatprep.subr.bf16.mxu0 %v6855_v29  ;;  %v85_v29 = vld [vmem:[%s10245_s1 + $0x198] sm:$0xff] }
  0xf3   :  { %4924 = vmatpush1.bf16.msra.mxu1 %v7108_v35  ;;  %v6966_v35 = vcombine.low %v580_v21, %v588_v23  ;;  %v6472_v42 = vcombine.low %v85_v29, %v93_v63  ;;  %v181_v23 = vld [vmem:[%s10245_s1 + $0x498] sm:$0xff] }
  0xf4   :  { %4925 = vmatprep.subr.bf16.mxu1 %v7125_v36  ;;  %v6983_v36 = vcombine.high %v596_v30, %v604_v31 }
  0xf5   :  { %5006 = vmatpush1.bf16.msra.mxu0 %v6854_v28  ;;  %v6473_v28 = vcombine.high %v85_v29, %v93_v63 }
  0xf6   :  { %5007 = vmatprep.subr.bf16.mxu0 %v6871_v37  ;;  %v101_v37 = vld [vmem:[%s10245_s1 + $0x218] sm:$0xff] }
  0xf7   :  { %4926 = vmatpush1.bf16.msra.mxu1 %v7124_v43  ;;  %v6982_v43 = vcombine.low %v596_v30, %v604_v31  ;;  %v6488_v50 = vcombine.low %v101_v37, %v109_v39  ;;  %v197_v31 = vld [vmem:[%s10245_s1 + $0x518] sm:$0xff] }
  0xf8   :  { %4927 = vmatprep.subr.bf16.mxu1 %v7141_v45  ;;  %v6999_v45 = vcombine.high %v612_v40, %v620_v41 }
  0xf9   :  { %5008 = vmatpush1.bf16.msra.mxu0 %v6870_v53  ;;  %v6489_v53 = vcombine.high %v101_v37, %v109_v39 }
  0xfa   :  { %5009 = vmatprep.subr.bf16.mxu0 %v6887_v46  ;;  %v117_v46 = vld [vmem:[%s10245_s1 + $0x298] sm:$0xff] }
  0xfb   :  { %4928 = vmatpush1.bf16.msra.mxu1 %v7140_v51  ;;  %v6998_v51 = vcombine.low %v612_v40, %v620_v41  ;;  %v6504_v59 = vcombine.low %v117_v46, %v125_v47  ;;  %v213_v41 = vld [vmem:[%s10245_s1 + $0x598] sm:$0xff] }
  0xfc   :  { %4929 = vmatprep.subr.bf16.mxu1 %v7157_v54  ;;  %v7015_v54 = vcombine.high %v628_v48, %v636_v49 }
  0xfd   :  { %5010 = vmatpush1.bf16.msra.mxu0 %v6886_v52  ;;  %v6505_v52 = vcombine.high %v117_v46, %v125_v47 }
  0xfe   :  { %5011 = vmatprep.subr.bf16.mxu0 %v6903_v55  ;;  %v133_v55 = vld [vmem:[%s10245_s1 + $0x318] sm:$0xff] }
  0xff   :  { %4930 = vmatpush1.bf16.msra.mxu1 %v7156_v60  ;;  %v7014_v60 = vcombine.low %v628_v48, %v636_v49  ;;  %v229_v49 = vld [vmem:[%s10245_s1 + $0x618] sm:$0xff] }
 0x100   :  { %4931 = vmatprep.subr.bf16.mxu1 %v7173_v62 }
 0x101   :  { %5012 = vmatpush1.bf16.msra.mxu0 %v6902_v61  ;;  %v6521_v61 = vcombine.high %v133_v55, %v141_v56 }
 0x102   :  { %5013 = vmatprep.subr.bf16.mxu0 %v6919_v0  ;;  %v7031_v0 = vcombine.high %v644_v57, %v652_v58  ;;  %v245_v58 = vld [vmem:[%s10245_s1 + $0x698] sm:$0xff] }
 0x103   :  { %4932 = vmatpush1.bf16.msra.mxu1 %v7172_v5  ;;  %v668_v5 = vld [vmem:[%s10245_s1 + $0x13d0] sm:$0xff] }
 0x104   :  { %5065 = vmatprep.subr.bf16.mxu1 %v6425_v7  ;;  %v6520_v7 = vcombine.low %v133_v55, %v141_v56  ;;  %v7047_v12 = vcombine.high %v660_v4, %v668_v5  ;;  %v7046_v19 = vcombine.low %v660_v4, %v668_v5  ;;  %v261_v5 = vld [vmem:[%s10245_s1 + $0x718] sm:$0xff] }
 0x105   :  { %5014 = vmatpush1.bf16.msra.mxu0 %v6918_v6 }
 0x106   :  { %5024 = vmatprep.subr.bf16.mxu0 %v6935_v8  ;;  %4934 = vmatmul.mubr.bf16.vlgmr.msra.gmra.mrb[4].mxu1 %v7705_v32 }
 0x107   :  { %5066 = vmatpush1.bf16.msra.mxu1 %v6424_v15  ;;  %5097 = vmatprep.mubr.bf16.mxu1 %v7662_v9  ;;  %v173_v15 = vld [vmem:[%s10245_s1 + $0x458] sm:$0xff] }
 0x108   :  { %5016 = vmatmul.mubr.bf16.vlgmr.msra.gmra.mrb[4].mxu0 %v7799_v33  ;;  %5067 = vmatprep.subr.bf16.mxu1 %v6441_v17  ;;  %v684_v17 = vld [vmem:[%s10245_s1 + $0x1450] sm:$0xff]  ;;  %v6553_v20 = vcombine.high %v165_v14, %v173_v15 }
 0x109   :  { %5025 = vmatpush1.bf16.msra.mxu0 %v6934_v16  ;;  %5056 = vmatprep.mubr.bf16.mxu0 %v7808_v38  ;;  %v676_v16 = vld [vmem:[%s10245_s1 + $0x1410] sm:$0xff] }
 0x10a   :  { %5026 = vmatprep.subr.bf16.mxu0 %v6951_v18  ;;  %v6536_v18 = vcombine.low %v149_v1, %v157_v2  ;;  %v7063_v21 = vcombine.high %v676_v16, %v684_v17  ;;  %v7062_v29 = vcombine.low %v676_v16, %v684_v17  ;;  %v285_v16 = vld [vmem:[%s10245_s1 + $0x7d8] sm:$0xff]  ;;  %v788_v17 = vld [vmem:[%s10245_s1 + $0x1790] sm:$0xff] }
 0x10b   :  { %5068 = vmatpush1.bf16.msra.mxu1 %v6440_v24  ;;  %v189_v24 = vld [vmem:[%s10245_s1 + $0x4d8] sm:$0xff] }
 0x10c   :  { %5069 = vmatprep.subr.bf16.mxu1 %v6457_v26  ;;  %v700_v26 = vld [vmem:[%s10245_s1 + $0x14d0] sm:$0xff]  ;;  %v6569_v63 = vcombine.high %v181_v23, %v189_v24 }
 0x10d   :  { %5027 = vmatpush1.bf16.msra.mxu0 %v6950_v25  ;;  %v692_v25 = vld [vmem:[%s10245_s1 + $0x1490] sm:$0xff] }
 0x10e   :  { %5028 = vmatprep.subr.bf16.mxu0 %v6967_v27  ;;  %v6552_v27 = vcombine.low %v165_v14, %v173_v15  ;;  %v7079_v30 = vcombine.high %v692_v25, %v700_v26  ;;  %v7078_v37 = vcombine.low %v692_v25, %v700_v26  ;;  %v277_v15 = vld [vmem:[%s10245_s1 + $0x798] sm:$0xff]  ;;  %v38_v26 = vld [vmem:[%s10245_s1 + $0x20] sm:$0xff] }
 0x10f   :  { %5070 = vmatpush1.bf16.msra.mxu1 %v6456_v34  ;;  %v205_v34 = vld [vmem:[%s10245_s1 + $0x558] sm:$0xff] }
 0x110   :  { %5071 = vmatprep.subr.bf16.mxu1 %v6473_v28  ;;  %v716_v28 = vld [vmem:[%s10245_s1 + $0x1550] sm:$0xff]  ;;  %v6585_v39 = vcombine.high %v197_v31, %v205_v34  ;;  %v301_v25 = vld [vmem:[%s10245_s1 + $0x858] sm:$0xff] }
 0x111   :  { %5029 = vmatpush1.bf16.msra.mxu0 %v6966_v35  ;;  %v708_v35 = vld [vmem:[%s10245_s1 + $0x1510] sm:$0xff] }
 0x112   :  { %5030 = vmatprep.subr.bf16.mxu0 %v6983_v36  ;;  %v6568_v36 = vcombine.low %v181_v23, %v189_v24  ;;  %v7095_v40 = vcombine.high %v708_v35, %v716_v28  ;;  %v7094_v46 = vcombine.low %v708_v35, %v716_v28  ;;  %v293_v24 = vld [vmem:[%s10245_s1 + $0x818] sm:$0xff]  ;;  %v54_v28 = vld [vmem:[%s10245_s1 + $0xa0] sm:$0xff] }
 0x113   :  { %5072 = vmatpush1.bf16.msra.mxu1 %v6472_v42  ;;  %v221_v42 = vld [vmem:[%s10245_s1 + $0x5d8] sm:$0xff] }
 0x114   :  { %5073 = vmatprep.subr.bf16.mxu1 %v6489_v53  ;;  %v732_v53 = vld [vmem:[%s10245_s1 + $0x15d0] sm:$0xff]  ;;  %v6601_v47 = vcombine.high %v213_v41, %v221_v42  ;;  %v317_v35 = vld [vmem:[%s10245_s1 + $0x8d8] sm:$0xff] }
 0x115   :  { %5031 = vmatpush1.bf16.msra.mxu0 %v6982_v43  ;;  %v724_v43 = vld [vmem:[%s10245_s1 + $0x1590] sm:$0xff] }
 0x116   :  { %5032 = vmatprep.subr.bf16.mxu0 %v6999_v45  ;;  %v6584_v45 = vcombine.low %v197_v31, %v205_v34  ;;  %v7111_v48 = vcombine.high %v724_v43, %v732_v53  ;;  %v7110_v55 = vcombine.low %v724_v43, %v732_v53  ;;  %v309_v34 = vld [vmem:[%s10245_s1 + $0x898] sm:$0xff]  ;;  %v70_v53 = vld [vmem:[%s10245_s1 + $0x120] sm:$0xff] }
 0x117   :  { %5074 = vmatpush1.bf16.msra.mxu1 %v6488_v50  ;;  %v237_v50 = vld [vmem:[%s10245_s1 + $0x658] sm:$0xff] }
 0x118   :  { %5075 = vmatprep.subr.bf16.mxu1 %v6505_v52  ;;  %v748_v52 = vld [vmem:[%s10245_s1 + $0x1650] sm:$0xff]  ;;  %v6617_v56 = vcombine.high %v229_v49, %v237_v50  ;;  %v333_v43 = vld [vmem:[%s10245_s1 + $0x958] sm:$0xff] }
 0x119   :  { %5033 = vmatpush1.bf16.msra.mxu0 %v6998_v51  ;;  %v8456_v62 = vpop.f32.mrb[0].mxu1  ;;  %v740_v51 = vld [vmem:[%s10245_s1 + $0x1610] sm:$0xff] }
 0x11a   :  { %5034 = vmatprep.subr.bf16.mxu0 %v7015_v54  ;;  %v8464_v3 = vpop.f32.mrb[1].mxu1  ;;  %v6600_v54 = vcombine.low %v213_v41, %v221_v42  ;;  %v7127_v57 = vcombine.high %v740_v51, %v748_v52  ;;  %v7126_v1 = vcombine.low %v740_v51, %v748_v52  ;;  %v325_v42 = vld [vmem:[%s10245_s1 + $0x918] sm:$0xff]  ;;  %v86_v52 = vld [vmem:[%s10245_s1 + $0x1a0] sm:$0xff] }
 0x11b   :  { %v4734_v6 = vpop.f32.mrb[2].mxu1  ;;  %5076 = vmatpush1.bf16.msra.mxu1 %v6504_v59  ;;  %v253_v59 = vld [vmem:[%s10245_s1 + $0x6d8] sm:$0xff] }
 0x11c   :  { %v4735_v8 = vpop.f32.mrb[3].mxu1  ;;  %5077 = vmatprep.subr.bf16.mxu1 %v6521_v61  ;;  %v764_v61 = vld [vmem:[%s10245_s1 + $0x16d0] sm:$0xff]  ;;  %v6633_v2 = vcombine.high %v245_v58, %v253_v59  ;;  %v269_v6 = vld [vmem:[%s10245_s1 + $0x758] sm:$0xff] }
 0x11d   :  { %5035 = vmatpush1.bf16.msra.mxu0 %v7014_v60  ;;  %v756_v60 = vld [vmem:[%s10245_s1 + $0x1690] sm:$0xff]  ;;  %v349_v51 = vld [vmem:[%s10245_s1 + $0x9d8] sm:$0xff] }
 0x11e   :  { %5036 = vmatprep.subr.bf16.mxu0 %v7031_v0  ;;  %v6616_v0 = vcombine.low %v229_v49, %v237_v50  ;;  %v7143_v4 = vcombine.high %v756_v60, %v764_v61  ;;  %v780_v8 = vld [vmem:[%s10245_s1 + $0x1750] sm:$0xff]  ;;  %v341_v50 = vld [vmem:[%s10245_s1 + $0x998] sm:$0xff] }
 0x11f   :  { %5078 = vmatpush1.bf16.msra.mxu1 %v6520_v7  ;;  %v772_v7 = vld [vmem:[%s10245_s1 + $0x1710] sm:$0xff] }
 0x120   :  { %5079 = vmatprep.subr.bf16.mxu1 %v6537_v11  ;;  %v7142_v11 = vcombine.low %v756_v60, %v764_v61  ;;  %v7159_v14 = vcombine.high %v772_v7, %v780_v8  ;;  %v365_v60 = vld [vmem:[%s10245_s1 + $0xa58] sm:$0xff]  ;;  %v102_v61 = vld [vmem:[%s10245_s1 + $0x220] sm:$0xff] }
 0x121   :  { %5037 = vmatpush1.bf16.msra.mxu0 %v7030_v10  ;;  %v6632_v10 = vcombine.low %v245_v58, %v253_v59  ;;  %v357_v59 = vld [vmem:[%s10245_s1 + $0xa18] sm:$0xff] }
 0x122   :  { %5038 = vmatprep.subr.bf16.mxu0 %v7047_v12  ;;  %v6649_v12 = vcombine.high %v261_v5, %v269_v6 }
 0x123   :  { %5080 = vmatpush1.bf16.msra.mxu1 %v6536_v18  ;;  %v796_v18 = vld [vmem:[%s10245_s1 + $0x17d0] sm:$0xff] }
 0x124   :  { %5081 = vmatprep.subr.bf16.mxu1 %v6553_v20  ;;  %v7158_v20 = vcombine.low %v772_v7, %v780_v8  ;;  %v7175_v23 = vcombine.high %v788_v17, %v796_v18  ;;  %v381_v7 = vld [vmem:[%s10245_s1 + $0xad8] sm:$0xff]  ;;  %v118_v8 = vld [vmem:[%s10245_s1 + $0x2a0] sm:$0xff] }
 0x125   :  { %5039 = vmatpush1.bf16.msra.mxu0 %v7046_v19  ;;  %v6648_v19 = vcombine.low %v261_v5, %v269_v6  ;;  %v373_v6 = vld [vmem:[%s10245_s1 + $0xa98] sm:$0xff] }
 0x126   :  { %5040 = vmatprep.subr.bf16.mxu0 %v7063_v21  ;;  %v6665_v21 = vcombine.high %v277_v15, %v285_v16 }
 0x127   :  { %5082 = vmatpush1.bf16.msra.mxu1 %v6552_v27  ;;  %v46_v27 = vld [vmem:[%s10245_s1 + $0x60] sm:$0xff] }
 0x128   :  { %5083 = vmatprep.subr.bf16.mxu1 %v6569_v63  ;;  %v7174_v63 = vcombine.low %v788_v17, %v796_v18  ;;  %v6427_v31 = vcombine.high %v38_v26, %v46_v27  ;;  %v397_v17 = vld [vmem:[%s10245_s1 + $0xb58] sm:$0xff]  ;;  %v134_v18 = vld [vmem:[%s10245_s1 + $0x320] sm:$0xff] }
 0x129   :  { %5041 = vmatpush1.bf16.msra.mxu0 %v7062_v29  ;;  %v6664_v29 = vcombine.low %v277_v15, %v285_v16  ;;  %v389_v16 = vld [vmem:[%s10245_s1 + $0xb18] sm:$0xff] }
 0x12a   :  { %5042 = vmatprep.subr.bf16.mxu0 %v7079_v30  ;;  %v6681_v30 = vcombine.high %v293_v24, %v301_v25 }
 0x12b   :  { %5084 = vmatpush1.bf16.msra.mxu1 %v6568_v36  ;;  %v62_v36 = vld [vmem:[%s10245_s1 + $0xe0] sm:$0xff] }
 0x12c   :  { %5085 = vmatprep.subr.bf16.mxu1 %v6585_v39  ;;  %v6426_v39 = vcombine.low %v38_v26, %v46_v27  ;;  %v6443_v41 = vcombine.high %v54_v28, %v62_v36  ;;  %v413_v26 = vld [vmem:[%s10245_s1 + $0xbd8] sm:$0xff] }
 0x12d   :  { %5043 = vmatpush1.bf16.msra.mxu0 %v7078_v37  ;;  %v6680_v37 = vcombine.low %v293_v24, %v301_v25  ;;  %v405_v25 = vld [vmem:[%s10245_s1 + $0xb98] sm:$0xff] }
 0x12e   :  { %5044 = vmatprep.subr.bf16.mxu0 %v7095_v40  ;;  %v6697_v40 = vcombine.high %v309_v34, %v317_v35 }
 0x12f   :  { %5086 = vmatpush1.bf16.msra.mxu1 %v6584_v45  ;;  %v78_v45 = vld [vmem:[%s10245_s1 + $0x160] sm:$0xff] }
 0x130   :  { %5087 = vmatprep.subr.bf16.mxu1 %v6601_v47  ;;  %v6442_v47 = vcombine.low %v54_v28, %v62_v36  ;;  %v6459_v49 = vcombine.high %v70_v53, %v78_v45 }
 0x131   :  { %5045 = vmatpush1.bf16.msra.mxu0 %v7094_v46  ;;  %v6696_v46 = vcombine.low %v309_v34, %v317_v35  ;;  %v6776_v34 = vcombine.low %v389_v16, %v397_v17 }
 0x132   :  { %5046 = vmatprep.subr.bf16.mxu0 %v7111_v48  ;;  %v6713_v48 = vcombine.high %v325_v42, %v333_v43 }
 0x133   :  { %5088 = vmatpush1.bf16.msra.mxu1 %v6600_v54  ;;  %v94_v54 = vld [vmem:[%s10245_s1 + $0x1e0] sm:$0xff] }
 0x134   :  { %5089 = vmatprep.subr.bf16.mxu1 %v6617_v56  ;;  %v6458_v56 = vcombine.low %v70_v53, %v78_v45  ;;  %v6475_v58 = vcombine.high %v86_v52, %v94_v54 }
 0x135   :  { %5047 = vmatpush1.bf16.msra.mxu0 %v7110_v55  ;;  %v6712_v55 = vcombine.low %v325_v42, %v333_v43  ;;  %v174_v42 = vld [vmem:[%s10245_s1 + $0x460] sm:$0xff]  ;;  %v6792_v43 = vcombine.low %v405_v25, %v413_v26 }
 0x136   :  { %5048 = vmatprep.subr.bf16.mxu0 %v7127_v57  ;;  %v6729_v57 = vcombine.high %v341_v50, %v349_v51 }
 0x137   :  { %5090 = vmatpush1.bf16.msra.mxu1 %v6616_v0  ;;  %v110_v0 = vld [vmem:[%s10245_s1 + $0x260] sm:$0xff] }
 0x138   :  { %5091 = vmatprep.subr.bf16.mxu1 %v6633_v2  ;;  %v6474_v2 = vcombine.low %v86_v52, %v94_v54  ;;  %v6491_v5 = vcombine.high %v102_v61, %v110_v0 }
 0x139   :  { %5049 = vmatpush1.bf16.msra.mxu0 %v7126_v1  ;;  %v6728_v1 = vcombine.low %v341_v50, %v349_v51  ;;  %v190_v50 = vld [vmem:[%s10245_s1 + $0x4e0] sm:$0xff] }
 0x13a   :  { %5050 = vmatprep.subr.bf16.mxu0 %v7143_v4  ;;  %v6745_v4 = vcombine.high %v357_v59, %v365_v60 }
 0x13b   :  { %5092 = vmatpush1.bf16.msra.mxu1 %v6632_v10  ;;  %v126_v10 = vld [vmem:[%s10245_s1 + $0x2e0] sm:$0xff] }
 0x13c   :  { %5093 = vmatprep.subr.bf16.mxu1 %v6649_v12  ;;  %v6490_v12 = vcombine.low %v102_v61, %v110_v0  ;;  %v6507_v15 = vcombine.high %v118_v8, %v126_v10 }
 0x13d   :  { %5051 = vmatpush1.bf16.msra.mxu0 %v7142_v11  ;;  %v6744_v11 = vcombine.low %v357_v59, %v365_v60  ;;  %v206_v59 = vld [vmem:[%s10245_s1 + $0x560] sm:$0xff] }
 0x13e   :  { %5052 = vmatprep.subr.bf16.mxu0 %v7159_v14  ;;  %v6761_v14 = vcombine.high %v373_v6, %v381_v7 }
 0x13f   :  { %5094 = vmatpush1.bf16.msra.mxu1 %v6648_v19  ;;  %v142_v19 = vld [vmem:[%s10245_s1 + $0x360] sm:$0xff] }
 0x140   :  { %5095 = vmatprep.subr.bf16.mxu1 %v6665_v21  ;;  %v6506_v21 = vcombine.low %v118_v8, %v126_v10  ;;  %v6523_v24 = vcombine.high %v134_v18, %v142_v19  ;;  %v6522_v36 = vcombine.low %v134_v18, %v142_v19 }
 0x141   :  { %5053 = vmatpush1.bf16.msra.mxu0 %v7158_v20  ;;  %v6760_v20 = vcombine.low %v373_v6, %v381_v7  ;;  %v222_v6 = vld [vmem:[%s10245_s1 + $0x5e0] sm:$0xff] }
 0x142   :  { %5054 = vmatprep.subr.bf16.mxu0 %v7175_v23  ;;  %v6777_v23 = vcombine.high %v389_v16, %v397_v17  ;;  %v238_v16 = vld [vmem:[%s10245_s1 + $0x660] sm:$0xff] }
 0x143   :  { %5096 = vmatpush1.bf16.msra.mxu1 %v6664_v29  ;;  %v150_v29 = vld [vmem:[%s10245_s1 + $0x3a0] sm:$0xff] }
 0x144   :  { %5106 = vmatprep.subr.bf16.mxu1 %v6681_v30 }
 0x145   :  { %5055 = vmatpush1.bf16.msra.mxu0 %v7174_v63  ;;  %v158_v63 = vld [vmem:[%s10245_s1 + $0x3e0] sm:$0xff] }
 0x146   :  { %5188 = vmatprep.subr.bf16.mxu0 %v6427_v31  ;;  %5098 = vmatmul.mubr.bf16.vlgmr.msra.gmra.mrb[8].mxu1 %v7781_v22  ;;  %v6538_v53 = vcombine.low %v150_v29, %v158_v63 }
 0x147   :  { %5107 = vmatpush1.bf16.msra.mxu1 %v6680_v37  ;;  %5138 = vmatprep.mubr.bf16.mxu1 %v7673_v13  ;;  %v6793_v37 = vcombine.high %v405_v25, %v413_v26  ;;  %v254_v25 = vld [vmem:[%s10245_s1 + $0x6e0] sm:$0xff] }
 0x148   :  { %5057 = vmatmul.mubr.bf16.vlgmr.msra.gmra.mrb[4].mxu0 %v7705_v32  ;;  %5108 = vmatprep.subr.bf16.mxu1 %v6697_v40  ;;  %v6539_v40 = vcombine.high %v150_v29, %v158_v63 }
 0x149   :  { %5189 = vmatpush1.bf16.msra.mxu0 %v6426_v39  ;;  %5220 = vmatprep.mubr.bf16.mxu0 %v7662_v9 }
 0x14a   :  { %5190 = vmatprep.subr.bf16.mxu0 %v6443_v41  ;;  %v421_v41 = vld [vmem:[%s10245_s1 + $0xc18] sm:$0xff] }
 0x14b   :  { %5109 = vmatpush1.bf16.msra.mxu1 %v6696_v46 }
 0x14c   :  { %5110 = vmatprep.subr.bf16.mxu1 %v6713_v48  ;;  %v445_v48 = vld [vmem:[%s10245_s1 + $0xcd8] sm:$0xff] }
 0x14d   :  { %5191 = vmatpush1.bf16.msra.mxu0 %v6442_v47  ;;  %v437_v47 = vld [vmem:[%s10245_s1 + $0xc98] sm:$0xff] }
 0x14e   :  { %5192 = vmatprep.subr.bf16.mxu0 %v6459_v49  ;;  %v182_v49 = vld [vmem:[%s10245_s1 + $0x4a0] sm:$0xff]  ;;  %v6825_v54 = vcombine.high %v437_v47, %v445_v48  ;;  %v6824_v60 = vcombine.low %v437_v47, %v445_v48  ;;  %v549_v48 = vld [vmem:[%s10245_s1 + $0x1018] sm:$0xff] }
 0x14f   :  { %5111 = vmatpush1.bf16.msra.mxu1 %v6712_v55  ;;  %v6571_v55 = vcombine.high %v182_v49, %v190_v50  ;;  %v6570_v61 = vcombine.low %v182_v49, %v190_v50  ;;  %v557_v49 = vld [vmem:[%s10245_s1 + $0x1058] sm:$0xff]  ;;  %v294_v50 = vld [vmem:[%s10245_s1 + $0x820] sm:$0xff] }
 0x150   :  { %5112 = vmatprep.subr.bf16.mxu1 %v6729_v57  ;;  %v461_v57 = vld [vmem:[%s10245_s1 + $0xd58] sm:$0xff] }
 0x151   :  { %5193 = vmatpush1.bf16.msra.mxu0 %v6458_v56  ;;  %v453_v56 = vld [vmem:[%s10245_s1 + $0xd18] sm:$0xff] }
 0x152   :  { %5194 = vmatprep.subr.bf16.mxu0 %v6475_v58  ;;  %v198_v58 = vld [vmem:[%s10245_s1 + $0x520] sm:$0xff]  ;;  %v6841_v0 = vcombine.high %v453_v56, %v461_v57  ;;  %v6840_v7 = vcombine.low %v453_v56, %v461_v57  ;;  %v565_v57 = vld [vmem:[%s10245_s1 + $0x1098] sm:$0xff] }
 0x153   :  { %5113 = vmatpush1.bf16.msra.mxu1 %v6728_v1  ;;  %v6587_v1 = vcombine.high %v198_v58, %v206_v59  ;;  %v6586_v8 = vcombine.low %v198_v58, %v206_v59  ;;  %v573_v58 = vld [vmem:[%s10245_s1 + $0x10d8] sm:$0xff]  ;;  %v310_v59 = vld [vmem:[%s10245_s1 + $0x8a0] sm:$0xff] }
 0x154   :  { %5114 = vmatprep.subr.bf16.mxu1 %v6745_v4  ;;  %v477_v4 = vld [vmem:[%s10245_s1 + $0xdd8] sm:$0xff] }
 0x155   :  { %5195 = vmatpush1.bf16.msra.mxu0 %v6474_v2  ;;  %v469_v2 = vld [vmem:[%s10245_s1 + $0xd98] sm:$0xff] }
 0x156   :  { %5196 = vmatprep.subr.bf16.mxu0 %v6491_v5  ;;  %v214_v5 = vld [vmem:[%s10245_s1 + $0x5a0] sm:$0xff]  ;;  %v6857_v10 = vcombine.high %v469_v2, %v477_v4  ;;  %v6856_v17 = vcombine.low %v469_v2, %v477_v4  ;;  %v581_v4 = vld [vmem:[%s10245_s1 + $0x1118] sm:$0xff] }
 0x157   :  { %5115 = vmatpush1.bf16.msra.mxu1 %v6744_v11  ;;  %v6603_v11 = vcombine.high %v214_v5, %v222_v6  ;;  %v6602_v18 = vcombine.low %v214_v5, %v222_v6  ;;  %v589_v5 = vld [vmem:[%s10245_s1 + $0x1158] sm:$0xff]  ;;  %v326_v6 = vld [vmem:[%s10245_s1 + $0x920] sm:$0xff] }
 0x158   :  { %5116 = vmatprep.subr.bf16.mxu1 %v6761_v14  ;;  %v493_v14 = vld [vmem:[%s10245_s1 + $0xe58] sm:$0xff] }
 0x159   :  { %5197 = vmatpush1.bf16.msra.mxu0 %v6490_v12  ;;  %v485_v12 = vld [vmem:[%s10245_s1 + $0xe18] sm:$0xff] }
 0x15a   :  { %5198 = vmatprep.subr.bf16.mxu0 %v6507_v15  ;;  %v230_v15 = vld [vmem:[%s10245_s1 + $0x620] sm:$0xff]  ;;  %v6873_v19 = vcombine.high %v485_v12, %v493_v14  ;;  %v6872_v26 = vcombine.low %v485_v12, %v493_v14  ;;  %v597_v14 = vld [vmem:[%s10245_s1 + $0x1198] sm:$0xff] }
 0x15b   :  { %v4812_v27 = vpop.f32.mrb[0].mxu0  ;;  %5117 = vmatpush1.bf16.msra.mxu1 %v6760_v20  ;;  %v6619_v20 = vcombine.high %v230_v15, %v238_v16 }
 0x15c   :  { %v8669_v30 = vadd.f32 %v4812_v27, %v8456_v62  ;;  %v4814_v31 = vpop.f32.mrb[1].mxu0  ;;  %5118 = vmatprep.subr.bf16.mxu1 %v6777_v23  ;;  %v429_v62 = vld [vmem:[%s10245_s1 + $0xc58] sm:$0xff]  ;;  %v6618_v27 = vcombine.low %v230_v15, %v238_v16  ;;  %v342_v16 = vld [vmem:[%s10245_s1 + $0x9a0] sm:$0xff] }
 0x15d   :  { %v8672_v35 = vadd.f32 %v4814_v31, %v8464_v3  ;;  %v4816_v28 = vpop.f32.mrb[2].mxu0  ;;  %5199 = vmatpush1.bf16.msra.mxu0 %v6506_v21  ;;  %v166_v3 = vld [vmem:[%s10245_s1 + $0x420] sm:$0xff]  ;;  %v6809_v45 = vcombine.high %v421_v41, %v429_v62  ;;  %v6808_v51 = vcombine.low %v421_v41, %v429_v62  ;;  %v501_v21 = vld [vmem:[%s10245_s1 + $0xe98] sm:$0xff] }
 0x15e   :  { %v4817_v39 = vpop.f32.mrb[3].mxu0  ;;  %5200 = vmatprep.subr.bf16.mxu0 %v6523_v24  ;;  %v6555_v46 = vcombine.high %v166_v3, %v174_v42  ;;  %v6554_v52 = vcombine.low %v166_v3, %v174_v42  ;;  %v509_v23 = vld [vmem:[%s10245_s1 + $0xed8] sm:$0xff]  ;;  %v246_v24 = vld [vmem:[%s10245_s1 + $0x6a0] sm:$0xff] }
 0x15f   :  { %5119 = vmatpush1.bf16.msra.mxu1 %v6776_v34  ;;  %v6889_v29 = vcombine.high %v501_v21, %v509_v23  ;;  %v6635_v63 = vcombine.high %v246_v24, %v254_v25  ;;  %v517_v31 = vld [vmem:[%s10245_s1 + $0xf18] sm:$0xff]  ;;  %v262_v28 = vld [vmem:[%s10245_s1 + $0x720] sm:$0xff]  ;;  %v6634_v39 = vcombine.low %v246_v24, %v254_v25 }
 0x160   :  { %5120 = vmatprep.subr.bf16.mxu1 %v6793_v37  ;;  %v525_v34 = vld [vmem:[%s10245_s1 + $0xf58] sm:$0xff]  ;;  %v6888_v37 = vcombine.low %v501_v21, %v509_v23  ;;  %v278_v42 = vld [vmem:[%s10245_s1 + $0x7a0] sm:$0xff] }
 0x161   :  { %5201 = vmatpush1.bf16.msra.mxu0 %v6522_v36  ;;  %v270_v36 = vld [vmem:[%s10245_s1 + $0x760] sm:$0xff]  ;;  %v533_v62 = vld [vmem:[%s10245_s1 + $0xf98] sm:$0xff] }
 0x162   :  { %5202 = vmatprep.subr.bf16.mxu0 %v6539_v40  ;;  %v6905_v40 = vcombine.high %v517_v31, %v525_v34  ;;  %v6651_v41 = vcombine.high %v262_v28, %v270_v36  ;;  %v541_v3 = vld [vmem:[%s10245_s1 + $0xfd8] sm:$0xff]  ;;  %v358_v25 = vld [vmem:[%s10245_s1 + $0xa20] sm:$0xff] }
 0x163   :  { %5121 = vmatpush1.bf16.msra.mxu1 %v6792_v43  ;;  %v286_v43 = vld [vmem:[%s10245_s1 + $0x7e0] sm:$0xff]  ;;  %v605_v15 = vld [vmem:[%s10245_s1 + $0x11d8] sm:$0xff] }
 0x164   :  { %5122 = vmatprep.subr.bf16.mxu1 %v6809_v45  ;;  %v6650_v45 = vcombine.low %v262_v28, %v270_v36  ;;  %v6667_v47 = vcombine.high %v278_v42, %v286_v43  ;;  %v613_v23 = vld [vmem:[%s10245_s1 + $0x1218] sm:$0xff]  ;;  %v374_v36 = vld [vmem:[%s10245_s1 + $0xaa0] sm:$0xff] }
 0x165   :  { %5203 = vmatpush1.bf16.msra.mxu0 %v6538_v53  ;;  %v6904_v53 = vcombine.low %v517_v31, %v525_v34  ;;  %v621_v24 = vld [vmem:[%s10245_s1 + $0x1258] sm:$0xff] }
 0x166   :  { %5204 = vmatprep.subr.bf16.mxu0 %v6555_v46  ;;  %v6921_v46 = vcombine.high %v533_v62, %v541_v3  ;;  %v629_v34 = vld [vmem:[%s10245_s1 + $0x1298] sm:$0xff] }
 0x167   :  { %5123 = vmatpush1.bf16.msra.mxu1 %v6808_v51  ;;  %v302_v51 = vld [vmem:[%s10245_s1 + $0x860] sm:$0xff]  ;;  %v637_v28 = vld [vmem:[%s10245_s1 + $0x12d8] sm:$0xff] }
 0x168   :  { %5124 = vmatprep.subr.bf16.mxu1 %v6825_v54  ;;  %v6666_v54 = vcombine.low %v278_v42, %v286_v43  ;;  %v6683_v56 = vcombine.high %v294_v50, %v302_v51  ;;  %v653_v42 = vld [vmem:[%s10245_s1 + $0x1358] sm:$0xff]  ;;  %v390_v43 = vld [vmem:[%s10245_s1 + $0xb20] sm:$0xff] }
 0x169   :  { %5205 = vmatpush1.bf16.msra.mxu0 %v6554_v52  ;;  %v6920_v52 = vcombine.low %v533_v62, %v541_v3  ;;  %v645_v3 = vld [vmem:[%s10245_s1 + $0x1318] sm:$0xff] }
 0x16a   :  { %5206 = vmatprep.subr.bf16.mxu0 %v6571_v55  ;;  %v6937_v55 = vcombine.high %v549_v48, %v557_v49 }
 0x16b   :  { %5125 = vmatpush1.bf16.msra.mxu1 %v6824_v60  ;;  %v318_v60 = vld [vmem:[%s10245_s1 + $0x8e0] sm:$0xff] }
 0x16c   :  { %5126 = vmatprep.subr.bf16.mxu1 %v6841_v0  ;;  %v6682_v0 = vcombine.low %v294_v50, %v302_v51  ;;  %v6699_v2 = vcombine.high %v310_v59, %v318_v60  ;;  %v669_v50 = vld [vmem:[%s10245_s1 + $0x13d8] sm:$0xff]  ;;  %v406_v51 = vld [vmem:[%s10245_s1 + $0xba0] sm:$0xff] }
 0x16d   :  { %5207 = vmatpush1.bf16.msra.mxu0 %v6570_v61  ;;  %v6936_v61 = vcombine.low %v549_v48, %v557_v49  ;;  %v661_v49 = vld [vmem:[%s10245_s1 + $0x1398] sm:$0xff] }
 0x16e   :  { %5208 = vmatprep.subr.bf16.mxu0 %v6587_v1  ;;  %v6953_v1 = vcombine.high %v565_v57, %v573_v58 }
 0x16f   :  { %5127 = vmatpush1.bf16.msra.mxu1 %v6840_v7  ;;  %v334_v7 = vld [vmem:[%s10245_s1 + $0x960] sm:$0xff] }
 0x170   :  { %5128 = vmatprep.subr.bf16.mxu1 %v6857_v10  ;;  %v6698_v10 = vcombine.low %v310_v59, %v318_v60  ;;  %v6715_v12 = vcombine.high %v326_v6, %v334_v7  ;;  %v685_v59 = vld [vmem:[%s10245_s1 + $0x1458] sm:$0xff]  ;;  %v422_v60 = vld [vmem:[%s10245_s1 + $0xc20] sm:$0xff] }
 0x171   :  { %5209 = vmatpush1.bf16.msra.mxu0 %v6586_v8  ;;  %v6952_v8 = vcombine.low %v565_v57, %v573_v58  ;;  %v677_v58 = vld [vmem:[%s10245_s1 + $0x1418] sm:$0xff] }
 0x172   :  { %5210 = vmatprep.subr.bf16.mxu0 %v6603_v11  ;;  %v6969_v11 = vcombine.high %v581_v4, %v589_v5 }
 0x173   :  { %5129 = vmatpush1.bf16.msra.mxu1 %v6856_v17  ;;  %v350_v17 = vld [vmem:[%s10245_s1 + $0x9e0] sm:$0xff] }
 0x174   :  { %5130 = vmatprep.subr.bf16.mxu1 %v6873_v19  ;;  %v6714_v19 = vcombine.low %v326_v6, %v334_v7  ;;  %v6731_v21 = vcombine.high %v342_v16, %v350_v17  ;;  %v701_v6 = vld [vmem:[%s10245_s1 + $0x14d8] sm:$0xff]  ;;  %v438_v7 = vld [vmem:[%s10245_s1 + $0xca0] sm:$0xff] }
 0x175   :  { %5211 = vmatpush1.bf16.msra.mxu0 %v6602_v18  ;;  %v6968_v18 = vcombine.low %v581_v4, %v589_v5  ;;  %v693_v5 = vld [vmem:[%s10245_s1 + $0x1498] sm:$0xff] }
 0x176   :  { %5212 = vmatprep.subr.bf16.mxu0 %v6619_v20  ;;  %v6985_v20 = vcombine.high %v597_v14, %v605_v15 }
 0x177   :  { %5131 = vmatpush1.bf16.msra.mxu1 %v6872_v26  ;;  %v366_v26 = vld [vmem:[%s10245_s1 + $0xa60] sm:$0xff] }
 0x178   :  { %5132 = vmatprep.subr.bf16.mxu1 %v6889_v29  ;;  %v6730_v29 = vcombine.low %v342_v16, %v350_v17  ;;  %v6747_v31 = vcombine.high %v358_v25, %v366_v26  ;;  %v717_v16 = vld [vmem:[%s10245_s1 + $0x1558] sm:$0xff]  ;;  %v454_v17 = vld [vmem:[%s10245_s1 + $0xd20] sm:$0xff] }
 0x179   :  { %5213 = vmatpush1.bf16.msra.mxu0 %v6618_v27  ;;  %v6984_v27 = vcombine.low %v597_v14, %v605_v15  ;;  %v709_v15 = vld [vmem:[%s10245_s1 + $0x1518] sm:$0xff] }
 0x17a   :  { %5214 = vmatprep.subr.bf16.mxu0 %v6635_v63  ;;  %v7001_v63 = vcombine.high %v613_v23, %v621_v24 }
 0x17b   :  { %5133 = vmatpush1.bf16.msra.mxu1 %v6888_v37  ;;  %v382_v37 = vld [vmem:[%s10245_s1 + $0xae0] sm:$0xff] }
 0x17c   :  { %5134 = vmatprep.subr.bf16.mxu1 %v6905_v40  ;;  %v6746_v40 = vcombine.low %v358_v25, %v366_v26  ;;  %v6763_v62 = vcombine.high %v374_v36, %v382_v37  ;;  %v733_v25 = vld [vmem:[%s10245_s1 + $0x15d8] sm:$0xff]  ;;  %v470_v26 = vld [vmem:[%s10245_s1 + $0xda0] sm:$0xff] }
 0x17d   :  { %5215 = vmatpush1.bf16.msra.mxu0 %v6634_v39  ;;  %v7000_v39 = vcombine.low %v613_v23, %v621_v24  ;;  %v725_v24 = vld [vmem:[%s10245_s1 + $0x1598] sm:$0xff] }
 0x17e   :  { %5216 = vmatprep.subr.bf16.mxu0 %v6651_v41  ;;  %v7017_v41 = vcombine.high %v629_v34, %v637_v28 }
 0x17f   :  { %5135 = vmatpush1.bf16.msra.mxu1 %v6904_v53  ;;  %v398_v53 = vld [vmem:[%s10245_s1 + $0xb60] sm:$0xff] }
 0x180   :  { %5136 = vmatprep.subr.bf16.mxu1 %v6921_v46  ;;  %v6762_v46 = vcombine.low %v374_v36, %v382_v37  ;;  %v6779_v48 = vcombine.high %v390_v43, %v398_v53  ;;  %v749_v36 = vld [vmem:[%s10245_s1 + $0x1658] sm:$0xff]  ;;  %v486_v37 = vld [vmem:[%s10245_s1 + $0xe20] sm:$0xff] }
 0x181   :  { %5217 = vmatpush1.bf16.msra.mxu0 %v6650_v45  ;;  %v7016_v45 = vcombine.low %v629_v34, %v637_v28  ;;  %v741_v28 = vld [vmem:[%s10245_s1 + $0x1618] sm:$0xff] }
 0x182   :  { %5218 = vmatprep.subr.bf16.mxu0 %v6667_v47  ;;  %v7033_v47 = vcombine.high %v645_v3, %v653_v42 }
 0x183   :  { %5137 = vmatpush1.bf16.msra.mxu1 %v6920_v52  ;;  %v414_v52 = vld [vmem:[%s10245_s1 + $0xbe0] sm:$0xff] }
 0x184   :  { %5147 = vmatprep.subr.bf16.mxu1 %v6937_v55  ;;  %v6778_v55 = vcombine.low %v390_v43, %v398_v53  ;;  %v6795_v57 = vcombine.high %v406_v51, %v414_v52  ;;  %v765_v43 = vld [vmem:[%s10245_s1 + $0x16d8] sm:$0xff]  ;;  %v502_v53 = vld [vmem:[%s10245_s1 + $0xea0] sm:$0xff] }
 0x185   :  { %5219 = vmatpush1.bf16.msra.mxu0 %v6666_v54  ;;  %v7032_v54 = vcombine.low %v645_v3, %v653_v42  ;;  %v757_v42 = vld [vmem:[%s10245_s1 + $0x1698] sm:$0xff] }
 0x186   :  { %5229 = vmatprep.subr.bf16.mxu0 %v6683_v56  ;;  %5139 = vmatmul.mubr.bf16.vlgmr.msra.gmra.mrb[8].mxu1 %v7799_v33  ;;  %v7049_v56 = vcombine.high %v661_v49, %v669_v50 }
 0x187   :  { %5148 = vmatpush1.bf16.msra.mxu1 %v6936_v61  ;;  %5179 = vmatprep.mubr.bf16.mxu1 %v7808_v38  ;;  %v430_v61 = vld [vmem:[%s10245_s1 + $0xc60] sm:$0xff] }
 0x188   :  { %5221 = vmatmul.mubr.bf16.vlgmr.msra.gmra.mrb[8].mxu0 %v7781_v22  ;;  %5149 = vmatprep.subr.bf16.mxu1 %v6953_v1  ;;  %v6794_v1 = vcombine.low %v406_v51, %v414_v52  ;;  %v6811_v4 = vcombine.high %v422_v60, %v430_v61  ;;  %v781_v51 = vld [vmem:[%s10245_s1 + $0x1758] sm:$0xff]  ;;  %v518_v52 = vld [vmem:[%s10245_s1 + $0xf20] sm:$0xff] }
 0x189   :  { %5230 = vmatpush1.bf16.msra.mxu0 %v6682_v0  ;;  %5261 = vmatprep.mubr.bf16.mxu0 %v7673_v13  ;;  %v7048_v0 = vcombine.low %v661_v49, %v669_v50  ;;  %v773_v50 = vld [vmem:[%s10245_s1 + $0x1718] sm:$0xff] }
 0x18a   :  { %5231 = vmatprep.subr.bf16.mxu0 %v6699_v2  ;;  %v7065_v2 = vcombine.high %v677_v58, %v685_v59 }
 0x18b   :  { %5150 = vmatpush1.bf16.msra.mxu1 %v6952_v8  ;;  %v446_v8 = vld [vmem:[%s10245_s1 + $0xce0] sm:$0xff] }
 0x18c   :  { %5151 = vmatprep.subr.bf16.mxu1 %v6969_v11  ;;  %v6810_v11 = vcombine.low %v422_v60, %v430_v61  ;;  %v6827_v14 = vcombine.high %v438_v7, %v446_v8  ;;  %v797_v60 = vld [vmem:[%s10245_s1 + $0x17d8] sm:$0xff]  ;;  %v534_v61 = vld [vmem:[%s10245_s1 + $0xfa0] sm:$0xff] }
 0x18d   :  { %5232 = vmatpush1.bf16.msra.mxu0 %v6698_v10  ;;  %v7064_v10 = vcombine.low %v677_v58, %v685_v59  ;;  %v789_v59 = vld [vmem:[%s10245_s1 + $0x1798] sm:$0xff] }
 0x18e   :  { %5233 = vmatprep.subr.bf16.mxu0 %v6715_v12  ;;  %v7081_v12 = vcombine.high %v693_v5, %v701_v6 }
 0x18f   :  { %5152 = vmatpush1.bf16.msra.mxu1 %v6968_v18  ;;  %v462_v18 = vld [vmem:[%s10245_s1 + $0xd60] sm:$0xff] }
 0x190   :  { %5153 = vmatprep.subr.bf16.mxu1 %v6985_v20  ;;  %v6826_v20 = vcombine.low %v438_v7, %v446_v8  ;;  %v6843_v23 = vcombine.high %v454_v17, %v462_v18  ;;  %v47_v7 = vld [vmem:[%s10245_s1 + $0x68] sm:$0xff]  ;;  %v550_v8 = vld [vmem:[%s10245_s1 + $0x1020] sm:$0xff] }
 0x191   :  { %5234 = vmatpush1.bf16.msra.mxu0 %v6714_v19  ;;  %v7080_v19 = vcombine.low %v693_v5, %v701_v6  ;;  %v39_v6 = vld [vmem:[%s10245_s1 + $0x28] sm:$0xff] }
 0x192   :  { %5235 = vmatprep.subr.bf16.mxu0 %v6731_v21  ;;  %v7097_v21 = vcombine.high %v709_v15, %v717_v16 }
 0x193   :  { %5154 = vmatpush1.bf16.msra.mxu1 %v6984_v27  ;;  %v478_v27 = vld [vmem:[%s10245_s1 + $0xde0] sm:$0xff] }
 0x194   :  { %5155 = vmatprep.subr.bf16.mxu1 %v7001_v63  ;;  %v6842_v63 = vcombine.low %v454_v17, %v462_v18  ;;  %v6859_v34 = vcombine.high %v470_v26, %v478_v27  ;;  %v63_v17 = vld [vmem:[%s10245_s1 + $0xe8] sm:$0xff]  ;;  %v566_v18 = vld [vmem:[%s10245_s1 + $0x10a0] sm:$0xff] }
 0x195   :  { %5236 = vmatpush1.bf16.msra.mxu0 %v6730_v29  ;;  %v7096_v29 = vcombine.low %v709_v15, %v717_v16  ;;  %v55_v16 = vld [vmem:[%s10245_s1 + $0xa8] sm:$0xff] }
 0x196   :  { %5237 = vmatprep.subr.bf16.mxu0 %v6747_v31  ;;  %v7113_v31 = vcombine.high %v725_v24, %v733_v25 }
 0x197   :  { %5156 = vmatpush1.bf16.msra.mxu1 %v7000_v39  ;;  %v494_v39 = vld [vmem:[%s10245_s1 + $0xe60] sm:$0xff] }
 0x198   :  { %5157 = vmatprep.subr.bf16.mxu1 %v7017_v41  ;;  %v6858_v41 = vcombine.low %v470_v26, %v478_v27  ;;  %v6875_v3 = vcombine.high %v486_v37, %v494_v39  ;;  %v79_v26 = vld [vmem:[%s10245_s1 + $0x168] sm:$0xff]  ;;  %v582_v27 = vld [vmem:[%s10245_s1 + $0x1120] sm:$0xff] }
 0x199   :  { %5238 = vmatpush1.bf16.msra.mxu0 %v6746_v40  ;;  %v7112_v40 = vcombine.low %v725_v24, %v733_v25  ;;  %v71_v25 = vld [vmem:[%s10245_s1 + $0x128] sm:$0xff] }
 0x19a   :  { %5239 = vmatprep.subr.bf16.mxu0 %v6763_v62  ;;  %v7129_v62 = vcombine.high %v741_v28, %v749_v36 }
 0x19b   :  { %5158 = vmatpush1.bf16.msra.mxu1 %v7016_v45  ;;  %v510_v45 = vld [vmem:[%s10245_s1 + $0xee0] sm:$0xff] }
 0x19c   :  { %5159 = vmatprep.subr.bf16.mxu1 %v7033_v47  ;;  %v6874_v47 = vcombine.low %v486_v37, %v494_v39  ;;  %v6891_v49 = vcombine.high %v502_v53, %v510_v45  ;;  %v95_v37 = vld [vmem:[%s10245_s1 + $0x1e8] sm:$0xff]  ;;  %v598_v39 = vld [vmem:[%s10245_s1 + $0x11a0] sm:$0xff] }
 0x19d   :  { %5240 = vmatpush1.bf16.msra.mxu0 %v6762_v46  ;;  %v7128_v46 = vcombine.low %v741_v28, %v749_v36  ;;  %v87_v36 = vld [vmem:[%s10245_s1 + $0x1a8] sm:$0xff] }
 0x19e   :  { %5241 = vmatprep.subr.bf16.mxu0 %v6779_v48  ;;  %v7145_v48 = vcombine.high %v757_v42, %v765_v43 }
 0x19f   :  { %5160 = vmatpush1.bf16.msra.mxu1 %v7032_v54  ;;  %v526_v54 = vld [vmem:[%s10245_s1 + $0xf60] sm:$0xff] }
 0x1a0   :  { %5161 = vmatprep.subr.bf16.mxu1 %v7049_v56  ;;  %v6890_v56 = vcombine.low %v502_v53, %v510_v45  ;;  %v6907_v58 = vcombine.high %v518_v52, %v526_v54  ;;  %v111_v53 = vld [vmem:[%s10245_s1 + $0x268] sm:$0xff]  ;;  %v614_v45 = vld [vmem:[%s10245_s1 + $0x1220] sm:$0xff] }
 0x1a1   :  { %5242 = vmatpush1.bf16.msra.mxu0 %v6778_v55  ;;  %v7144_v55 = vcombine.low %v757_v42, %v765_v43  ;;  %v103_v43 = vld [vmem:[%s10245_s1 + $0x228] sm:$0xff] }
 0x1a2   :  { %5243 = vmatprep.subr.bf16.mxu0 %v6795_v57  ;;  %v7161_v57 = vcombine.high %v773_v50, %v781_v51 }
 0x1a3   :  { %5162 = vmatpush1.bf16.msra.mxu1 %v7048_v0  ;;  %v542_v0 = vld [vmem:[%s10245_s1 + $0xfe0] sm:$0xff] }
 0x1a4   :  { %5163 = vmatprep.subr.bf16.mxu1 %v7065_v2  ;;  %v6906_v2 = vcombine.low %v518_v52, %v526_v54  ;;  %v6923_v5 = vcombine.high %v534_v61, %v542_v0  ;;  %v127_v52 = vld [vmem:[%s10245_s1 + $0x2e8] sm:$0xff]  ;;  %v630_v54 = vld [vmem:[%s10245_s1 + $0x12a0] sm:$0xff] }
 0x1a5   :  { %5244 = vmatpush1.bf16.msra.mxu0 %v6794_v1  ;;  %v7160_v1 = vcombine.low %v773_v50, %v781_v51  ;;  %v119_v51 = vld [vmem:[%s10245_s1 + $0x2a8] sm:$0xff] }
 0x1a6   :  { %5245 = vmatprep.subr.bf16.mxu0 %v6811_v4  ;;  %v7177_v4 = vcombine.high %v789_v59, %v797_v60 }
 0x1a7   :  { %5164 = vmatpush1.bf16.msra.mxu1 %v7064_v10  ;;  %v558_v10 = vld [vmem:[%s10245_s1 + $0x1060] sm:$0xff] }
 0x1a8   :  { %5165 = vmatprep.subr.bf16.mxu1 %v7081_v12  ;;  %v6922_v12 = vcombine.low %v534_v61, %v542_v0  ;;  %v6939_v15 = vcombine.high %v550_v8, %v558_v10  ;;  %v143_v61 = vld [vmem:[%s10245_s1 + $0x368] sm:$0xff]  ;;  %v646_v0 = vld [vmem:[%s10245_s1 + $0x1320] sm:$0xff] }
 0x1a9   :  { %5246 = vmatpush1.bf16.msra.mxu0 %v6810_v11  ;;  %v7176_v11 = vcombine.low %v789_v59, %v797_v60  ;;  %v135_v60 = vld [vmem:[%s10245_s1 + $0x328] sm:$0xff] }
 0x1aa   :  { %5247 = vmatprep.subr.bf16.mxu0 %v6827_v14  ;;  %v6429_v14 = vcombine.high %v39_v6, %v47_v7 }
 0x1ab   :  { %5166 = vmatpush1.bf16.msra.mxu1 %v7080_v19  ;;  %v574_v19 = vld [vmem:[%s10245_s1 + $0x10e0] sm:$0xff] }
 0x1ac   :  { %5167 = vmatprep.subr.bf16.mxu1 %v7097_v21  ;;  %v6938_v21 = vcombine.low %v550_v8, %v558_v10  ;;  %v6955_v24 = vcombine.high %v566_v18, %v574_v19  ;;  %v151_v8 = vld [vmem:[%s10245_s1 + $0x3a8] sm:$0xff] }
 0x1ad   :  { %5248 = vmatpush1.bf16.msra.mxu0 %v6826_v20  ;;  %v6428_v20 = vcombine.low %v39_v6, %v47_v7  ;;  %v159_v10 = vld [vmem:[%s10245_s1 + $0x3e8] sm:$0xff] }
 0x1ae   :  { %5249 = vmatprep.subr.bf16.mxu0 %v6843_v23  ;;  %v6445_v23 = vcombine.high %v55_v16, %v63_v17 }
 0x1af   :  { %5168 = vmatpush1.bf16.msra.mxu1 %v7096_v29  ;;  %v590_v29 = vld [vmem:[%s10245_s1 + $0x1160] sm:$0xff] }
 0x1b0   :  { %5169 = vmatprep.subr.bf16.mxu1 %v7113_v31  ;;  %v6954_v31 = vcombine.low %v566_v18, %v574_v19  ;;  %v6971_v28 = vcombine.high %v582_v27, %v590_v29  ;;  %v6541_v19 = vcombine.high %v151_v8, %v159_v10 }
 0x1b1   :  { %5250 = vmatpush1.bf16.msra.mxu0 %v6842_v63  ;;  %v6444_v63 = vcombine.low %v55_v16, %v63_v17  ;;  %v6524_v16 = vcombine.low %v135_v60, %v143_v61 }
 0x1b2   :  { %5251 = vmatprep.subr.bf16.mxu0 %v6859_v34  ;;  %v6461_v34 = vcombine.high %v71_v25, %v79_v26 }
 0x1b3   :  { %5170 = vmatpush1.bf16.msra.mxu1 %v7112_v40  ;;  %v606_v40 = vld [vmem:[%s10245_s1 + $0x11e0] sm:$0xff] }
 0x1b4   :  { %5171 = vmatprep.subr.bf16.mxu1 %v7129_v62  ;;  %v6970_v62 = vcombine.low %v582_v27, %v590_v29  ;;  %v6987_v42 = vcombine.high %v598_v39, %v606_v40 }
 0x1b5   :  { %5252 = vmatpush1.bf16.msra.mxu0 %v6858_v41  ;;  %v6460_v41 = vcombine.low %v71_v25, %v79_v26  ;;  %v686_v25 = vld [vmem:[%s10245_s1 + $0x1460] sm:$0xff]  ;;  %v6540_v26 = vcombine.low %v151_v8, %v159_v10 }
 0x1b6   :  { %5253 = vmatprep.subr.bf16.mxu0 %v6875_v3  ;;  %v6477_v3 = vcombine.high %v87_v36, %v95_v37  ;;  %v766_v8 = vld [vmem:[%s10245_s1 + $0x16e0] sm:$0xff] }
 0x1b7   :  { %5172 = vmatpush1.bf16.msra.mxu1 %v7128_v46  ;;  %v622_v46 = vld [vmem:[%s10245_s1 + $0x1260] sm:$0xff] }
 0x1b8   :  { %5173 = vmatprep.subr.bf16.mxu1 %v7145_v48  ;;  %v6986_v48 = vcombine.low %v598_v39, %v606_v40  ;;  %v7003_v50 = vcombine.high %v614_v45, %v622_v46 }
 0x1b9   :  { %5254 = vmatpush1.bf16.msra.mxu0 %v6874_v47  ;;  %v6476_v47 = vcombine.low %v87_v36, %v95_v37  ;;  %v702_v36 = vld [vmem:[%s10245_s1 + $0x14e0] sm:$0xff] }
 0x1ba   :  { %5255 = vmatprep.subr.bf16.mxu0 %v6891_v49  ;;  %v6493_v49 = vcombine.high %v103_v43, %v111_v53 }
 0x1bb   :  { %5174 = vmatpush1.bf16.msra.mxu1 %v7144_v55  ;;  %v638_v55 = vld [vmem:[%s10245_s1 + $0x12e0] sm:$0xff] }
 0x1bc   :  { %5175 = vmatprep.subr.bf16.mxu1 %v7161_v57  ;;  %v7002_v57 = vcombine.low %v614_v45, %v622_v46  ;;  %v7019_v59 = vcombine.high %v630_v54, %v638_v55 }
 0x1bd   :  { %5256 = vmatpush1.bf16.msra.mxu0 %v6890_v56  ;;  %v6492_v56 = vcombine.low %v103_v43, %v111_v53  ;;  %v718_v43 = vld [vmem:[%s10245_s1 + $0x1560] sm:$0xff] }
 0x1be   :  { %5257 = vmatprep.subr.bf16.mxu0 %v6907_v58  ;;  %v6509_v58 = vcombine.high %v119_v51, %v127_v52 }
 0x1bf   :  { %5176 = vmatpush1.bf16.msra.mxu1 %v7160_v1  ;;  %v654_v1 = vld [vmem:[%s10245_s1 + $0x1360] sm:$0xff] }
 0x1c0   :  { %5177 = vmatprep.subr.bf16.mxu1 %v7177_v4  ;;  %v7018_v4 = vcombine.low %v630_v54, %v638_v55  ;;  %v7035_v7 = vcombine.high %v646_v0, %v654_v1  ;;  %v7034_v18 = vcombine.low %v646_v0, %v654_v1 }
 0x1c1   :  { %5258 = vmatpush1.bf16.msra.mxu0 %v6906_v2  ;;  %v6508_v2 = vcombine.low %v119_v51, %v127_v52  ;;  %v734_v51 = vld [vmem:[%s10245_s1 + $0x15e0] sm:$0xff] }
 0x1c2   :  { %5259 = vmatprep.subr.bf16.mxu0 %v6923_v5  ;;  %v6525_v5 = vcombine.high %v135_v60, %v143_v61  ;;  %v750_v60 = vld [vmem:[%s10245_s1 + $0x1660] sm:$0xff] }
 0x1c3   :  { %5178 = vmatpush1.bf16.msra.mxu1 %v7176_v11 }
 0x1c4   :  { %5311 = vmatprep.subr.bf16.mxu1 %v6429_v14  ;;  %v670_v14 = vld [vmem:[%s10245_s1 + $0x13e0] sm:$0xff] }
 0x1c5   :  { %5260 = vmatpush1.bf16.msra.mxu0 %v6922_v12  ;;  %v662_v12 = vld [vmem:[%s10245_s1 + $0x13a0] sm:$0xff] }
 0x1c6   :  { %5270 = vmatprep.subr.bf16.mxu0 %v6939_v15  ;;  %5180 = vmatmul.mubr.bf16.vlgmr.msra.gmra.mrb[8].mxu1 %v7705_v32  ;;  %v7050_v27 = vcombine.low %v662_v12, %v670_v14 }
 0x1c7   :  { %5312 = vmatpush1.bf16.msra.mxu1 %v6428_v20  ;;  %5343 = vmatprep.mubr.bf16.mxu1 %v7662_v9  ;;  %v7051_v20 = vcombine.high %v662_v12, %v670_v14 }
 0x1c8   :  { %5262 = vmatmul.mubr.bf16.vlgmr.msra.gmra.mrb[8].mxu0 %v7799_v33  ;;  %5313 = vmatprep.subr.bf16.mxu1 %v6445_v23  ;;  %v175_v23 = vld [vmem:[%s10245_s1 + $0x468] sm:$0xff] }
 0x1c9   :  { %5271 = vmatpush1.bf16.msra.mxu0 %v6938_v21  ;;  %5302 = vmatprep.mubr.bf16.mxu0 %v7808_v38  ;;  %v167_v21 = vld [vmem:[%s10245_s1 + $0x428] sm:$0xff] }
 0x1ca   :  { %5272 = vmatprep.subr.bf16.mxu0 %v6955_v24  ;;  %v678_v24 = vld [vmem:[%s10245_s1 + $0x1420] sm:$0xff]  ;;  %v6557_v29 = vcombine.high %v167_v21, %v175_v23  ;;  %v6556_v37 = vcombine.low %v167_v21, %v175_v23 }
 0x1cb   :  { %5314 = vmatpush1.bf16.msra.mxu1 %v6444_v63  ;;  %v7067_v63 = vcombine.high %v678_v24, %v686_v25  ;;  %v7066_v39 = vcombine.low %v678_v24, %v686_v25  ;;  %v279_v25 = vld [vmem:[%s10245_s1 + $0x7a8] sm:$0xff] }
 0x1cc   :  { %5315 = vmatprep.subr.bf16.mxu1 %v6461_v34  ;;  %v191_v34 = vld [vmem:[%s10245_s1 + $0x4e8] sm:$0xff] }
 0x1cd   :  { %5273 = vmatpush1.bf16.msra.mxu0 %v6954_v31  ;;  %v183_v31 = vld [vmem:[%s10245_s1 + $0x4a8] sm:$0xff] }
 0x1ce   :  { %5274 = vmatprep.subr.bf16.mxu0 %v6971_v28  ;;  %v694_v28 = vld [vmem:[%s10245_s1 + $0x14a0] sm:$0xff]  ;;  %v6573_v40 = vcombine.high %v183_v31, %v191_v34  ;;  %v6572_v53 = vcombine.low %v183_v31, %v191_v34 }
 0x1cf   :  { %5316 = vmatpush1.bf16.msra.mxu1 %v6460_v41  ;;  %v7083_v41 = vcombine.high %v694_v28, %v702_v36  ;;  %v7082_v45 = vcombine.low %v694_v28, %v702_v36  ;;  %v295_v36 = vld [vmem:[%s10245_s1 + $0x828] sm:$0xff] }
 0x1d0   :  { %5317 = vmatprep.subr.bf16.mxu1 %v6477_v3  ;;  %v207_v3 = vld [vmem:[%s10245_s1 + $0x568] sm:$0xff] }
 0x1d1   :  { %5275 = vmatpush1.bf16.msra.mxu0 %v6970_v62  ;;  %v199_v62 = vld [vmem:[%s10245_s1 + $0x528] sm:$0xff] }
 0x1d2   :  { %5276 = vmatprep.subr.bf16.mxu0 %v6987_v42  ;;  %v710_v42 = vld [vmem:[%s10245_s1 + $0x1520] sm:$0xff]  ;;  %v6589_v46 = vcombine.high %v199_v62, %v207_v3  ;;  %v6588_v52 = vcombine.low %v199_v62, %v207_v3 }
 0x1d3   :  { %5318 = vmatpush1.bf16.msra.mxu1 %v6476_v47  ;;  %v7099_v47 = vcombine.high %v710_v42, %v718_v43  ;;  %v7098_v54 = vcombine.low %v710_v42, %v718_v43  ;;  %v311_v43 = vld [vmem:[%s10245_s1 + $0x8a8] sm:$0xff] }
 0x1d4   :  { %5319 = vmatprep.subr.bf16.mxu1 %v6493_v49  ;;  %v223_v49 = vld [vmem:[%s10245_s1 + $0x5e8] sm:$0xff] }
 0x1d5   :  { %5277 = vmatpush1.bf16.msra.mxu0 %v6986_v48  ;;  %v215_v48 = vld [vmem:[%s10245_s1 + $0x5a8] sm:$0xff] }
 0x1d6   :  { %5278 = vmatprep.subr.bf16.mxu0 %v7003_v50  ;;  %v726_v50 = vld [vmem:[%s10245_s1 + $0x15a0] sm:$0xff]  ;;  %v6605_v55 = vcombine.high %v215_v48, %v223_v49  ;;  %v6604_v61 = vcombine.low %v215_v48, %v223_v49 }
 0x1d7   :  { %5320 = vmatpush1.bf16.msra.mxu1 %v6492_v56  ;;  %v7115_v56 = vcombine.high %v726_v50, %v734_v51  ;;  %v7114_v0 = vcombine.low %v726_v50, %v734_v51  ;;  %v327_v51 = vld [vmem:[%s10245_s1 + $0x928] sm:$0xff] }
 0x1d8   :  { %5321 = vmatprep.subr.bf16.mxu1 %v6509_v58  ;;  %v239_v58 = vld [vmem:[%s10245_s1 + $0x668] sm:$0xff] }
 0x1d9   :  { %5279 = vmatpush1.bf16.msra.mxu0 %v7002_v57  ;;  %v9054_v6 = vpop.f32.mrb[4].mxu1  ;;  %v231_v57 = vld [vmem:[%s10245_s1 + $0x628] sm:$0xff] }
 0x1da   :  { %5280 = vmatprep.subr.bf16.mxu0 %v7019_v59  ;;  %v9062_v11 = vpop.f32.mrb[5].mxu1  ;;  %v742_v59 = vld [vmem:[%s10245_s1 + $0x1620] sm:$0xff]  ;;  %v6621_v1 = vcombine.high %v231_v57, %v239_v58  ;;  %v6620_v10 = vcombine.low %v231_v57, %v239_v58 }
 0x1db   :  { %v4939_v15 = vpop.f32.mrb[6].mxu1  ;;  %5322 = vmatpush1.bf16.msra.mxu1 %v6508_v2  ;;  %v7131_v2 = vcombine.high %v742_v59, %v750_v60  ;;  %v7130_v12 = vcombine.low %v742_v59, %v750_v60  ;;  %v343_v60 = vld [vmem:[%s10245_s1 + $0x9a8] sm:$0xff] }
 0x1dc   :  { %v4940_v17 = vpop.f32.mrb[7].mxu1  ;;  %5323 = vmatprep.subr.bf16.mxu1 %v6525_v5  ;;  %v255_v5 = vld [vmem:[%s10245_s1 + $0x6e8] sm:$0xff] }
 0x1dd   :  { %5281 = vmatpush1.bf16.msra.mxu0 %v7018_v4  ;;  %v247_v4 = vld [vmem:[%s10245_s1 + $0x6a8] sm:$0xff] }
 0x1de   :  { %5282 = vmatprep.subr.bf16.mxu0 %v7035_v7  ;;  %v758_v7 = vld [vmem:[%s10245_s1 + $0x16a0] sm:$0xff]  ;;  %v6637_v14 = vcombine.high %v247_v4, %v255_v5  ;;  %v271_v17 = vld [vmem:[%s10245_s1 + $0x768] sm:$0xff] }
 0x1df   :  { %5324 = vmatpush1.bf16.msra.mxu1 %v6524_v16  ;;  %v7147_v15 = vcombine.high %v758_v7, %v766_v8  ;;  %v263_v16 = vld [vmem:[%s10245_s1 + $0x728] sm:$0xff]  ;;  %v7146_v21 = vcombine.low %v758_v7, %v766_v8 }
 0x1e0   :  { %5325 = vmatprep.subr.bf16.mxu1 %v6541_v19  ;;  %v782_v19 = vld [vmem:[%s10245_s1 + $0x1760] sm:$0xff]  ;;  %v6653_v23 = vcombine.high %v263_v16, %v271_v17  ;;  %v359_v8 = vld [vmem:[%s10245_s1 + $0xa28] sm:$0xff] }
 0x1e1   :  { %5283 = vmatpush1.bf16.msra.mxu0 %v7034_v18  ;;  %v774_v18 = vld [vmem:[%s10245_s1 + $0x1720] sm:$0xff] }
 0x1e2   :  { %5284 = vmatprep.subr.bf16.mxu0 %v7051_v20  ;;  %v6636_v20 = vcombine.low %v247_v4, %v255_v5  ;;  %v7163_v24 = vcombine.high %v774_v18, %v782_v19  ;;  %v7162_v31 = vcombine.low %v774_v18, %v782_v19  ;;  %v375_v19 = vld [vmem:[%s10245_s1 + $0xaa8] sm:$0xff] }
 0x1e3   :  { %5326 = vmatpush1.bf16.msra.mxu1 %v6540_v26  ;;  %v287_v26 = vld [vmem:[%s10245_s1 + $0x7e8] sm:$0xff] }
 0x1e4   :  { %5327 = vmatprep.subr.bf16.mxu1 %v6557_v29  ;;  %v798_v29 = vld [vmem:[%s10245_s1 + $0x17e0] sm:$0xff]  ;;  %v6669_v34 = vcombine.high %v279_v25, %v287_v26 }
 0x1e5   :  { %5285 = vmatpush1.bf16.msra.mxu0 %v7050_v27  ;;  %v790_v27 = vld [vmem:[%s10245_s1 + $0x17a0] sm:$0xff] }
 0x1e6   :  { %5286 = vmatprep.subr.bf16.mxu0 %v7067_v63  ;;  %v6652_v63 = vcombine.low %v263_v16, %v271_v17  ;;  %v7179_v28 = vcombine.high %v790_v27, %v798_v29  ;;  %v7178_v62 = vcombine.low %v790_v27, %v798_v29  ;;  %v391_v29 = vld [vmem:[%s10245_s1 + $0xb28] sm:$0xff] }
 0x1e7   :  { %5328 = vmatpush1.bf16.msra.mxu1 %v6556_v37  ;;  %v303_v37 = vld [vmem:[%s10245_s1 + $0x868] sm:$0xff] }
 0x1e8   :  { %5329 = vmatprep.subr.bf16.mxu1 %v6573_v40  ;;  %v48_v40 = vld [vmem:[%s10245_s1 + $0x70] sm:$0xff]  ;;  %v6685_v3 = vcombine.high %v295_v36, %v303_v37 }
 0x1e9   :  { %5287 = vmatpush1.bf16.msra.mxu0 %v7066_v39  ;;  %v40_v39 = vld [vmem:[%s10245_s1 + $0x30] sm:$0xff] }
 0x1ea   :  { %5288 = vmatprep.subr.bf16.mxu0 %v7083_v41  ;;  %v6668_v41 = vcombine.low %v279_v25, %v287_v26  ;;  %v6431_v42 = vcombine.high %v40_v39, %v48_v40  ;;  %v6430_v48 = vcombine.low %v40_v39, %v48_v40  ;;  %v407_v40 = vld [vmem:[%s10245_s1 + $0xba8] sm:$0xff] }
 0x1eb   :  { %5330 = vmatpush1.bf16.msra.mxu1 %v6572_v53  ;;  %v319_v53 = vld [vmem:[%s10245_s1 + $0x8e8] sm:$0xff] }
 0x1ec   :  { %5331 = vmatprep.subr.bf16.mxu1 %v6589_v46  ;;  %v64_v46 = vld [vmem:[%s10245_s1 + $0xf0] sm:$0xff]  ;;  %v6701_v49 = vcombine.high %v311_v43, %v319_v53 }
 0x1ed   :  { %5289 = vmatpush1.bf16.msra.mxu0 %v7082_v45  ;;  %v56_v45 = vld [vmem:[%s10245_s1 + $0xb0] sm:$0xff] }
 0x1ee   :  { %5290 = vmatprep.subr.bf16.mxu0 %v7099_v47  ;;  %v6684_v47 = vcombine.low %v295_v36, %v303_v37  ;;  %v6447_v50 = vcombine.high %v56_v45, %v64_v46  ;;  %v6446_v57 = vcombine.low %v56_v45, %v64_v46 }
 0x1ef   :  { %5332 = vmatpush1.bf16.msra.mxu1 %v6588_v52  ;;  %v335_v52 = vld [vmem:[%s10245_s1 + $0x968] sm:$0xff] }
 0x1f0   :  { %5333 = vmatprep.subr.bf16.mxu1 %v6605_v55  ;;  %v80_v55 = vld [vmem:[%s10245_s1 + $0x170] sm:$0xff]  ;;  %v6717_v58 = vcombine.high %v327_v51, %v335_v52 }
 0x1f1   :  { %5291 = vmatpush1.bf16.msra.mxu0 %v7098_v54  ;;  %v72_v54 = vld [vmem:[%s10245_s1 + $0x130] sm:$0xff] }
 0x1f2   :  { %5292 = vmatprep.subr.bf16.mxu0 %v7115_v56  ;;  %v6700_v56 = vcombine.low %v311_v43, %v319_v53  ;;  %v6463_v59 = vcombine.high %v72_v54, %v80_v55  ;;  %v6462_v4 = vcombine.low %v72_v54, %v80_v55  ;;  %v431_v54 = vld [vmem:[%s10245_s1 + $0xc68] sm:$0xff]  ;;  %v168_v55 = vld [vmem:[%s10245_s1 + $0x430] sm:$0xff] }
 0x1f3   :  { %5334 = vmatpush1.bf16.msra.mxu1 %v6604_v61  ;;  %v351_v61 = vld [vmem:[%s10245_s1 + $0x9e8] sm:$0xff] }
 0x1f4   :  { %5335 = vmatprep.subr.bf16.mxu1 %v6621_v1  ;;  %v96_v1 = vld [vmem:[%s10245_s1 + $0x1f0] sm:$0xff]  ;;  %v6733_v5 = vcombine.high %v343_v60, %v351_v61 }
 0x1f5   :  { %5293 = vmatpush1.bf16.msra.mxu0 %v7114_v0  ;;  %v88_v0 = vld [vmem:[%s10245_s1 + $0x1b0] sm:$0xff] }
 0x1f6   :  { %5294 = vmatprep.subr.bf16.mxu0 %v7131_v2  ;;  %v6716_v2 = vcombine.low %v327_v51, %v335_v52  ;;  %v6479_v7 = vcombine.high %v88_v0, %v96_v1  ;;  %v6478_v16 = vcombine.low %v88_v0, %v96_v1  ;;  %v423_v52 = vld [vmem:[%s10245_s1 + $0xc28] sm:$0xff]  ;;  %v184_v1 = vld [vmem:[%s10245_s1 + $0x4b0] sm:$0xff] }
 0x1f7   :  { %5336 = vmatpush1.bf16.msra.mxu1 %v6620_v10  ;;  %v367_v10 = vld [vmem:[%s10245_s1 + $0xa68] sm:$0xff] }
 0x1f8   :  { %5337 = vmatprep.subr.bf16.mxu1 %v6637_v14  ;;  %v112_v14 = vld [vmem:[%s10245_s1 + $0x270] sm:$0xff]  ;;  %v6749_v17 = vcombine.high %v359_v8, %v367_v10  ;;  %v447_v0 = vld [vmem:[%s10245_s1 + $0xce8] sm:$0xff] }
 0x1f9   :  { %5295 = vmatpush1.bf16.msra.mxu0 %v7130_v12  ;;  %v104_v12 = vld [vmem:[%s10245_s1 + $0x230] sm:$0xff] }
 0x1fa   :  { %5296 = vmatprep.subr.bf16.mxu0 %v7147_v15  ;;  %v6732_v15 = vcombine.low %v343_v60, %v351_v61  ;;  %v6495_v18 = vcombine.high %v104_v12, %v112_v14  ;;  %v6494_v25 = vcombine.low %v104_v12, %v112_v14  ;;  %v439_v61 = vld [vmem:[%s10245_s1 + $0xca8] sm:$0xff]  ;;  %v200_v14 = vld [vmem:[%s10245_s1 + $0x530] sm:$0xff] }
 0x1fb   :  { %5338 = vmatpush1.bf16.msra.mxu1 %v6636_v20  ;;  %v383_v20 = vld [vmem:[%s10245_s1 + $0xae8] sm:$0xff] }
 0x1fc   :  { %5339 = vmatprep.subr.bf16.mxu1 %v6653_v23  ;;  %v128_v23 = vld [vmem:[%s10245_s1 + $0x2f0] sm:$0xff]  ;;  %v6765_v26 = vcombine.high %v375_v19, %v383_v20  ;;  %v463_v12 = vld [vmem:[%s10245_s1 + $0xd68] sm:$0xff] }
 0x1fd   :  { %5297 = vmatpush1.bf16.msra.mxu0 %v7146_v21  ;;  %v120_v21 = vld [vmem:[%s10245_s1 + $0x2b0] sm:$0xff] }
 0x1fe   :  { %5298 = vmatprep.subr.bf16.mxu0 %v7163_v24  ;;  %v6748_v24 = vcombine.low %v359_v8, %v367_v10  ;;  %v6511_v27 = vcombine.high %v120_v21, %v128_v23  ;;  %v6510_v36 = vcombine.low %v120_v21, %v128_v23  ;;  %v455_v10 = vld [vmem:[%s10245_s1 + $0xd28] sm:$0xff]  ;;  %v216_v23 = vld [vmem:[%s10245_s1 + $0x5b0] sm:$0xff] }
 0x1ff   :  { %5340 = vmatpush1.bf16.msra.mxu1 %v6652_v63  ;;  %v399_v63 = vld [vmem:[%s10245_s1 + $0xb68] sm:$0xff] }
 0x200   :  { %5341 = vmatprep.subr.bf16.mxu1 %v6669_v34  ;;  %v144_v34 = vld [vmem:[%s10245_s1 + $0x370] sm:$0xff]  ;;  %v6781_v37 = vcombine.high %v391_v29, %v399_v63  ;;  %v6780_v45 = vcombine.low %v391_v29, %v399_v63  ;;  %v479_v21 = vld [vmem:[%s10245_s1 + $0xde8] sm:$0xff] }
 0x201   :  { %5299 = vmatpush1.bf16.msra.mxu0 %v7162_v31  ;;  %v136_v31 = vld [vmem:[%s10245_s1 + $0x330] sm:$0xff]  ;;  %v487_v63 = vld [vmem:[%s10245_s1 + $0xe28] sm:$0xff] }
 0x202   :  { %5300 = vmatprep.subr.bf16.mxu0 %v7179_v28  ;;  %v6764_v28 = vcombine.low %v375_v19, %v383_v20  ;;  %v6527_v39 = vcombine.high %v136_v31, %v144_v34  ;;  %v471_v20 = vld [vmem:[%s10245_s1 + $0xda8] sm:$0xff] }
 0x203   :  { %5342 = vmatpush1.bf16.msra.mxu1 %v6668_v41  ;;  %v415_v41 = vld [vmem:[%s10245_s1 + $0xbe8] sm:$0xff] }
 0x204   :  { %5352 = vmatprep.subr.bf16.mxu1 %v6685_v3  ;;  %v152_v3 = vld [vmem:[%s10245_s1 + $0x3b0] sm:$0xff] }
 0x205   :  { %5301 = vmatpush1.bf16.msra.mxu0 %v7178_v62 }
 0x206   :  { %5434 = vmatprep.subr.bf16.mxu0 %v6431_v42  ;;  %5344 = vmatmul.mubr.bf16.vlgmr.msra.gmra.mrb[12].mxu1 %v7781_v22  ;;  %v160_v42 = vld [vmem:[%s10245_s1 + $0x3f0] sm:$0xff] }
 0x207   :  { %5353 = vmatpush1.bf16.msra.mxu1 %v6684_v47  ;;  %5384 = vmatprep.mubr.bf16.mxu1 %v7673_v13  ;;  %v6543_v51 = vcombine.high %v152_v3, %v160_v42 }
 0x208   :  { %5303 = vmatmul.mubr.bf16.vlgmr.msra.gmra.mrb[8].mxu0 %v7705_v32  ;;  %5354 = vmatprep.subr.bf16.mxu1 %v6701_v49  ;;  %v6797_v49 = vcombine.high %v407_v40, %v415_v41 }
 0x209   :  { %5435 = vmatpush1.bf16.msra.mxu0 %v6430_v48  ;;  %5466 = vmatprep.mubr.bf16.mxu0 %v7662_v9  ;;  %v6526_v48 = vcombine.low %v136_v31, %v144_v34  ;;  %v495_v31 = vld [vmem:[%s10245_s1 + $0xe68] sm:$0xff]  ;;  %v232_v34 = vld [vmem:[%s10245_s1 + $0x630] sm:$0xff] }
 0x20a   :  { %5436 = vmatprep.subr.bf16.mxu0 %v6447_v50 }
 0x20b   :  { %5355 = vmatpush1.bf16.msra.mxu1 %v6700_v56  ;;  %v176_v56 = vld [vmem:[%s10245_s1 + $0x470] sm:$0xff] }
 0x20c   :  { %5356 = vmatprep.subr.bf16.mxu1 %v6717_v58  ;;  %v6542_v58 = vcombine.low %v152_v3, %v160_v42  ;;  %v6559_v60 = vcombine.high %v168_v55, %v176_v56  ;;  %v511_v3 = vld [vmem:[%s10245_s1 + $0xee8] sm:$0xff]  ;;  %v248_v42 = vld [vmem:[%s10245_s1 + $0x6b0] sm:$0xff] }
 0x20d   :  { %5437 = vmatpush1.bf16.msra.mxu0 %v6446_v57  ;;  %v6796_v57 = vcombine.low %v407_v40, %v415_v41  ;;  %v503_v41 = vld [vmem:[%s10245_s1 + $0xea8] sm:$0xff] }
 0x20e   :  { %5438 = vmatprep.subr.bf16.mxu0 %v6463_v59  ;;  %v6813_v59 = vcombine.high %v423_v52, %v431_v54 }
 0x20f   :  { %5357 = vmatpush1.bf16.msra.mxu1 %v6716_v2  ;;  %v192_v2 = vld [vmem:[%s10245_s1 + $0x4f0] sm:$0xff] }
 0x210   :  { %5358 = vmatprep.subr.bf16.mxu1 %v6733_v5  ;;  %v6558_v5 = vcombine.low %v168_v55, %v176_v56  ;;  %v6575_v8 = vcombine.high %v184_v1, %v192_v2  ;;  %v272_v55 = vld [vmem:[%s10245_s1 + $0x770] sm:$0xff]  ;;  %v6892_v56 = vcombine.low %v503_v41, %v511_v3 }
 0x211   :  { %5439 = vmatpush1.bf16.msra.mxu0 %v6462_v4  ;;  %v6812_v4 = vcombine.low %v423_v52, %v431_v54  ;;  %v527_v52 = vld [vmem:[%s10245_s1 + $0xf68] sm:$0xff]  ;;  %v264_v54 = vld [vmem:[%s10245_s1 + $0x730] sm:$0xff] }
 0x212   :  { %5440 = vmatprep.subr.bf16.mxu0 %v6479_v7  ;;  %v6829_v7 = vcombine.high %v439_v61, %v447_v0 }
 0x213   :  { %5359 = vmatpush1.bf16.msra.mxu1 %v6732_v15  ;;  %v208_v15 = vld [vmem:[%s10245_s1 + $0x570] sm:$0xff] }
 0x214   :  { %5360 = vmatprep.subr.bf16.mxu1 %v6749_v17  ;;  %v6574_v17 = vcombine.low %v184_v1, %v192_v2  ;;  %v6591_v19 = vcombine.high %v200_v14, %v208_v15  ;;  %v288_v1 = vld [vmem:[%s10245_s1 + $0x7f0] sm:$0xff] }
 0x215   :  { %5441 = vmatpush1.bf16.msra.mxu0 %v6478_v16  ;;  %v6828_v16 = vcombine.low %v439_v61, %v447_v0  ;;  %v543_v61 = vld [vmem:[%s10245_s1 + $0xfe8] sm:$0xff]  ;;  %v280_v0 = vld [vmem:[%s10245_s1 + $0x7b0] sm:$0xff] }
 0x216   :  { %5442 = vmatprep.subr.bf16.mxu0 %v6495_v18  ;;  %v6845_v18 = vcombine.high %v455_v10, %v463_v12 }
 0x217   :  { %5361 = vmatpush1.bf16.msra.mxu1 %v6748_v24  ;;  %v224_v24 = vld [vmem:[%s10245_s1 + $0x5f0] sm:$0xff] }
 0x218   :  { %5362 = vmatprep.subr.bf16.mxu1 %v6765_v26  ;;  %v6590_v26 = vcombine.low %v200_v14, %v208_v15  ;;  %v6607_v29 = vcombine.high %v216_v23, %v224_v24  ;;  %v304_v14 = vld [vmem:[%s10245_s1 + $0x870] sm:$0xff] }
 0x219   :  { %5443 = vmatpush1.bf16.msra.mxu0 %v6494_v25  ;;  %v6844_v25 = vcombine.low %v455_v10, %v463_v12  ;;  %v559_v10 = vld [vmem:[%s10245_s1 + $0x1068] sm:$0xff]  ;;  %v296_v12 = vld [vmem:[%s10245_s1 + $0x830] sm:$0xff] }
 0x21a   :  { %5444 = vmatprep.subr.bf16.mxu0 %v6511_v27  ;;  %v6861_v27 = vcombine.high %v471_v20, %v479_v21 }
 0x21b   :  { %v9260_v62 = vpop.f32.mrb[4].mxu0  ;;  %5363 = vmatpush1.bf16.msra.mxu1 %v6764_v28  ;;  %v240_v28 = vld [vmem:[%s10245_s1 + $0x670] sm:$0xff] }
 0x21c   :  { %v5680_v43 = vmax.f32 %v8669_v30, %v9260_v62  ;;  %v9270_v53 = vpop.f32.mrb[5].mxu0  ;;  %5364 = vmatprep.subr.bf16.mxu1 %v6781_v37  ;;  %v6606_v37 = vcombine.low %v216_v23, %v224_v24  ;;  %v6623_v40 = vcombine.high %v232_v34, %v240_v28  ;;  %v320_v23 = vld [vmem:[%s10245_s1 + $0x8f0] sm:$0xff]  ;;  %v7440_v62 = vld [vmem:[%s10247_s3 + $0x124] ss:$8 sps:$4 sm:$0xff]  }
 0x21d   :  { %v5681_v46 = vmax.f32 %v8672_v35, %v9270_v53  ;;  %v5062_v47 = vpop.f32.mrb[6].mxu0  ;;  %5445 = vmatpush1.bf16.msra.mxu0 %v6510_v36  ;;  %v6860_v36 = vcombine.low %v471_v20, %v479_v21  ;;  %v575_v20 = vld [vmem:[%s10245_s1 + $0x10e8] sm:$0xff]  ;;  %v312_v21 = vld [vmem:[%s10245_s1 + $0x8b0] sm:$0xff] }
 0x21e   :  { %v5063_v50 = vpop.f32.mrb[7].mxu0  ;;  %5446 = vmatprep.subr.bf16.mxu0 %v6527_v39  ;;  %v6877_v39 = vcombine.high %v487_v63, %v495_v31  ;;  %v6876_v47 = vcombine.low %v487_v63, %v495_v31  ;;  %v591_v63 = vld [vmem:[%s10245_s1 + $0x1168] sm:$0xff]  ;;  %v328_v31 = vld [vmem:[%s10245_s1 + $0x930] sm:$0xff] }
 0x21f   :  { %5365 = vmatpush1.bf16.msra.mxu1 %v6780_v45  ;;  %v256_v45 = vld [vmem:[%s10245_s1 + $0x6f0] sm:$0xff] }
 0x220   :  { %5366 = vmatprep.subr.bf16.mxu1 %v6797_v49  ;;  %v6893_v49 = vcombine.high %v503_v41, %v511_v3  ;;  %v6639_v50 = vcombine.high %v248_v42, %v256_v45  ;;  %v607_v41 = vld [vmem:[%s10245_s1 + $0x11e8] sm:$0xff]  ;;  %v344_v3 = vld [vmem:[%s10245_s1 + $0x9b0] sm:$0xff] }
 0x221   :  { %5447 = vmatpush1.bf16.msra.mxu0 %v6526_v48  ;;  %v6622_v48 = vcombine.low %v232_v34, %v240_v28  ;;  %v336_v34 = vld [vmem:[%s10245_s1 + $0x970] sm:$0xff] }
 0x222   :  { %5448 = vmatprep.subr.bf16.mxu0 %v6543_v51  ;;  %v519_v51 = vld [vmem:[%s10245_s1 + $0xf28] sm:$0xff]  ;;  %v7437_v30 = vld [vmem:[%s10247_s3 + $0x114] ss:$8 sps:$4 sm:$0xff]   ;;  %v7435_v35 = vld [vmem:[%s10247_s3 + $0x110] ss:$8 sps:$4 sm:$0xff]  }
 0x223   :  { %5367 = vmatpush1.bf16.msra.mxu1 %v6796_v57  ;;  %v6638_v57 = vcombine.low %v248_v42, %v256_v45  ;;  %v6908_v2 = vcombine.low %v519_v51, %v527_v52  ;;  %v352_v42 = vld [vmem:[%s10245_s1 + $0x9f0] sm:$0xff] }
 0x224   :  { %5368 = vmatprep.subr.bf16.mxu1 %v6813_v59  ;;  %v6655_v59 = vcombine.high %v264_v54, %v272_v55  ;;  %v7443_v53 = vld [vmem:[%s10247_s3 + $0x134] ss:$8 sps:$4 sm:$0xff]  }
 0x225   :  { %5449 = vmatpush1.bf16.msra.mxu0 %v6542_v58  ;;  %v6909_v58 = vcombine.high %v519_v51, %v527_v52  ;;  %v623_v51 = vld [vmem:[%s10245_s1 + $0x1268] sm:$0xff]  ;;  %v360_v52 = vld [vmem:[%s10245_s1 + $0xa30] sm:$0xff] }
 0x226   :  { %5450 = vmatprep.subr.bf16.mxu0 %v6559_v60  ;;  %v535_v60 = vld [vmem:[%s10245_s1 + $0xfa8] sm:$0xff] }
 0x227   :  { %5369 = vmatpush1.bf16.msra.mxu1 %v6812_v4  ;;  %v6654_v4 = vcombine.low %v264_v54, %v272_v55  ;;  %v6924_v15 = vcombine.low %v535_v60, %v543_v61  ;;  %v368_v54 = vld [vmem:[%s10245_s1 + $0xa70] sm:$0xff] }
 0x228   :  { %5370 = vmatprep.subr.bf16.mxu1 %v6829_v7  ;;  %v6671_v7 = vcombine.high %v280_v0, %v288_v1 }
 0x229   :  { %5451 = vmatpush1.bf16.msra.mxu0 %v6558_v5  ;;  %v6925_v5 = vcombine.high %v535_v60, %v543_v61  ;;  %v639_v60 = vld [vmem:[%s10245_s1 + $0x12e8] sm:$0xff]  ;;  %v376_v61 = vld [vmem:[%s10245_s1 + $0xab0] sm:$0xff] }
 0x22a   :  { %5452 = vmatprep.subr.bf16.mxu0 %v6575_v8  ;;  %v551_v8 = vld [vmem:[%s10245_s1 + $0x1028] sm:$0xff] }
 0x22b   :  { %5371 = vmatpush1.bf16.msra.mxu1 %v6828_v16  ;;  %v6670_v16 = vcombine.low %v280_v0, %v288_v1  ;;  %v6940_v24 = vcombine.low %v551_v8, %v559_v10  ;;  %v384_v0 = vld [vmem:[%s10245_s1 + $0xaf0] sm:$0xff] }
 0x22c   :  { %5372 = vmatprep.subr.bf16.mxu1 %v6845_v18  ;;  %v6687_v18 = vcombine.high %v296_v12, %v304_v14 }
 0x22d   :  { %5453 = vmatpush1.bf16.msra.mxu0 %v6574_v17  ;;  %v6941_v17 = vcombine.high %v551_v8, %v559_v10  ;;  %v655_v8 = vld [vmem:[%s10245_s1 + $0x1368] sm:$0xff]  ;;  %v392_v10 = vld [vmem:[%s10245_s1 + $0xb30] sm:$0xff] }
 0x22e   :  { %5454 = vmatprep.subr.bf16.mxu0 %v6591_v19  ;;  %v567_v19 = vld [vmem:[%s10245_s1 + $0x10a8] sm:$0xff] }
 0x22f   :  { %5373 = vmatpush1.bf16.msra.mxu1 %v6844_v25  ;;  %v6686_v25 = vcombine.low %v296_v12, %v304_v14  ;;  %v6956_v28 = vcombine.low %v567_v19, %v575_v20  ;;  %v400_v12 = vld [vmem:[%s10245_s1 + $0xb70] sm:$0xff] }
 0x230   :  { %5374 = vmatprep.subr.bf16.mxu1 %v6861_v27  ;;  %v6703_v27 = vcombine.high %v312_v21, %v320_v23 }
 0x231   :  { %5455 = vmatpush1.bf16.msra.mxu0 %v6590_v26  ;;  %v6957_v26 = vcombine.high %v567_v19, %v575_v20  ;;  %v671_v19 = vld [vmem:[%s10245_s1 + $0x13e8] sm:$0xff]  ;;  %v408_v20 = vld [vmem:[%s10245_s1 + $0xbb0] sm:$0xff] }
 0x232   :  { %5456 = vmatprep.subr.bf16.mxu0 %v6607_v29  ;;  %v583_v29 = vld [vmem:[%s10245_s1 + $0x1128] sm:$0xff] }
 0x233   :  { %5375 = vmatpush1.bf16.msra.mxu1 %v6860_v36  ;;  %v6702_v36 = vcombine.low %v312_v21, %v320_v23  ;;  %v6972_v45 = vcombine.low %v583_v29, %v591_v63  ;;  %v416_v21 = vld [vmem:[%s10245_s1 + $0xbf0] sm:$0xff] }
 0x234   :  { %5376 = vmatprep.subr.bf16.mxu1 %v6877_v39  ;;  %v6719_v39 = vcombine.high %v328_v31, %v336_v34 }
 0x235   :  { %5457 = vmatpush1.bf16.msra.mxu0 %v6606_v37  ;;  %v6973_v37 = vcombine.high %v583_v29, %v591_v63  ;;  %v687_v29 = vld [vmem:[%s10245_s1 + $0x1468] sm:$0xff]  ;;  %v424_v63 = vld [vmem:[%s10245_s1 + $0xc30] sm:$0xff] }
 0x236   :  { %5458 = vmatprep.subr.bf16.mxu0 %v6623_v40  ;;  %v599_v40 = vld [vmem:[%s10245_s1 + $0x11a8] sm:$0xff] }
 0x237   :  { %5377 = vmatpush1.bf16.msra.mxu1 %v6876_v47  ;;  %v6718_v47 = vcombine.low %v328_v31, %v336_v34  ;;  %v6988_v55 = vcombine.low %v599_v40, %v607_v41  ;;  %v432_v31 = vld [vmem:[%s10245_s1 + $0xc70] sm:$0xff] }
 0x238   :  { %5378 = vmatprep.subr.bf16.mxu1 %v6893_v49  ;;  %v6735_v49 = vcombine.high %v344_v3, %v352_v42 }
 0x239   :  { %5459 = vmatpush1.bf16.msra.mxu0 %v6622_v48  ;;  %v6989_v48 = vcombine.high %v599_v40, %v607_v41  ;;  %v703_v40 = vld [vmem:[%s10245_s1 + $0x14e8] sm:$0xff]  ;;  %v440_v41 = vld [vmem:[%s10245_s1 + $0xcb0] sm:$0xff] }
 0x23a   :  { %5460 = vmatprep.subr.bf16.mxu0 %v6639_v50  ;;  %v615_v50 = vld [vmem:[%s10245_s1 + $0x1228] sm:$0xff] }
 0x23b   :  { %5379 = vmatpush1.bf16.msra.mxu1 %v6892_v56  ;;  %v6734_v56 = vcombine.low %v344_v3, %v352_v42  ;;  %v7004_v1 = vcombine.low %v615_v50, %v623_v51  ;;  %v448_v3 = vld [vmem:[%s10245_s1 + $0xcf0] sm:$0xff] }
 0x23c   :  { %5380 = vmatprep.subr.bf16.mxu1 %v6909_v58  ;;  %v6751_v58 = vcombine.high %v360_v52, %v368_v54 }
 0x23d   :  { %5461 = vmatpush1.bf16.msra.mxu0 %v6638_v57  ;;  %v7005_v57 = vcombine.high %v615_v50, %v623_v51  ;;  %v719_v50 = vld [vmem:[%s10245_s1 + $0x1568] sm:$0xff]  ;;  %v456_v51 = vld [vmem:[%s10245_s1 + $0xd30] sm:$0xff] }
 0x23e   :  { %5462 = vmatprep.subr.bf16.mxu0 %v6655_v59  ;;  %v631_v59 = vld [vmem:[%s10245_s1 + $0x12a8] sm:$0xff] }
 0x23f   :  { %5381 = vmatpush1.bf16.msra.mxu1 %v6908_v2  ;;  %v6750_v2 = vcombine.low %v360_v52, %v368_v54  ;;  %v7020_v14 = vcombine.low %v631_v59, %v639_v60  ;;  %v464_v52 = vld [vmem:[%s10245_s1 + $0xd70] sm:$0xff] }
 0x240   :  { %5382 = vmatprep.subr.bf16.mxu1 %v6925_v5  ;;  %v6767_v5 = vcombine.high %v376_v61, %v384_v0 }
 0x241   :  { %5463 = vmatpush1.bf16.msra.mxu0 %v6654_v4  ;;  %v7021_v4 = vcombine.high %v631_v59, %v639_v60  ;;  %v735_v59 = vld [vmem:[%s10245_s1 + $0x15e8] sm:$0xff]  ;;  %v472_v60 = vld [vmem:[%s10245_s1 + $0xdb0] sm:$0xff] }
 0x242   :  { %5464 = vmatprep.subr.bf16.mxu0 %v6671_v7  ;;  %v647_v7 = vld [vmem:[%s10245_s1 + $0x1328] sm:$0xff] }
 0x243   :  { %5383 = vmatpush1.bf16.msra.mxu1 %v6924_v15  ;;  %v6766_v15 = vcombine.low %v376_v61, %v384_v0  ;;  %v7036_v23 = vcombine.low %v647_v7, %v655_v8  ;;  %v480_v61 = vld [vmem:[%s10245_s1 + $0xdf0] sm:$0xff] }
 0x244   :  { %5393 = vmatprep.subr.bf16.mxu1 %v6941_v17  ;;  %v6783_v17 = vcombine.high %v392_v10, %v400_v12 }
 0x245   :  { %5465 = vmatpush1.bf16.msra.mxu0 %v6670_v16  ;;  %v7037_v16 = vcombine.high %v647_v7, %v655_v8  ;;  %v751_v7 = vld [vmem:[%s10245_s1 + $0x1668] sm:$0xff]  ;;  %v488_v8 = vld [vmem:[%s10245_s1 + $0xe30] sm:$0xff] }
 0x246   :  { %5475 = vmatprep.subr.bf16.mxu0 %v6687_v18  ;;  %5385 = vmatmul.mubr.bf16.vlgmr.msra.gmra.mrb[12].mxu1 %v7799_v33  ;;  %v663_v18 = vld [vmem:[%s10245_s1 + $0x13a8] sm:$0xff] }
 0x247   :  { %5394 = vmatpush1.bf16.msra.mxu1 %v6940_v24  ;;  %5425 = vmatprep.mubr.bf16.mxu1 %v7808_v38  ;;  %v6782_v24 = vcombine.low %v392_v10, %v400_v12  ;;  %v7052_v34 = vcombine.low %v663_v18, %v671_v19  ;;  %v496_v10 = vld [vmem:[%s10245_s1 + $0xe70] sm:$0xff] }
 0x248   :  { %5467 = vmatmul.mubr.bf16.vlgmr.msra.gmra.mrb[12].mxu0 %v7781_v22  ;;  %5395 = vmatprep.subr.bf16.mxu1 %v6957_v26  ;;  %v6799_v26 = vcombine.high %v408_v20, %v416_v21 }
 0x249   :  { %5476 = vmatpush1.bf16.msra.mxu0 %v6686_v25  ;;  %5507 = vmatprep.mubr.bf16.mxu0 %v7673_v13  ;;  %v7053_v25 = vcombine.high %v663_v18, %v671_v19  ;;  %v767_v18 = vld [vmem:[%s10245_s1 + $0x16e8] sm:$0xff]  ;;  %v504_v19 = vld [vmem:[%s10245_s1 + $0xeb0] sm:$0xff] }
 0x24a   :  { %5477 = vmatprep.subr.bf16.mxu0 %v6703_v27  ;;  %v679_v27 = vld [vmem:[%s10245_s1 + $0x1428] sm:$0xff] }
 0x24b   :  { %5396 = vmatpush1.bf16.msra.mxu1 %v6956_v28  ;;  %v6798_v28 = vcombine.low %v408_v20, %v416_v21  ;;  %v7068_v42 = vcombine.low %v679_v27, %v687_v29  ;;  %v512_v20 = vld [vmem:[%s10245_s1 + $0xef0] sm:$0xff] }
 0x24c   :  { %5397 = vmatprep.subr.bf16.mxu1 %v6973_v37  ;;  %v6815_v37 = vcombine.high %v424_v63, %v432_v31 }
 0x24d   :  { %5478 = vmatpush1.bf16.msra.mxu0 %v6702_v36  ;;  %v7069_v36 = vcombine.high %v679_v27, %v687_v29  ;;  %v783_v27 = vld [vmem:[%s10245_s1 + $0x1768] sm:$0xff]  ;;  %v520_v29 = vld [vmem:[%s10245_s1 + $0xf30] sm:$0xff] }
 0x24e   :  { %5479 = vmatprep.subr.bf16.mxu0 %v6719_v39  ;;  %v695_v39 = vld [vmem:[%s10245_s1 + $0x14a8] sm:$0xff] }
 0x24f   :  { %5398 = vmatpush1.bf16.msra.mxu1 %v6972_v45  ;;  %v6814_v45 = vcombine.low %v424_v63, %v432_v31  ;;  %v7084_v54 = vcombine.low %v695_v39, %v703_v40  ;;  %v528_v63 = vld [vmem:[%s10245_s1 + $0xf70] sm:$0xff] }
 0x250   :  { %5399 = vmatprep.subr.bf16.mxu1 %v6989_v48  ;;  %v6831_v48 = vcombine.high %v440_v41, %v448_v3 }
 0x251   :  { %5480 = vmatpush1.bf16.msra.mxu0 %v6718_v47  ;;  %v7085_v47 = vcombine.high %v695_v39, %v703_v40  ;;  %v799_v39 = vld [vmem:[%s10245_s1 + $0x17e8] sm:$0xff]  ;;  %v536_v40 = vld [vmem:[%s10245_s1 + $0xfb0] sm:$0xff] }
 0x252   :  { %5481 = vmatprep.subr.bf16.mxu0 %v6735_v49  ;;  %v711_v49 = vld [vmem:[%s10245_s1 + $0x1528] sm:$0xff] }
 0x253   :  { %5400 = vmatpush1.bf16.msra.mxu1 %v6988_v55  ;;  %v6830_v55 = vcombine.low %v440_v41, %v448_v3  ;;  %v7100_v0 = vcombine.low %v711_v49, %v719_v50  ;;  %v544_v41 = vld [vmem:[%s10245_s1 + $0xff0] sm:$0xff] }
 0x254   :  { %5401 = vmatprep.subr.bf16.mxu1 %v7005_v57  ;;  %v6847_v57 = vcombine.high %v456_v51, %v464_v52 }
 0x255   :  { %5482 = vmatpush1.bf16.msra.mxu0 %v6734_v56  ;;  %v7101_v56 = vcombine.high %v711_v49, %v719_v50  ;;  %v49_v49 = vld [vmem:[%s10245_s1 + $0x78] sm:$0xff]  ;;  %v552_v50 = vld [vmem:[%s10245_s1 + $0x1030] sm:$0xff] }
 0x256   :  { %5483 = vmatprep.subr.bf16.mxu0 %v6751_v58  ;;  %v727_v58 = vld [vmem:[%s10245_s1 + $0x15a8] sm:$0xff] }
 0x257   :  { %5402 = vmatpush1.bf16.msra.mxu1 %v7004_v1  ;;  %v6846_v1 = vcombine.low %v456_v51, %v464_v52  ;;  %v7116_v12 = vcombine.low %v727_v58, %v735_v59  ;;  %v560_v51 = vld [vmem:[%s10245_s1 + $0x1070] sm:$0xff] }
 0x258   :  { %5403 = vmatprep.subr.bf16.mxu1 %v7021_v4  ;;  %v6863_v4 = vcombine.high %v472_v60, %v480_v61 }
 0x259   :  { %5484 = vmatpush1.bf16.msra.mxu0 %v6750_v2  ;;  %v7117_v2 = vcombine.high %v727_v58, %v735_v59  ;;  %v65_v58 = vld [vmem:[%s10245_s1 + $0xf8] sm:$0xff]  ;;  %v568_v59 = vld [vmem:[%s10245_s1 + $0x10b0] sm:$0xff] }
 0x25a   :  { %5485 = vmatprep.subr.bf16.mxu0 %v6767_v5  ;;  %v743_v5 = vld [vmem:[%s10245_s1 + $0x1628] sm:$0xff] }
 0x25b   :  { %5404 = vmatpush1.bf16.msra.mxu1 %v7020_v14  ;;  %v6862_v14 = vcombine.low %v472_v60, %v480_v61  ;;  %v7132_v21 = vcombine.low %v743_v5, %v751_v7  ;;  %v576_v60 = vld [vmem:[%s10245_s1 + $0x10f0] sm:$0xff] }
 0x25c   :  { %5405 = vmatprep.subr.bf16.mxu1 %v7037_v16  ;;  %v6879_v16 = vcombine.high %v488_v8, %v496_v10 }
 0x25d   :  { %5486 = vmatpush1.bf16.msra.mxu0 %v6766_v15  ;;  %v7133_v15 = vcombine.high %v743_v5, %v751_v7  ;;  %v81_v5 = vld [vmem:[%s10245_s1 + $0x178] sm:$0xff]  ;;  %v584_v7 = vld [vmem:[%s10245_s1 + $0x1130] sm:$0xff] }
 0x25e   :  { %5487 = vmatprep.subr.bf16.mxu0 %v6783_v17  ;;  %v759_v17 = vld [vmem:[%s10245_s1 + $0x16a8] sm:$0xff] }
 0x25f   :  { %5406 = vmatpush1.bf16.msra.mxu1 %v7036_v23  ;;  %v6878_v23 = vcombine.low %v488_v8, %v496_v10  ;;  %v7148_v31 = vcombine.low %v759_v17, %v767_v18  ;;  %v592_v8 = vld [vmem:[%s10245_s1 + $0x1170] sm:$0xff] }
 0x260   :  { %5407 = vmatprep.subr.bf16.mxu1 %v7053_v25  ;;  %v6895_v25 = vcombine.high %v504_v19, %v512_v20 }
 0x261   :  { %5488 = vmatpush1.bf16.msra.mxu0 %v6782_v24  ;;  %v7149_v24 = vcombine.high %v759_v17, %v767_v18  ;;  %v97_v17 = vld [vmem:[%s10245_s1 + $0x1f8] sm:$0xff]  ;;  %v600_v18 = vld [vmem:[%s10245_s1 + $0x11b0] sm:$0xff] }
 0x262   :  { %5489 = vmatprep.subr.bf16.mxu0 %v6799_v26  ;;  %v775_v26 = vld [vmem:[%s10245_s1 + $0x1728] sm:$0xff] }
 0x263   :  { %5408 = vmatpush1.bf16.msra.mxu1 %v7052_v34  ;;  %v6894_v34 = vcombine.low %v504_v19, %v512_v20  ;;  %v7164_v3 = vcombine.low %v775_v26, %v783_v27  ;;  %v608_v19 = vld [vmem:[%s10245_s1 + $0x11f0] sm:$0xff] }
 0x264   :  { %5409 = vmatprep.subr.bf16.mxu1 %v7069_v36  ;;  %v6911_v36 = vcombine.high %v520_v29, %v528_v63 }
 0x265   :  { %5490 = vmatpush1.bf16.msra.mxu0 %v6798_v28  ;;  %v7165_v28 = vcombine.high %v775_v26, %v783_v27  ;;  %v113_v26 = vld [vmem:[%s10245_s1 + $0x278] sm:$0xff]  ;;  %v624_v27 = vld [vmem:[%s10245_s1 + $0x1270] sm:$0xff] }
 0x266   :  { %5491 = vmatprep.subr.bf16.mxu0 %v6815_v37  ;;  %v791_v37 = vld [vmem:[%s10245_s1 + $0x17a8] sm:$0xff] }
 0x267   :  { %5410 = vmatpush1.bf16.msra.mxu1 %v7068_v42  ;;  %v6910_v42 = vcombine.low %v520_v29, %v528_v63  ;;  %v7180_v52 = vcombine.low %v791_v37, %v799_v39  ;;  %v6990_v63 = vcombine.low %v600_v18, %v608_v19 }
 0x268   :  { %5411 = vmatprep.subr.bf16.mxu1 %v7085_v47  ;;  %v6927_v47 = vcombine.high %v536_v40, %v544_v41 }
 0x269   :  { %5492 = vmatpush1.bf16.msra.mxu0 %v6814_v45  ;;  %v7181_v45 = vcombine.high %v791_v37, %v799_v39  ;;  %v632_v37 = vld [vmem:[%s10245_s1 + $0x12b0] sm:$0xff] }
 0x26a   :  { %5493 = vmatprep.subr.bf16.mxu0 %v6831_v48  ;;  %v41_v48 = vld [vmem:[%s10245_s1 + $0x38] sm:$0xff]  ;;  %v640_v39 = vld [vmem:[%s10245_s1 + $0x12f0] sm:$0xff] }
 0x26b   :  { %5412 = vmatpush1.bf16.msra.mxu1 %v7084_v54  ;;  %v6926_v54 = vcombine.low %v536_v40, %v544_v41  ;;  %v6432_v61 = vcombine.low %v41_v48, %v49_v49 }
 0x26c   :  { %5413 = vmatprep.subr.bf16.mxu1 %v7101_v56  ;;  %v6943_v56 = vcombine.high %v552_v50, %v560_v51 }
 0x26d   :  { %5494 = vmatpush1.bf16.msra.mxu0 %v6830_v55  ;;  %v6433_v55 = vcombine.high %v41_v48, %v49_v49  ;;  %v648_v48 = vld [vmem:[%s10245_s1 + $0x1330] sm:$0xff] }
 0x26e   :  { %5495 = vmatprep.subr.bf16.mxu0 %v6847_v57  ;;  %v57_v57 = vld [vmem:[%s10245_s1 + $0xb8] sm:$0xff]  ;;  %v656_v49 = vld [vmem:[%s10245_s1 + $0x1370] sm:$0xff] }
 0x26f   :  { %5414 = vmatpush1.bf16.msra.mxu1 %v7100_v0  ;;  %v6942_v0 = vcombine.low %v552_v50, %v560_v51  ;;  %v6448_v10 = vcombine.low %v57_v57, %v65_v58  ;;  %v7022_v51 = vcombine.low %v632_v37, %v640_v39 }
 0x270   :  { %5415 = vmatprep.subr.bf16.mxu1 %v7117_v2  ;;  %v6959_v2 = vcombine.high %v568_v59, %v576_v60 }
 0x271   :  { %5496 = vmatpush1.bf16.msra.mxu0 %v6846_v1  ;;  %v6449_v1 = vcombine.high %v57_v57, %v65_v58  ;;  %v161_v57 = vld [vmem:[%s10245_s1 + $0x3f8] sm:$0xff] }
 0x272   :  { %5497 = vmatprep.subr.bf16.mxu0 %v6863_v4  ;;  %v73_v4 = vld [vmem:[%s10245_s1 + $0x138] sm:$0xff] }
 0x273   :  { %5416 = vmatpush1.bf16.msra.mxu1 %v7116_v12  ;;  %v6958_v12 = vcombine.low %v568_v59, %v576_v60  ;;  %v6464_v20 = vcombine.low %v73_v4, %v81_v5  ;;  %v664_v60 = vld [vmem:[%s10245_s1 + $0x13b0] sm:$0xff] }
 0x274   :  { %5417 = vmatprep.subr.bf16.mxu1 %v7133_v15  ;;  %v6975_v15 = vcombine.high %v584_v7, %v592_v8 }
 0x275   :  { %5498 = vmatpush1.bf16.msra.mxu0 %v6862_v14  ;;  %v6465_v14 = vcombine.high %v73_v4, %v81_v5  ;;  %v7038_v5 = vcombine.low %v648_v48, %v656_v49 }
 0x276   :  { %5499 = vmatprep.subr.bf16.mxu0 %v6879_v16  ;;  %v89_v16 = vld [vmem:[%s10245_s1 + $0x1b8] sm:$0xff] }
 0x277   :  { %5418 = vmatpush1.bf16.msra.mxu1 %v7132_v21  ;;  %v6974_v21 = vcombine.low %v584_v7, %v592_v8  ;;  %v6480_v29 = vcombine.low %v89_v16, %v97_v17 }
 0x278   :  { %5419 = vmatprep.subr.bf16.mxu1 %v7149_v24  ;;  %v6991_v24 = vcombine.high %v600_v18, %v608_v19 }
 0x279   :  { %5500 = vmatpush1.bf16.msra.mxu0 %v6878_v23  ;;  %v6481_v23 = vcombine.high %v89_v16, %v97_v17 }
 0x27a   :  { %5501 = vmatprep.subr.bf16.mxu0 %v6895_v25  ;;  %v105_v25 = vld [vmem:[%s10245_s1 + $0x238] sm:$0xff] }
 0x27b   :  { %5420 = vmatpush1.bf16.msra.mxu1 %v7148_v31  ;;  %v6497_v31 = vcombine.high %v105_v25, %v113_v26  ;;  %v6496_v40 = vcombine.low %v105_v25, %v113_v26 }
 0x27c   :  { %5421 = vmatprep.subr.bf16.mxu1 %v7165_v28  ;;  %v121_v28 = vld [vmem:[%s10245_s1 + $0x2b8] sm:$0xff] }
 0x27d   :  { %5502 = vmatpush1.bf16.msra.mxu0 %v6894_v34 }
 0x27e   :  { %5503 = vmatprep.subr.bf16.mxu0 %v6911_v36  ;;  %v129_v36 = vld [vmem:[%s10245_s1 + $0x2f8] sm:$0xff] }
 0x27f   :  { %5422 = vmatpush1.bf16.msra.mxu1 %v7164_v3  ;;  %v6513_v3 = vcombine.high %v121_v28, %v129_v36  ;;  %v6512_v50 = vcombine.low %v121_v28, %v129_v36 }
 0x280   :  { %5423 = vmatprep.subr.bf16.mxu1 %v7181_v45  ;;  %v137_v45 = vld [vmem:[%s10245_s1 + $0x338] sm:$0xff] }
 0x281   :  { %5504 = vmatpush1.bf16.msra.mxu0 %v6910_v42  ;;  %v7023_v42 = vcombine.high %v632_v37, %v640_v39 }
 0x282   :  { %5505 = vmatprep.subr.bf16.mxu0 %v6927_v47  ;;  %v145_v47 = vld [vmem:[%s10245_s1 + $0x378] sm:$0xff] }
 0x283   :  { %5424 = vmatpush1.bf16.msra.mxu1 %v7180_v52  ;;  %v6529_v52 = vcombine.high %v137_v45, %v145_v47 }
 0x284   :  { %5557 = vmatprep.subr.bf16.mxu1 %v6433_v55  ;;  %v7039_v55 = vcombine.high %v648_v48, %v656_v49 }
 0x285   :  { %5506 = vmatpush1.bf16.msra.mxu0 %v6926_v54 }
 0x286   :  { %5516 = vmatprep.subr.bf16.mxu0 %v6943_v56  ;;  %5426 = vmatmul.mubr.bf16.vlgmr.msra.gmra.mrb[12].mxu1 %v7705_v32  ;;  %v153_v56 = vld [vmem:[%s10245_s1 + $0x3b8] sm:$0xff] }
 0x287   :  { %5558 = vmatpush1.bf16.msra.mxu1 %v6432_v61  ;;  %5589 = vmatprep.mubr.bf16.mxu1 %v7662_v9  ;;  %v616_v9 = vld [vmem:[%s10245_s1 + $0x1230] sm:$0xff]  ;;  %v6545_v7 = vcombine.high %v153_v56, %v161_v57  ;;  %v6544_v16 = vcombine.low %v153_v56, %v161_v57 }
 0x288   :  { %5508 = vmatmul.mubr.bf16.vlgmr.msra.gmra.mrb[12].mxu0 %v7799_v33  ;;  %5559 = vmatprep.subr.bf16.mxu1 %v6449_v1  ;;  %v7007_v34 = vcombine.high %v616_v9, %v624_v27  ;;  %v7006_v41 = vcombine.low %v616_v9, %v624_v27  ;;  %v672_v61 = vld [vmem:[%s10245_s1 + $0x13f0] sm:$0xff] }
 0x289   :  { %5517 = vmatpush1.bf16.msra.mxu0 %v6942_v0  ;;  %5548 = vmatprep.mubr.bf16.mxu0 %v7808_v38  ;;  %v7055_v8 = vcombine.high %v664_v60, %v672_v61  ;;  %v7054_v17 = vcombine.low %v664_v60, %v672_v61 }
 0x28a   :  { %5518 = vmatprep.subr.bf16.mxu0 %v6959_v2  ;;  %v6528_v2 = vcombine.low %v137_v45, %v145_v47 }
 0x28b   :  { %5560 = vmatpush1.bf16.msra.mxu1 %v6448_v10  ;;  %v169_v10 = vld [vmem:[%s10245_s1 + $0x438] sm:$0xff] }
 0x28c   :  { %5561 = vmatprep.subr.bf16.mxu1 %v6465_v14  ;;  %v680_v14 = vld [vmem:[%s10245_s1 + $0x1430] sm:$0xff] }
 0x28d   :  { %5519 = vmatpush1.bf16.msra.mxu0 %v6958_v12  ;;  %v177_v12 = vld [vmem:[%s10245_s1 + $0x478] sm:$0xff] }
 0x28e   :  { %5520 = vmatprep.subr.bf16.mxu0 %v6975_v15  ;;  %v688_v15 = vld [vmem:[%s10245_s1 + $0x1470] sm:$0xff]  ;;  %v6561_v18 = vcombine.high %v169_v10, %v177_v12  ;;  %v6560_v25 = vcombine.low %v169_v10, %v177_v12 }
 0x28f   :  { %5562 = vmatpush1.bf16.msra.mxu1 %v6464_v20  ;;  %v7071_v19 = vcombine.high %v680_v14, %v688_v15  ;;  %v185_v20 = vld [vmem:[%s10245_s1 + $0x4b8] sm:$0xff]  ;;  %v7070_v26 = vcombine.low %v680_v14, %v688_v15 }
 0x290   :  { %5563 = vmatprep.subr.bf16.mxu1 %v6481_v23  ;;  %v696_v23 = vld [vmem:[%s10245_s1 + $0x14b0] sm:$0xff]  ;;  %v265_v14 = vld [vmem:[%s10245_s1 + $0x738] sm:$0xff] }
 0x291   :  { %5521 = vmatpush1.bf16.msra.mxu0 %v6974_v21  ;;  %v193_v21 = vld [vmem:[%s10245_s1 + $0x4f8] sm:$0xff] }
 0x292   :  { %5522 = vmatprep.subr.bf16.mxu0 %v6991_v24  ;;  %v704_v24 = vld [vmem:[%s10245_s1 + $0x14f0] sm:$0xff]  ;;  %v6577_v9 = vcombine.high %v185_v20, %v193_v21  ;;  %v6576_v28 = vcombine.low %v185_v20, %v193_v21  ;;  %v273_v15 = vld [vmem:[%s10245_s1 + $0x778] sm:$0xff] }
 0x293   :  { %5564 = vmatpush1.bf16.msra.mxu1 %v6480_v29  ;;  %v7087_v27 = vcombine.high %v696_v23, %v704_v24  ;;  %v201_v29 = vld [vmem:[%s10245_s1 + $0x538] sm:$0xff]  ;;  %v7086_v36 = vcombine.low %v696_v23, %v704_v24  ;;  %v6657_v20 = vcombine.high %v265_v14, %v273_v15 }
 0x294   :  { %5565 = vmatprep.subr.bf16.mxu1 %v6497_v31  ;;  %v712_v31 = vld [vmem:[%s10245_s1 + $0x1530] sm:$0xff]  ;;  %v281_v23 = vld [vmem:[%s10245_s1 + $0x7b8] sm:$0xff] }
 0x295   :  { %5523 = vmatpush1.bf16.msra.mxu0 %v6990_v63  ;;  %v209_v63 = vld [vmem:[%s10245_s1 + $0x578] sm:$0xff] }
 0x296   :  { %5524 = vmatprep.subr.bf16.mxu0 %v7007_v34  ;;  %v720_v34 = vld [vmem:[%s10245_s1 + $0x1570] sm:$0xff]  ;;  %v6593_v37 = vcombine.high %v201_v29, %v209_v63  ;;  %v6592_v45 = vcombine.low %v201_v29, %v209_v63  ;;  %v289_v24 = vld [vmem:[%s10245_s1 + $0x7f8] sm:$0xff] }
 0x297   :  { %5566 = vmatpush1.bf16.msra.mxu1 %v6496_v40  ;;  %v7103_v39 = vcombine.high %v712_v31, %v720_v34  ;;  %v217_v40 = vld [vmem:[%s10245_s1 + $0x5b8] sm:$0xff]  ;;  %v7102_v47 = vcombine.low %v712_v31, %v720_v34  ;;  %v6673_v29 = vcombine.high %v281_v23, %v289_v24 }
 0x298   :  { %5567 = vmatprep.subr.bf16.mxu1 %v6513_v3  ;;  %v728_v3 = vld [vmem:[%s10245_s1 + $0x15b0] sm:$0xff]  ;;  %v297_v31 = vld [vmem:[%s10245_s1 + $0x838] sm:$0xff] }
 0x299   :  { %5525 = vmatpush1.bf16.msra.mxu0 %v7006_v41  ;;  %v9654_v54 = vpop.f32.mrb[8].mxu1  ;;  %v225_v41 = vld [vmem:[%s10245_s1 + $0x5f8] sm:$0xff] }
 0x29a   :  { %5526 = vmatprep.subr.bf16.mxu0 %v7023_v42  ;;  %v5682_v58 = vmax.f32 %v9054_v6, %v9654_v54  ;;  %v9664_v59 = vpop.f32.mrb[9].mxu1  ;;  %v736_v42 = vld [vmem:[%s10245_s1 + $0x15f0] sm:$0xff]  ;;  %v6609_v48 = vcombine.high %v217_v40, %v225_v41  ;;  %v6608_v56 = vcombine.low %v217_v40, %v225_v41  ;;  %v305_v34 = vld [vmem:[%s10245_s1 + $0x878] sm:$0xff]  ;;  %v7480_v6 = vld [vmem:[%s10249_s5] sm:$0xff]  }
 0x29b   :  { %v5683_v0 = vmax.f32 %v9062_v11, %v9664_v59  ;;  %v5185_v1 = vpop.f32.mrb[10].mxu1  ;;  %5568 = vmatpush1.bf16.msra.mxu1 %v6512_v50  ;;  %v7119_v49 = vcombine.high %v728_v3, %v736_v42  ;;  %v233_v50 = vld [vmem:[%s10245_s1 + $0x638] sm:$0xff]  ;;  %v7118_v57 = vcombine.low %v728_v3, %v736_v42  ;;  %v6688_v41 = vcombine.low %v297_v31, %v305_v34  ;;  %v7481_v11 = vld [vmem:[%s10249_s5 + $0x8] sm:$0xff]   ;;  %v7482_v54 = vld [vmem:[%s10249_s5 + $0x10] sm:$0xff]  }
 0x29c   :  { %v5186_v4 = vpop.f32.mrb[11].mxu1  ;;  %5569 = vmatprep.subr.bf16.mxu1 %v6529_v52  ;;  %v744_v52 = vld [vmem:[%s10245_s1 + $0x1630] sm:$0xff]  ;;  %v249_v1 = vld [vmem:[%s10245_s1 + $0x6b8] sm:$0xff] }
 0x29d   :  { %5527 = vmatpush1.bf16.msra.mxu0 %v7022_v51  ;;  %v241_v51 = vld [vmem:[%s10245_s1 + $0x678] sm:$0xff]  ;;  %v760_v4 = vld [vmem:[%s10245_s1 + $0x16b0] sm:$0xff] }
 0x29e   :  { %5528 = vmatprep.subr.bf16.mxu0 %v7039_v55  ;;  %v752_v55 = vld [vmem:[%s10245_s1 + $0x1670] sm:$0xff]  ;;  %v6625_v60 = vcombine.high %v233_v50, %v241_v51  ;;  %v321_v40 = vld [vmem:[%s10245_s1 + $0x8f8] sm:$0xff] }
 0x29f   :  { %5570 = vmatpush1.bf16.msra.mxu1 %v6528_v2  ;;  %v7135_v61 = vcombine.high %v744_v52, %v752_v55  ;;  %v257_v2 = vld [vmem:[%s10245_s1 + $0x6f8] sm:$0xff] }
 0x2a0   :  { %5571 = vmatprep.subr.bf16.mxu1 %v6545_v7  ;;  %v6624_v7 = vcombine.low %v233_v50, %v241_v51  ;;  %v6641_v10 = vcombine.high %v249_v1, %v257_v2  ;;  %v329_v42 = vld [vmem:[%s10245_s1 + $0x938] sm:$0xff] }
 0x2a1   :  { %5529 = vmatpush1.bf16.msra.mxu0 %v7038_v5  ;;  %v768_v5 = vld [vmem:[%s10245_s1 + $0x16f0] sm:$0xff]  ;;  %v353_v50 = vld [vmem:[%s10245_s1 + $0x9f8] sm:$0xff] }
 0x2a2   :  { %5530 = vmatprep.subr.bf16.mxu0 %v7055_v8  ;;  %v7134_v8 = vcombine.low %v744_v52, %v752_v55  ;;  %v7151_v12 = vcombine.high %v760_v4, %v768_v5  ;;  %v361_v52 = vld [vmem:[%s10245_s1 + $0xa38] sm:$0xff] }
 0x2a3   :  { %5572 = vmatpush1.bf16.msra.mxu1 %v6544_v16  ;;  %v776_v16 = vld [vmem:[%s10245_s1 + $0x1730] sm:$0xff] }
 0x2a4   :  { %5573 = vmatprep.subr.bf16.mxu1 %v6561_v18  ;;  %v6640_v18 = vcombine.low %v249_v1, %v257_v2  ;;  %v393_v2 = vld [vmem:[%s10245_s1 + $0xb38] sm:$0xff] }
 0x2a5   :  { %5531 = vmatpush1.bf16.msra.mxu0 %v7054_v17  ;;  %v784_v17 = vld [vmem:[%s10245_s1 + $0x1770] sm:$0xff] }
 0x2a6   :  { %5532 = vmatprep.subr.bf16.mxu0 %v7071_v19  ;;  %v7150_v19 = vcombine.low %v760_v4, %v768_v5  ;;  %v7167_v21 = vcombine.high %v776_v16, %v784_v17  ;;  %v401_v4 = vld [vmem:[%s10245_s1 + $0xb78] sm:$0xff] }
 0x2a7   :  { %5574 = vmatpush1.bf16.msra.mxu1 %v6560_v25  ;;  %v792_v25 = vld [vmem:[%s10245_s1 + $0x17b0] sm:$0xff] }
 0x2a8   :  { %5575 = vmatprep.subr.bf16.mxu1 %v6577_v9  ;;  %v6656_v9 = vcombine.low %v265_v14, %v273_v15  ;;  %v6784_v15 = vcombine.low %v393_v2, %v401_v4 }
 0x2a9   :  { %5533 = vmatpush1.bf16.msra.mxu0 %v7070_v26  ;;  %v800_v26 = vld [vmem:[%s10245_s1 + $0x17f0] sm:$0xff] }
 0x2aa   :  { %5534 = vmatprep.subr.bf16.mxu0 %v7087_v27  ;;  %v7166_v27 = vcombine.low %v776_v16, %v784_v17  ;;  %v7183_v63 = vcombine.high %v792_v25, %v800_v26 }
 0x2ab   :  { %5576 = vmatpush1.bf16.msra.mxu1 %v6576_v28  ;;  %v6672_v28 = vcombine.low %v281_v23, %v289_v24  ;;  %v7386_v23 = vld [vmem:[%s10247_s3 + $0x4] ss:$8 sps:$4 sm:$0xff]  }
 0x2ac   :  { %5577 = vmatprep.subr.bf16.mxu1 %v6593_v37  ;;  %v6689_v37 = vcombine.high %v297_v31, %v305_v34 }
 0x2ad   :  { %5535 = vmatpush1.bf16.msra.mxu0 %v7086_v36  ;;  %v7182_v36 = vcombine.low %v792_v25, %v800_v26  ;;  %v7389_v25 = vld [vmem:[%s10247_s3 + $0x14] ss:$8 sps:$4 sm:$0xff]  }
 0x2ae   :  { %5536 = vmatprep.subr.bf16.mxu0 %v7103_v39  ;;  %v313_v39 = vld [vmem:[%s10245_s1 + $0x8b8] sm:$0xff] }
 0x2af   :  { %5578 = vmatpush1.bf16.msra.mxu1 %v6592_v45  ;;  %v6705_v3 = vcombine.high %v313_v39, %v321_v40  ;;  %v337_v45 = vld [vmem:[%s10245_s1 + $0x978] sm:$0xff] }
 0x2b0   :  { %5579 = vmatprep.subr.bf16.mxu1 %v6609_v48  ;;  %v6721_v48 = vcombine.high %v329_v42, %v337_v45  ;;  %v6720_v51 = vcombine.low %v329_v42, %v337_v45  ;;  %v481_v42 = vld [vmem:[%s10245_s1 + $0xdf8] sm:$0xff] }
 0x2b1   :  { %5537 = vmatpush1.bf16.msra.mxu0 %v7102_v47  ;;  %v6704_v47 = vcombine.low %v313_v39, %v321_v40  ;;  %v7395_v39 = vld [vmem:[%s10247_s3 + $0x34] ss:$8 sps:$4 sm:$0xff]   ;;  %v7393_v45 = vld [vmem:[%s10247_s3 + $0x30] ss:$8 sps:$4 sm:$0xff]  }
 0x2b2   :  { %5538 = vmatprep.subr.bf16.mxu0 %v7119_v49  ;;  %v345_v49 = vld [vmem:[%s10245_s1 + $0x9b8] sm:$0xff] }
 0x2b3   :  { %5580 = vmatpush1.bf16.msra.mxu1 %v6608_v56  ;;  %v6736_v55 = vcombine.low %v345_v49, %v353_v50 }
 0x2b4   :  { %5581 = vmatprep.subr.bf16.mxu1 %v6625_v60  ;;  %v385_v60 = vld [vmem:[%s10245_s1 + $0xaf8] sm:$0xff] }
 0x2b5   :  { %5539 = vmatpush1.bf16.msra.mxu0 %v7118_v57  ;;  %v377_v57 = vld [vmem:[%s10245_s1 + $0xab8] sm:$0xff] }
 0x2b6   :  { %5540 = vmatprep.subr.bf16.mxu0 %v7135_v61  ;;  %v6769_v1 = vcombine.high %v377_v57, %v385_v60  ;;  %v6768_v5 = vcombine.low %v377_v57, %v385_v60  ;;  %v7399_v57 = vld [vmem:[%s10247_s3 + $0x50] ss:$8 sps:$4 sm:$0xff]  }
 0x2b7   :  { %5582 = vmatpush1.bf16.msra.mxu1 %v6624_v7  ;;  %v6785_v7 = vcombine.high %v393_v2, %v401_v4  ;;  %v521_v2 = vld [vmem:[%s10245_s1 + $0xf38] sm:$0xff] }
 0x2b8   :  { %5583 = vmatprep.subr.bf16.mxu1 %v6641_v10  ;;  %v417_v10 = vld [vmem:[%s10245_s1 + $0xbf8] sm:$0xff] }
 0x2b9   :  { %5541 = vmatpush1.bf16.msra.mxu0 %v7134_v8  ;;  %v409_v8 = vld [vmem:[%s10245_s1 + $0xbb8] sm:$0xff] }
 0x2ba   :  { %5542 = vmatprep.subr.bf16.mxu0 %v7151_v12  ;;  %v6801_v17 = vcombine.high %v409_v8, %v417_v10  ;;  %v6800_v24 = vcombine.low %v409_v8, %v417_v10  ;;  %v529_v4 = vld [vmem:[%s10245_s1 + $0xf78] sm:$0xff] }
 0x2bb   :  { %5584 = vmatpush1.bf16.msra.mxu1 %v6640_v18  ;;  %v425_v18 = vld [vmem:[%s10245_s1 + $0xc38] sm:$0xff] }
 0x2bc   :  { %5585 = vmatprep.subr.bf16.mxu1 %v6657_v20  ;;  %v7407_v8 = vld [vmem:[%s10247_s3 + $0x74] ss:$8 sps:$4 sm:$0xff]  }
 0x2bd   :  { %5543 = vmatpush1.bf16.msra.mxu0 %v7150_v19  ;;  %v433_v19 = vld [vmem:[%s10245_s1 + $0xc78] sm:$0xff] }
 0x2be   :  { %5544 = vmatprep.subr.bf16.mxu0 %v7167_v21  ;;  %v7384_v21 = vld [vmem:[%s10247_s3] ss:$8 sps:$4 sm:$0xff]   ;;  %v6817_v26 = vcombine.high %v425_v18, %v433_v19  ;;  %v6816_v31 = vcombine.low %v425_v18, %v433_v19  ;;  %v6913_v18 = vcombine.high %v521_v2, %v529_v4  ;;  %v7410_v19 = vld [vmem:[%s10247_s3 + $0x84] ss:$8 sps:$4 sm:$0xff]  }
 0x2bf   :  { %5586 = vmatpush1.bf16.msra.mxu1 %v6656_v9  ;;  %v441_v9 = vld [vmem:[%s10245_s1 + $0xcb8] sm:$0xff] }
 0x2c0   :  { %5587 = vmatprep.subr.bf16.mxu1 %v6673_v29  ;;  %v7387_v29 = vld [vmem:[%s10247_s3 + $0x10] ss:$8 sps:$4 sm:$0xff]  }
 0x2c1   :  { %5545 = vmatpush1.bf16.msra.mxu0 %v7166_v27  ;;  %v449_v27 = vld [vmem:[%s10245_s1 + $0xcf8] sm:$0xff] }
 0x2c2   :  { %5546 = vmatprep.subr.bf16.mxu0 %v7183_v63  ;;  %v7392_v63 = vld [vmem:[%s10247_s3 + $0x24] ss:$8 sps:$4 sm:$0xff]   ;;  %v6833_v34 = vcombine.high %v441_v9, %v449_v27  ;;  %v6832_v40 = vcombine.low %v441_v9, %v449_v27 }
 0x2c3   :  { %5588 = vmatpush1.bf16.msra.mxu1 %v6672_v28  ;;  %v457_v28 = vld [vmem:[%s10245_s1 + $0xd38] sm:$0xff] }
 0x2c4   :  { %5598 = vmatprep.subr.bf16.mxu1 %v6689_v37  ;;  %v7390_v37 = vld [vmem:[%s10247_s3 + $0x20] ss:$8 sps:$4 sm:$0xff]  }
 0x2c5   :  { %5547 = vmatpush1.bf16.msra.mxu0 %v7182_v36  ;;  %v465_v36 = vld [vmem:[%s10245_s1 + $0xd78] sm:$0xff] }
 0x2c6   :  { %5590 = vmatmul.mubr.bf16.vlgmr.msra.gmra.mrb[16].mxu1 %v7781_v22  ;;  %v6737_v22 = vcombine.high %v345_v49, %v353_v50  ;;  %6110 = vmatprep.subr.bf16.mxu0 %v7386_v23  ;;  %v489_v50 = vld [vmem:[%s10245_s1 + $0xe38] sm:$0xff] }
 0x2c7   :  { %5599 = vmatpush1.bf16.msra.mxu1 %v6688_v41  ;;  %5630 = vmatprep.mubr.bf16.mxu1 %v7673_v13  ;;  %v369_v13 = vld [vmem:[%s10245_s1 + $0xa78] sm:$0xff]  ;;  %v6849_v41 = vcombine.high %v457_v28, %v465_v36 }
 0x2c8   :  { %5549 = vmatmul.mubr.bf16.vlgmr.msra.gmra.mrb[12].mxu0 %v7705_v32  ;;  %5600 = vmatprep.subr.bf16.mxu1 %v6705_v3  ;;  %v6753_v56 = vcombine.high %v361_v52, %v369_v13  ;;  %v6752_v61 = vcombine.low %v361_v52, %v369_v13  ;;  %v473_v3 = vld [vmem:[%s10245_s1 + $0xdb8] sm:$0xff] }
 0x2c9   :  { %6111 = vmatpush1.bf16.msra.mxu0 %v7384_v21  ;;  %v6865_v49 = vcombine.high %v473_v3, %v481_v42  ;;  %v7401_v52 = vld [vmem:[%s10247_s3 + $0x54] ss:$8 sps:$4 sm:$0xff]   ;;  %v6864_v13 = vcombine.low %v473_v3, %v481_v42 }
 0x2ca   :  { %6112 = vmatprep.subr.bf16.mxu0 %v7389_v25  ;;  %v553_v23 = vld [vmem:[%s10245_s1 + $0x1038] sm:$0xff]  ;;  %v7408_v25 = vld [vmem:[%s10247_s3 + $0x80] ss:$8 sps:$4 sm:$0xff]  }
 0x2cb   :  { %5601 = vmatpush1.bf16.msra.mxu1 %v6704_v47  ;;  %v7398_v47 = vld [vmem:[%s10247_s3 + $0x44] ss:$8 sps:$4 sm:$0xff]  }
 0x2cc   :  { %5602 = vmatprep.subr.bf16.mxu1 %v6721_v48  ;;  %v6848_v48 = vcombine.low %v457_v28, %v465_v36 }
 0x2cd   :  { %6113 = vmatpush1.bf16.msra.mxu0 %v7387_v29  ;;  %v569_v29 = vld [vmem:[%s10245_s1 + $0x10b8] sm:$0xff] }
 0x2ce   :  { %6114 = vmatprep.subr.bf16.mxu0 %v7392_v63  ;;  %v577_v63 = vld [vmem:[%s10245_s1 + $0x10f8] sm:$0xff] }
 0x2cf   :  { %5603 = vmatpush1.bf16.msra.mxu1 %v6720_v51  ;;  %v497_v51 = vld [vmem:[%s10245_s1 + $0xe78] sm:$0xff]  ;;  %v6961_v36 = vcombine.high %v569_v29, %v577_v63  ;;  %v6960_v3 = vcombine.low %v569_v29, %v577_v63 }
 0x2d0   :  { %5604 = vmatprep.subr.bf16.mxu1 %v6737_v22  ;;  %v7396_v22 = vld [vmem:[%s10247_s3 + $0x40] ss:$8 sps:$4 sm:$0xff]   ;;  %v6881_v60 = vcombine.high %v489_v50, %v497_v51  ;;  %v713_v63 = vld [vmem:[%s10245_s1 + $0x1538] sm:$0xff] }
 0x2d1   :  { %6115 = vmatpush1.bf16.msra.mxu0 %v7390_v37  ;;  %v585_v37 = vld [vmem:[%s10245_s1 + $0x1138] sm:$0xff] }
 0x2d2   :  { %6116 = vmatprep.subr.bf16.mxu0 %v7395_v39  ;;  %v593_v39 = vld [vmem:[%s10245_s1 + $0x1178] sm:$0xff] }
 0x2d3   :  { %5605 = vmatpush1.bf16.msra.mxu1 %v6736_v55  ;;  %v505_v55 = vld [vmem:[%s10245_s1 + $0xeb8] sm:$0xff]  ;;  %v6977_v42 = vcombine.high %v585_v37, %v593_v39 }
 0x2d4   :  { %5606 = vmatprep.subr.bf16.mxu1 %v6753_v56  ;;  %v513_v56 = vld [vmem:[%s10245_s1 + $0xef8] sm:$0xff] }
 0x2d5   :  { %6117 = vmatpush1.bf16.msra.mxu0 %v7393_v45  ;;  %v6896_v10 = vcombine.low %v505_v55, %v513_v56  ;;  %v601_v45 = vld [vmem:[%s10245_s1 + $0x11b8] sm:$0xff] }
 0x2d6   :  { %6118 = vmatprep.subr.bf16.mxu0 %v7398_v47  ;;  %v609_v47 = vld [vmem:[%s10245_s1 + $0x11f8] sm:$0xff] }
 0x2d7   :  { %5607 = vmatpush1.bf16.msra.mxu1 %v6752_v61  ;;  %v7404_v61 = vld [vmem:[%s10247_s3 + $0x64] ss:$8 sps:$4 sm:$0xff]  }
 0x2d8   :  { %5608 = vmatprep.subr.bf16.mxu1 %v6769_v1  ;;  %v6880_v1 = vcombine.low %v489_v50, %v497_v51  ;;  %v617_v50 = vld [vmem:[%s10245_s1 + $0x1238] sm:$0xff] }
 0x2d9   :  { %6119 = vmatpush1.bf16.msra.mxu0 %v7396_v22  ;;  %v625_v51 = vld [vmem:[%s10245_s1 + $0x1278] sm:$0xff]  ;;  %v7420_v22 = vld [vmem:[%s10247_s3 + $0xc0] ss:$8 sps:$4 sm:$0xff]  }
 0x2da   :  { %6120 = vmatprep.subr.bf16.mxu0 %v7401_v52  ;;  %v6992_v52 = vcombine.low %v601_v45, %v609_v47 }
 0x2db   :  { %v9821_v12 = vpop.f32.mrb[8].mxu0  ;;  %5609 = vmatpush1.bf16.msra.mxu1 %v6768_v5  ;;  %v7402_v5 = vld [vmem:[%s10247_s3 + $0x60] ss:$8 sps:$4 sm:$0xff]  }
 0x2dc   :  { %v9823_v14 = vpop.f32.mrb[9].mxu0  ;;  %5610 = vmatprep.subr.bf16.mxu1 %v6785_v7  ;;  %v6897_v7 = vcombine.high %v505_v55, %v513_v56  ;;  %v633_v55 = vld [vmem:[%s10245_s1 + $0x12b8] sm:$0xff] }
 0x2dd   :  { %v5308_v16 = vpop.f32.mrb[10].mxu0  ;;  %6121 = vmatpush1.bf16.msra.mxu0 %v7399_v57  ;;  %v641_v56 = vld [vmem:[%s10245_s1 + $0x12f8] sm:$0xff]  ;;  %v7008_v57 = vcombine.low %v617_v50, %v625_v51 }
 0x2de   :  { %v5309_v20 = vpop.f32.mrb[11].mxu0  ;;  %6122 = vmatprep.subr.bf16.mxu0 %v7404_v61  ;;  %v545_v16 = vld [vmem:[%s10245_s1 + $0xff8] sm:$0xff] }
 0x2df   :  { %5611 = vmatpush1.bf16.msra.mxu1 %v6784_v15  ;;  %v537_v15 = vld [vmem:[%s10245_s1 + $0xfb8] sm:$0xff]  ;;  %v6912_v20 = vcombine.low %v521_v2, %v529_v4  ;;  %v7024_v2 = vcombine.low %v633_v55, %v641_v56 }
 0x2e0   :  { %5612 = vmatprep.subr.bf16.mxu1 %v6801_v17  ;;  %v7405_v17 = vld [vmem:[%s10247_s3 + $0x70] ss:$8 sps:$4 sm:$0xff]   ;;  %v6929_v21 = vcombine.high %v537_v15, %v545_v16  ;;  %v6928_v9 = vcombine.low %v537_v15, %v545_v16 }
 0x2e1   :  { %6123 = vmatpush1.bf16.msra.mxu0 %v7402_v5  ;;  %v649_v61 = vld [vmem:[%s10245_s1 + $0x1338] sm:$0xff] }
 0x2e2   :  { %6124 = vmatprep.subr.bf16.mxu0 %v7407_v8  ;;  %v665_v5 = vld [vmem:[%s10245_s1 + $0x13b8] sm:$0xff] }
 0x2e3   :  { %5613 = vmatpush1.bf16.msra.mxu1 %v6800_v24  ;;  %v561_v24 = vld [vmem:[%s10245_s1 + $0x1078] sm:$0xff] }
 0x2e4   :  { %5614 = vmatprep.subr.bf16.mxu1 %v6817_v26  ;;  %v7413_v26 = vld [vmem:[%s10247_s3 + $0x94] ss:$8 sps:$4 sm:$0xff]   ;;  %v6945_v27 = vcombine.high %v553_v23, %v561_v24  ;;  %v6944_v28 = vcombine.low %v553_v23, %v561_v24 }
 0x2e5   :  { %6125 = vmatpush1.bf16.msra.mxu0 %v7405_v17  ;;  %v7425_v8 = vld [vmem:[%s10247_s3 + $0xd4] ss:$8 sps:$4 sm:$0xff]  }
 0x2e6   :  { %6126 = vmatprep.subr.bf16.mxu0 %v7410_v19  ;;  %v681_v17 = vld [vmem:[%s10245_s1 + $0x1438] sm:$0xff]  ;;  %v7428_v19 = vld [vmem:[%s10247_s3 + $0xe4] ss:$8 sps:$4 sm:$0xff]  }
 0x2e7   :  { %5615 = vmatpush1.bf16.msra.mxu1 %v6816_v31  ;;  %v7411_v31 = vld [vmem:[%s10247_s3 + $0x90] ss:$8 sps:$4 sm:$0xff]  }
 0x2e8   :  { %5616 = vmatprep.subr.bf16.mxu1 %v6833_v34  ;;  %v7416_v34 = vld [vmem:[%s10247_s3 + $0xa4] ss:$8 sps:$4 sm:$0xff]   ;;  %v697_v24 = vld [vmem:[%s10245_s1 + $0x14b8] sm:$0xff] }
 0x2e9   :  { %6127 = vmatpush1.bf16.msra.mxu0 %v7408_v25  ;;  %v705_v25 = vld [vmem:[%s10245_s1 + $0x14f8] sm:$0xff] }
 0x2ea   :  { %6128 = vmatprep.subr.bf16.mxu0 %v7413_v26  ;;  %v7431_v26 = vld [vmem:[%s10247_s3 + $0xf4] ss:$8 sps:$4 sm:$0xff]   ;;  %v7089_v29 = vcombine.high %v697_v24, %v705_v25 }
 0x2eb   :  { %5617 = vmatpush1.bf16.msra.mxu1 %v6832_v40  ;;  %v7414_v40 = vld [vmem:[%s10247_s3 + $0xa0] ss:$8 sps:$4 sm:$0xff]  }
 0x2ec   :  { %5618 = vmatprep.subr.bf16.mxu1 %v6849_v41  ;;  %v7419_v41 = vld [vmem:[%s10247_s3 + $0xb4] ss:$8 sps:$4 sm:$0xff]  }
 0x2ed   :  { %6129 = vmatpush1.bf16.msra.mxu0 %v7411_v31  ;;  %v721_v31 = vld [vmem:[%s10245_s1 + $0x1578] sm:$0xff] }
 0x2ee   :  { %6130 = vmatprep.subr.bf16.mxu0 %v7416_v34  ;;  %v7088_v34 = vcombine.low %v697_v24, %v705_v25 }
 0x2ef   :  { %5619 = vmatpush1.bf16.msra.mxu1 %v6848_v48  ;;  %v6976_v48 = vcombine.low %v585_v37, %v593_v39  ;;  %v729_v37 = vld [vmem:[%s10245_s1 + $0x15b8] sm:$0xff] }
 0x2f0   :  { %5620 = vmatprep.subr.bf16.mxu1 %v6865_v49  ;;  %v6993_v49 = vcombine.high %v601_v45, %v609_v47  ;;  %v737_v39 = vld [vmem:[%s10245_s1 + $0x15f8] sm:$0xff] }
 0x2f1   :  { %6131 = vmatpush1.bf16.msra.mxu0 %v7414_v40  ;;  %v7104_v40 = vcombine.low %v713_v63, %v721_v31  ;;  %v7120_v45 = vcombine.low %v729_v37, %v737_v39 }
 0x2f2   :  { %6132 = vmatprep.subr.bf16.mxu0 %v7419_v41  ;;  %v7121_v41 = vcombine.high %v729_v37, %v737_v39  ;;  %v7455_v37 = vld [vmem:[%s10247_s3 + $0x174] ss:$8 sps:$4 sm:$0xff]   ;;  %v7453_v39 = vld [vmem:[%s10247_s3 + $0x170] ss:$8 sps:$4 sm:$0xff]  }
 0x2f3   :  { %5621 = vmatpush1.bf16.msra.mxu1 %v6864_v13  ;;  %v7009_v13 = vcombine.high %v617_v50, %v625_v51  ;;  %v777_v50 = vld [vmem:[%s10245_s1 + $0x1738] sm:$0xff] }
 0x2f4   :  { %5622 = vmatprep.subr.bf16.mxu1 %v6881_v60  ;;  %v7025_v60 = vcombine.high %v633_v55, %v641_v56  ;;  %v785_v51 = vld [vmem:[%s10245_s1 + $0x1778] sm:$0xff] }
 0x2f5   :  { %v801_v55 = vld [vmem:[%s10245_s1 + $0x17f8] sm:$0xff]  ;;  %v7168_v56 = vcombine.low %v777_v50, %v785_v51 }
 0x2f7   :  { %5623 = vmatpush1.bf16.msra.mxu1 %v6880_v1  ;;  %v657_v1 = vld [vmem:[%s10245_s1 + $0x1378] sm:$0xff] }
 0x2f8   :  { %5624 = vmatprep.subr.bf16.mxu1 %v6897_v7  ;;  %v7041_v4 = vcombine.high %v649_v61, %v657_v1  ;;  %v673_v7 = vld [vmem:[%s10245_s1 + $0x13f8] sm:$0xff]  ;;  %v7040_v15 = vcombine.low %v649_v61, %v657_v1 }
 0x2f9   :  { %v7057_v16 = vcombine.high %v665_v5, %v673_v7 }
 0x2fb   :  { %5625 = vmatpush1.bf16.msra.mxu1 %v6896_v10  ;;  %v7423_v10 = vld [vmem:[%s10247_s3 + $0xd0] ss:$8 sps:$4 sm:$0xff]  }
 0x2fc   :  { %5626 = vmatprep.subr.bf16.mxu1 %v6913_v18  ;;  %v689_v18 = vld [vmem:[%s10245_s1 + $0x1478] sm:$0xff] }
 0x2fd   :  { %v7073_v23 = vcombine.high %v681_v17, %v689_v18 }
 0x2ff   :  { %5627 = vmatpush1.bf16.msra.mxu1 %v6912_v20  ;;  %v7426_v20 = vld [vmem:[%s10247_s3 + $0xe0] ss:$8 sps:$4 sm:$0xff]  }
 0x300   :  { %5628 = vmatprep.subr.bf16.mxu1 %v6929_v21  ;;  %v7056_v21 = vcombine.low %v665_v5, %v673_v7  ;;  %v5696_v5 = vsub.s32 0, %v7612_v44  ;;  %v10079_v7 = vld [vmem:[%s10248_s2] sm:$0xf] }
 0x303   :  { %5629 = vmatpush1.bf16.msra.mxu1 %v6928_v9  ;;  %v7429_v9 = vld [vmem:[%s10247_s3 + $0xf0] ss:$8 sps:$4 sm:$0xff]  }
 0x304   :  { %5639 = vmatprep.subr.bf16.mxu1 %v6945_v27  ;;  %v7072_v27 = vcombine.low %v681_v17, %v689_v18 }
 0x306   :  { %5631 = vmatmul.mubr.bf16.vlgmr.msra.gmra.mrb[16].mxu1 %v7799_v33  ;;  %v7417_v33 = vld [vmem:[%s10247_s3 + $0xb0] ss:$8 sps:$4 sm:$0xff]  }
 0x307   :  { %5640 = vmatpush1.bf16.msra.mxu1 %v6944_v28  ;;  %5671 = vmatprep.mubr.bf16.mxu1 %v7808_v38  ;;  %v7422_v38 = vld [vmem:[%s10247_s3 + $0xc4] ss:$8 sps:$4 sm:$0xff]  }
 0x308   :  { %5641 = vmatprep.subr.bf16.mxu1 %v6961_v36  ;;  %6133 = vmatpush1.bf16.msra.mxu0 %v7417_v33  ;;  %v7434_v28 = vld [vmem:[%s10247_s3 + $0x104] ss:$8 sps:$4 sm:$0xff]   ;;  %v7105_v36 = vcombine.high %v713_v63, %v721_v31  ;;  %v761_v33 = vld [vmem:[%s10245_s1 + $0x16b8] sm:$0xff]  ;;  %v7444_v63 = vld [vmem:[%s10247_s3 + $0x140] ss:$8 sps:$4 sm:$0xff]  }
 0x309   :  { %6134 = vmatprep.subr.bf16.mxu0 %v7422_v38  ;;  %v769_v38 = vld [vmem:[%s10245_s1 + $0x16f8] sm:$0xff] }
 0x30a   :  { %v7449_v31 = vld [vmem:[%s10247_s3 + $0x154] ss:$8 sps:$4 sm:$0xff]  }
 0x30b   :  { %5642 = vmatpush1.bf16.msra.mxu1 %v6960_v3  ;;  %v745_v3 = vld [vmem:[%s10245_s1 + $0x1638] sm:$0xff] }
 0x30c   :  { %5643 = vmatprep.subr.bf16.mxu1 %v6977_v42  ;;  %6135 = vmatpush1.bf16.msra.mxu0 %v7420_v22  ;;  %v753_v42 = vld [vmem:[%s10245_s1 + $0x1678] sm:$0xff]  ;;  %v7152_v22 = vcombine.low %v761_v33, %v769_v38 }
 0x30d   :  { %6136 = vmatprep.subr.bf16.mxu0 %v7425_v8  ;;  %v7137_v47 = vcombine.high %v745_v3, %v753_v42  ;;  %v5700_v8 = vsub.s32 1, %v7612_v44 }
 0x30f   :  { %5644 = vmatpush1.bf16.msra.mxu1 %v6976_v48  ;;  %v7136_v48 = vcombine.low %v745_v3, %v753_v42  ;;  %v5701_v18 = vrot.slane %v10079_v7, %v5700_v8  ;;  %v7461_v3 = vld [vmem:[%s10247_s3 + $0x194] ss:$8 sps:$4 sm:$0xff]   ;;  %v7459_v42 = vld [vmem:[%s10247_s3 + $0x190] ss:$8 sps:$4 sm:$0xff]  }
 0x310   :  { %5645 = vmatprep.subr.bf16.mxu1 %v6993_v49  ;;  %6137 = vmatpush1.bf16.msra.mxu0 %v7423_v10  ;;  %v7153_v49 = vcombine.high %v761_v33, %v769_v38  ;;  %v7467_v33 = vld [vmem:[%s10247_s3 + $0x1b4] ss:$8 sps:$4 sm:$0xff]   ;;  %v7465_v38 = vld [vmem:[%s10247_s3 + $0x1b0] ss:$8 sps:$4 sm:$0xff]  }
 0x311   :  { %6138 = vmatprep.subr.bf16.mxu0 %v7428_v19 }
 0x313   :  { %5646 = vmatpush1.bf16.msra.mxu1 %v6992_v52  ;;  %v7169_v52 = vcombine.high %v777_v50, %v785_v51  ;;  %v7473_v50 = vld [vmem:[%s10247_s3 + $0x1d4] ss:$8 sps:$4 sm:$0xff]   ;;  %v7471_v51 = vld [vmem:[%s10247_s3 + $0x1d0] ss:$8 sps:$4 sm:$0xff]  }
 0x314   :  { %5647 = vmatprep.subr.bf16.mxu1 %v7009_v13  ;;  %6139 = vmatpush1.bf16.msra.mxu0 %v7426_v20  ;;  %v793_v13 = vld [vmem:[%s10245_s1 + $0x17b8] sm:$0xff] }
 0x315   :  { %6140 = vmatprep.subr.bf16.mxu0 %v7431_v26 }
 0x317   :  { %5648 = vmatpush1.bf16.msra.mxu1 %v7008_v57  ;;  %v7185_v57 = vcombine.high %v793_v13, %v801_v55 }
 0x318   :  { %5649 = vmatprep.subr.bf16.mxu1 %v7025_v60  ;;  %6141 = vmatpush1.bf16.msra.mxu0 %v7429_v9  ;;  %v7184_v60 = vcombine.low %v793_v13, %v801_v55  ;;  %v7479_v13 = vld [vmem:[%s10247_s3 + $0x1f4] ss:$8 sps:$4 sm:$0xff]   ;;  %v7477_v55 = vld [vmem:[%s10247_s3 + $0x1f0] ss:$8 sps:$4 sm:$0xff]  }
 0x319   :  { %6151 = vmatprep.subr.bf16.mxu0 %v7434_v28  ;;  %v7452_v28 = vld [vmem:[%s10247_s3 + $0x164] ss:$8 sps:$4 sm:$0xff]  }
 0x31b   :  { %5650 = vmatpush1.bf16.msra.mxu1 %v7024_v2 }
 0x31c   :  { %5651 = vmatprep.subr.bf16.mxu1 %v7041_v4 }
 0x31f   :  { %5652 = vmatpush1.bf16.msra.mxu1 %v7040_v15 }
 0x320   :  { %5653 = vmatprep.subr.bf16.mxu1 %v7057_v16 }
 0x323   :  { %5654 = vmatpush1.bf16.msra.mxu1 %v7056_v21 }
 0x324   :  { %5655 = vmatprep.subr.bf16.mxu1 %v7073_v23 }
 0x327   :  { %5656 = vmatpush1.bf16.msra.mxu1 %v7072_v27 }
 0x328   :  { %5657 = vmatprep.subr.bf16.mxu1 %v7089_v29  ;;  %v7446_v29 = vld [vmem:[%s10247_s3 + $0x144] ss:$8 sps:$4 sm:$0xff]  }
 0x32b   :  { %5658 = vmatpush1.bf16.msra.mxu1 %v7088_v34  ;;  %v7447_v34 = vld [vmem:[%s10247_s3 + $0x150] ss:$8 sps:$4 sm:$0xff]  }
 0x32c   :  { %5659 = vmatprep.subr.bf16.mxu1 %v7105_v36  ;;  %v7450_v36 = vld [vmem:[%s10247_s3 + $0x160] ss:$8 sps:$4 sm:$0xff]  }
 0x32f   :  { %5660 = vmatpush1.bf16.msra.mxu1 %v7104_v40  ;;  %v7458_v40 = vld [vmem:[%s10247_s3 + $0x184] ss:$8 sps:$4 sm:$0xff]  }
 0x330   :  { %5661 = vmatprep.subr.bf16.mxu1 %v7121_v41  ;;  %v7456_v41 = vld [vmem:[%s10247_s3 + $0x180] ss:$8 sps:$4 sm:$0xff]  }
 0x333   :  { %5662 = vmatpush1.bf16.msra.mxu1 %v7120_v45  ;;  %v7464_v45 = vld [vmem:[%s10247_s3 + $0x1a4] ss:$8 sps:$4 sm:$0xff]  }
 0x334   :  { %5663 = vmatprep.subr.bf16.mxu1 %v7137_v47  ;;  %v7462_v47 = vld [vmem:[%s10247_s3 + $0x1a0] ss:$8 sps:$4 sm:$0xff]  }
 0x337   :  { %5664 = vmatpush1.bf16.msra.mxu1 %v7136_v48  ;;  %v7470_v48 = vld [vmem:[%s10247_s3 + $0x1c4] ss:$8 sps:$4 sm:$0xff]  }
 0x338   :  { %5665 = vmatprep.subr.bf16.mxu1 %v7153_v49  ;;  %v7468_v49 = vld [vmem:[%s10247_s3 + $0x1c0] ss:$8 sps:$4 sm:$0xff]  }
 0x33b   :  { %5666 = vmatpush1.bf16.msra.mxu1 %v7152_v22  ;;  %v7476_v22 = vld [vmem:[%s10247_s3 + $0x1e4] ss:$8 sps:$4 sm:$0xff]  }
 0x33c   :  { %5667 = vmatprep.subr.bf16.mxu1 %v7169_v52  ;;  %v7474_v52 = vld [vmem:[%s10247_s3 + $0x1e0] ss:$8 sps:$4 sm:$0xff]  }
 0x33f   :  { %5668 = vmatpush1.bf16.msra.mxu1 %v7168_v56  ;;  %v5704_v56 = vsub.s32 2, %v7612_v44 }
 0x340   :  { %5669 = vmatprep.subr.bf16.mxu1 %v7185_v57  ;;  %v5708_v57 = vsub.s32 3, %v7612_v44 }
 0x343   :  { %5670 = vmatpush1.bf16.msra.mxu1 %v7184_v60 }
 0x346   :  { %5672 = vmatmul.mubr.bf16.vlgmr.msra.gmra.mrb[16].mxu1 %v7705_v32  ;;  %v5697_v32 = vrot.slane %v10079_v7, %v5696_v5 }
 0x359   :  { %v10071_v61 = vpop.f32.mrb[12].mxu1 }
 0x35a   :  { %v10073_v1 = vpop.f32.mrb[13].mxu1 }
 0x35b   :  { %v5431_v2 = vpop.f32.mrb[14].mxu1 }
 0x35c   :  { %v5432_v4 = vpop.f32.mrb[15].mxu1 }
 0x35d   :  { %v5705_v4 = vrot.slane %v10079_v7, %v5704_v56 }
 0x39b   :  { %v5550_v10 = vpop.f32.mrb[12].mxu0 }
 0x39c   :  { %v5684_v15 = vmax.f32 %v9821_v12, %v5550_v10  ;;  %v5552_v16 = vpop.f32.mrb[13].mxu0  ;;  %v5709_v10 = vrot.slane %v10079_v7, %v5708_v57 }
 0x39d   :  { %v5685_v17 = vmax.f32 %v9823_v14, %v5552_v16  ;;  %v5554_v19 = vpop.f32.mrb[14].mxu0  ;;  %v7432_v14 = vld [vmem:[%s10247_s3 + $0x100] ss:$8 sps:$4 sm:$0xff]  }
 0x39e   :  { %v5688_v20 = vmax.f32 %v5680_v43, %v5684_v15  ;;  %v5555_v21 = vpop.f32.mrb[15].mxu0  ;;  %v7438_v43 = vld [vmem:[%s10247_s3 + $0x120] ss:$8 sps:$4 sm:$0xff]  }
 0x39f   :  { %v5689_v23 = vmax.f32 %v5681_v46, %v5685_v17  ;;  %v7441_v46 = vld [vmem:[%s10247_s3 + $0x130] ss:$8 sps:$4 sm:$0xff]  }
 0x3a0   :  { %v5714_v24 = vadd.f32 %v5697_v32, %v5688_v20 }
 0x3a1   :  { %v5715_v25 = vadd.f32 %v5701_v18, %v5689_v23 }
 0x3a2   :  { %v5718_v12 = vmax.f32 %v5714_v24, 0.0  ;;  %v7484_v24 = vld [vmem:[%s10250_s7] sm:$0xff]  }
 0x3a3   :  { %v5719_v26 = vmax.f32 %v5715_v25, 0.0  ;;  %v7485_v25 = vld [vmem:[%s10250_s7 + $0x8] sm:$0xff]  }
 0x3a4   :  { %v5722_v27 = vpack.c.bf16 %v5718_v12, %v5718_v12  ;;  %v7486_v12 = vld [vmem:[%s10250_s7 + $0x10] sm:$0xff]  }
 0x3a5   :  { %v5723_v9 = vpack.c.bf16 %v5719_v26, %v5719_v26  ;;  %v7487_v26 = vld [vmem:[%s10250_s7 + $0x18] sm:$0xff]  }
 0x3a7   :  { %6142 = vmatprep.mubr.bf16.mxu0 %v5723_v9  ;;  %v7488_v9 = vld [vmem:[%s10250_s7 + $0x20] sm:$0xff]  }
 0x3a8   :  { %6143 = vmatmul.mubr.bf16.vlgmr.msra.gmra.mrb[16].mxu0 %v5722_v27 }
 0x3a9   :  { %6152 = vmatpush1.bf16.msra.mxu0 %v7432_v14  ;;  %v7489_v14 = vld [vmem:[%s10250_s7 + $0x28] sm:$0xff]  }
 0x3aa   :  { %6153 = vmatprep.subr.bf16.mxu0 %v7437_v30 }
 0x3ad   :  { %6154 = vmatpush1.bf16.msra.mxu0 %v7435_v35 }
 0x3ae   :  { %6155 = vmatprep.subr.bf16.mxu0 %v7440_v62 }
 0x3b1   :  { %6156 = vmatpush1.bf16.msra.mxu0 %v7438_v43  ;;  %v7250_v43 = vld [vmem:[%s10251_s4] ss:$0 sm:$0xff] }
 0x3b2   :  { %6157 = vmatprep.subr.bf16.mxu0 %v7443_v53 }
 0x3b5   :  { %6158 = vmatpush1.bf16.msra.mxu0 %v7441_v46 }
 0x3b6   :  { %6159 = vmatprep.subr.bf16.mxu0 %v7446_v29 }
 0x3b9   :  { %6160 = vmatpush1.bf16.msra.mxu0 %v7444_v63 }
 0x3ba   :  { %6161 = vmatprep.subr.bf16.mxu0 %v7449_v31  ;;  %v7490_v31 = vld [vmem:[%s10250_s7 + $0x30] sm:$0xff]  }
 0x3bd   :  { %6162 = vmatpush1.bf16.msra.mxu0 %v7447_v34  ;;  %v7491_v34 = vld [vmem:[%s10250_s7 + $0x38] ss:$0 sps:$4 sm:$0xff]  }
 0x3be   :  { %6163 = vmatprep.subr.bf16.mxu0 %v7452_v28  ;;  %v6371_v28 = vsel %vm6369_vm2, %v7491_v34, 0 }
 0x3c1   :  { %6164 = vmatpush1.bf16.msra.mxu0 %v7450_v36  ;;  %v7251_v36 = vld [vmem:[%s10252_s6] ss:$0 sm:$0xff] }
 0x3c2   :  { %6165 = vmatprep.subr.bf16.mxu0 %v7455_v37 }
 0x3c5   :  { %6166 = vmatpush1.bf16.msra.mxu0 %v7453_v39 }
 0x3c6   :  { %6167 = vmatprep.subr.bf16.mxu0 %v7458_v40 }
 0x3c9   :  { %6168 = vmatpush1.bf16.msra.mxu0 %v7456_v41 }
 0x3ca   :  { %6169 = vmatprep.subr.bf16.mxu0 %v7461_v3 }
 0x3cd   :  { %6170 = vmatpush1.bf16.msra.mxu0 %v7459_v42 }
 0x3ce   :  { %6171 = vmatprep.subr.bf16.mxu0 %v7464_v45 }
 0x3d1   :  { %6172 = vmatpush1.bf16.msra.mxu0 %v7462_v47  ;;  %v7257_v47 = vld [vmem:[%s10253_s8] ss:$0 sm:$0xff] }
 0x3d2   :  { %6173 = vmatprep.subr.bf16.mxu0 %v7467_v33 }
 0x3d5   :  { %6174 = vmatpush1.bf16.msra.mxu0 %v7465_v38 }
 0x3d6   :  { %6175 = vmatprep.subr.bf16.mxu0 %v7470_v48 }
 0x3d9   :  { %6176 = vmatpush1.bf16.msra.mxu0 %v7468_v49 }
 0x3da   :  { %6177 = vmatprep.subr.bf16.mxu0 %v7473_v50 }
 0x3dd   :  { %6178 = vmatpush1.bf16.msra.mxu0 %v7471_v51 }
 0x3de   :  { %6179 = vmatprep.subr.bf16.mxu0 %v7476_v22 }
 0x3e1   :  { %6180 = vmatpush1.bf16.msra.mxu0 %v7474_v52 }
 0x3e2   :  { %6181 = vmatprep.subr.bf16.mxu0 %v7479_v13 }
 0x3e5   :  { %6182 = vmatpush1.bf16.msra.mxu0 %v7477_v55 }
 0x419   :  { %v5673_v60 = vpop.f32.mrb[16].mxu1 }
 0x41a   :  { %v5686_v2 = vmax.f32 %v10071_v61, %v5673_v60  ;;  %v5675_v5 = vpop.f32.mrb[17].mxu1 }
 0x41b   :  { %v5687_v8 = vmax.f32 %v10073_v1, %v5675_v5  ;;  %v5677_v15 = vpop.f32.mrb[18].mxu1  ;;  %v7493_v1 = vmov 0.0  }
 0x41c   :  { %v5690_v32 = vmax.f32 %v5682_v58, %v5686_v2  ;;  %v5678_v16 = vpop.f32.mrb[19].mxu1  ;;  %7281 = vmatprep.subr.bf16.mxu0 %v7493_v1  ;;  %7293 = vmatprep.subr.bf16.mxu1 %v7493_v1  ;;  %v7483_v58 = vld [vmem:[%s10249_s5 + $0x18] sm:$0xff]  }
 0x41d   :  { %v5691_v44 = vmax.f32 %v5683_v0, %v5687_v8  ;;  %7309 = vmatprep.mubr.msk.bf16.mxu1 %vm7495_vm0, %v7493_v1  ;;  %7294 = vmatpush3.bf16.msra.mxu1 %v7484_v24 }
 0x41e   :  { %v5716_v17 = vadd.f32 %v5705_v4, %v5690_v32  ;;  %7295 = vmatprep.subr.bf16.mxu1 %v7493_v1 }
 0x41f   :  { %v5717_v18 = vadd.f32 %v5709_v10, %v5691_v44 }
 0x420   :  { %v5720_v61 = vmax.f32 %v5716_v17, 0.0 }
 0x421   :  { %v5721_v19 = vmax.f32 %v5717_v18, 0.0  ;;  %7296 = vmatpush3.bf16.msra.mxu1 %v7485_v25 }
 0x422   :  { %v5724_v21 = vpack.c.bf16 %v5720_v61, %v5720_v61  ;;  %7297 = vmatprep.subr.bf16.mxu1 %v7493_v1 }
 0x423   :  { %v5725_v20 = vpack.c.bf16 %v5721_v19, %v5721_v19 }
 0x425   :  { %6183 = vmatprep.mubr.bf16.mxu0 %v5725_v20  ;;  %7298 = vmatpush3.bf16.msra.mxu1 %v7486_v12 }
 0x426   :  { %6184 = vmatmul.mubr.bf16.vlgmr.msra.gmra.mrb[16].mxu0 %v5724_v21  ;;  %7299 = vmatprep.subr.bf16.mxu1 %v7493_v1 }
 0x427   :  { %7282 = vmatpush3.bf16.msra.mxu0 %v7480_v6  ;;  %7289 = vmatprep.mubr.msk.bf16.mxu0 %vm7495_vm0, %v7493_v1 }
 0x428   :  { %7283 = vmatprep.subr.bf16.mxu0 %v7493_v1 }
 0x429   :  { %7300 = vmatpush3.bf16.msra.mxu1 %v7487_v26 }
 0x42a   :  { %7301 = vmatprep.subr.bf16.mxu1 %v7493_v1 }
 0x42b   :  { %7284 = vmatpush3.bf16.msra.mxu0 %v7481_v11 }
 0x42c   :  { %7285 = vmatprep.subr.bf16.mxu0 %v7493_v1 }
 0x42d   :  { %7302 = vmatpush3.bf16.msra.mxu1 %v7488_v9 }
 0x42e   :  { %7303 = vmatprep.subr.bf16.mxu1 %v7493_v1 }
 0x42f   :  { %7286 = vmatpush3.bf16.msra.mxu0 %v7482_v54 }
 0x430   :  { %7287 = vmatprep.subr.bf16.mxu0 %v7493_v1 }
 0x431   :  { %7304 = vmatpush3.bf16.msra.mxu1 %v7489_v14 }
 0x432   :  { %7305 = vmatprep.subr.bf16.mxu1 %v7493_v1 }
 0x433   :  { %7288 = vmatpush3.bf16.msra.mxu0 %v7483_v58 }
 0x435   :  { %7306 = vmatpush3.bf16.msra.mxu1 %v7490_v31 }
 0x436   :  { %7307 = vmatprep.subr.bf16.mxu1 %v7493_v1 }
 0x439   :  { %7308 = vmatpush3.bf16.msra.mxu1 %v6371_v28 }
 0x4f9   :  { %v6185_v59 = vpop.f32.mrb[16].mxu0 }
 0x4fa   :  { %6193 = vrot.lane.b32.xlu0 %v6185_v59, %s7494_s30  ;;  %v6187_v0 = vpop.f32.mrb[17].mxu0 }
 0x4fb   :  { %v6189_v7 = vpop.f32.mrb[18].mxu0 }
 0x4fc   :  { %v6190_v23 = vpop.f32.mrb[19].mxu0 }
 0x4fe   :  { %6198 = vrot.lane.b32.xlu0 %v6187_v0, %s7494_s30 }
 0x56c   :  { %v6194_v27 = vpop.permute.xlu0 %6193 }
 0x56d   :  { %v6196_v35 = vmax.f32 %v6185_v59, %v6194_v27 }
 0x570   :  { %v6199_v30 = vpop.permute.xlu0 %6198 }
 0x571   :  { %v6201_v62 = vmax.f32 %v6187_v0, %v6199_v30 }
 0x573   :  { %v6202_v53 = vmax.f32 %v6196_v35, %v6201_v62 }
 0x575   :  { %v6210_v46 = vadd.f32 %v7250_v43, %v6202_v53 }
 0x577   :  { %v6211_v29 = vmax.f32 %v6210_v46, 0.0 }
 0x579   :  { %v6212_v63 = vpack.c.bf16 %v6211_v29, %v6211_v29 }
 0x57b   :  { %7290 = vmatmul.mubr.msk.bf16.vlgmr.msra.gmra.mrb[20].mxu0 %vm6252_vm1, %v6212_v63 }
 0x64e   :  { %v6290_v37 = vpop.f32.mrb[20].mxu0 }
 0x64f   :  { %v6291_v39 = vadd.f32 %v7251_v36, %v6290_v37  ;;  %v7291_v40 = vpop.f32.mrb[21].mxu0 }
 0x650   :  { %v6293_v41 = vpop.f32.mrb[22].mxu0 }
 0x651   :  { %v6296_v3 = vmax.f32 %v6291_v39, 0.0  ;;  %v7292_v42 = vpop.f32.mrb[23].mxu0 }
 0x653   :  { %v6297_v45 = vpack.c.bf16 %v6296_v3, %v6296_v3 }
 0x655   :  { %7310 = vmatmul.mubr.msk.bf16.vlgmr.msra.gmra.mrb[20].mxu1 %vm6365_vm3, %v6297_v45 }
 0x728   :  { %v6407_v33 = vpop.f32.mrb[20].mxu1 }
 0x729   :  { %v6408_v38 = vadd.f32 %v7257_v47, %v6407_v33  ;;  %v7311_v48 = vpop.f32.mrb[21].mxu1 }
 0x72a   :  { %v6410_v49 = vpop.f32.mrb[22].mxu1 }
 0x72b   :  { %6413 = vst [vmem:[%s10254_s9] sm:$0x3] %v6408_v38  ;;  %v7312_v50 = vpop.f32.mrb[23].mxu1 }

</bundles_post_ra>
